<compile_context>
chip_gen: v6e
topology: v6e:2x2x1
jax: 0.10.0
libtpu: 0.0.40
codegen_flags: <defaults>
</compile_context>

<pallas_src>
import jax
import jax.numpy as jnp
from jax.experimental import pallas as pl
from jax.experimental.pallas import tpu as pltpu

# ---------------- configuration (small, consistent with the module) ----------------
B, S, D_IN, E, H, L = 2, 8, 16, 32, 4, 2        # batch, seq_len, input_dim, embed, heads, layers
FF = 2048                                        # PyTorch default dim_feedforward
HD = E // H                                      # head dim
LN_EPS = 1e-5
FCHUNK = 256                                     # FFN tile width along the FF axis
assert FF % FCHUNK == 0


def _layer_norm(x, w, b):
    mu = jnp.mean(x, axis=-1, keepdims=True)
    var = jnp.mean((x - mu) ** 2, axis=-1, keepdims=True)
    return (x - mu) * jax.lax.rsqrt(var + LN_EPS) * w + b


# ------------------------------- fused Pallas kernel --------------------------------
def fused_transformer_kernel(x_ref, wemb_ref, bemb_ref, pos_ref,
                             wqkv_ref, bqkv_ref, wo_ref, bo_ref,
                             ln1w_ref, ln1b_ref, ln2w_ref, ln2b_ref,
                             w1_ref, b1_ref, w2_ref, b2_ref,
                             o_ref):
    # ---- embedding + positional encoding (pos already tiled to (B*S, E)) ----
    h = jnp.dot(x_ref[...], wemb_ref[...], preferred_element_type=jnp.float32)
    h = h + bemb_ref[...] + pos_ref[...]                          # (B*S, E)

    scale = 1.0 / (HD ** 0.5)
    for l in range(L):                                            # static loop over layers
        # ---------------- multi-head self-attention (post-norm) ----------------
        qkv = jnp.dot(h, wqkv_ref[l], preferred_element_type=jnp.float32) + bqkv_ref[l]
        qkv3 = qkv.reshape(B, S, 3 * E)                           # [q | k | v] blocks
        attn = jnp.zeros((B * S, E), jnp.float32)
        for hh in range(H):                                       # static loop over heads
            qh = qkv3[:, :, hh * HD:(hh + 1) * HD]                # (B, S, HD)
            kh = qkv3[:, :, E + hh * HD:E + (hh + 1) * HD]
            vh = qkv3[:, :, 2 * E + hh * HD:2 * E + (hh + 1) * HD]
            s = jnp.einsum('bqd,bkd->bqk', qh, kh,
                           preferred_element_type=jnp.float32) * scale
            s = s - jnp.max(s, axis=-1, keepdims=True)
            p = jnp.exp(s)
            p = p * pl.reciprocal(jnp.sum(p, axis=-1, keepdims=True), approx=True)
            oh = jnp.einsum('bqk,bkd->bqd', p, vh,
                            preferred_element_type=jnp.float32)   # (B, S, HD)
            # accumulate through matching W_o row-block (== concat + single matmul)
            attn = attn + jnp.dot(oh.reshape(B * S, HD),
                                  wo_ref[l, hh * HD:(hh + 1) * HD, :],
                                  preferred_element_type=jnp.float32)
        attn = attn + bo_ref[l]
        h = _layer_norm(h + attn, ln1w_ref[l], ln1b_ref[l])       # residual + LN1

        # ---------------- feed-forward (Linear -> ReLU -> Linear), FF-tiled -----
        ff = jnp.zeros((B * S, E), jnp.float32)
        for c in range(FF // FCHUNK):                             # static chunk loop
            c0 = c * FCHUNK
            h1 = jnp.dot(h, w1_ref[l, :, c0:c0 + FCHUNK],
                         preferred_element_type=jnp.float32)
            h1 = jnp.maximum(h1 + b1_ref[l, :, c0:c0 + FCHUNK], 0.0)
            ff = ff + jnp.dot(h1, w2_ref[l, c0:c0 + FCHUNK, :],
                              preferred_element_type=jnp.float32)
        ff = ff + b2_ref[l]
        h = _layer_norm(h + ff, ln2w_ref[l], ln2b_ref[l])         # residual + LN2

    # ---- mean over the sequence axis (== x.mean(dim=0) in seq-major layout) ----
    o_ref[...] = jnp.mean(h.reshape(B, S, E), axis=1)


# ------------------------------- parameters -----------------------------------------
def init_params(key):
    k = jax.random.split(key, 6)
    return {
        # stored pre-transposed so the kernel does plain x @ W
        'w_emb': jax.random.normal(k[0], (D_IN, E), jnp.float32) * 0.02,
        'b_emb': jnp.zeros((1, E), jnp.float32),
        'pos':   jax.random.normal(k[1], (S, E), jnp.float32),
        # per-layer weights stacked along a leading L axis
        'w_qkv': jax.random.normal(k[2], (L, E, 3 * E), jnp.float32) * 0.02,
        'b_qkv': jnp.zeros((L, 1, 3 * E), jnp.float32),
        'w_o':   jax.random.normal(k[3], (L, E, E), jnp.float32) * 0.02,
        'b_o':   jnp.zeros((L, 1, E), jnp.float32),
        'ln1_w': jnp.ones((L, 1, E), jnp.float32),
        'ln1_b': jnp.zeros((L, 1, E), jnp.float32),
        'ln2_w': jnp.ones((L, 1, E), jnp.float32),
        'ln2_b': jnp.zeros((L, 1, E), jnp.float32),
        'w1':    jax.random.normal(k[4], (L, E, FF), jnp.float32) * 0.02,
        'b1':    jnp.zeros((L, 1, FF), jnp.float32),
        'w2':    jax.random.normal(k[5], (L, FF, E), jnp.float32) * 0.02,
        'b2':    jnp.zeros((L, 1, E), jnp.float32),
    }


# ------------------------------- forward wrapper -------------------------------------
@jax.jit
def transformer_backbone(params, x):
    # Wrapper-side layout plumbing (free XLA reshapes): flatten to (B*S, D_IN) and
    # pre-tile the positional encoding so the kernel only sees 2-D operands.
    x2 = x.reshape(B * S, D_IN)
    pos_full = jnp.tile(params['pos'], (B, 1))                    # (B*S, E)
    operands = (x2, params['w_emb'], params['b_emb'], pos_full,
                params['w_qkv'], params['b_qkv'], params['w_o'], params['b_o'],
                params['ln1_w'], params['ln1_b'], params['ln2_w'], params['ln2_b'],
                params['w1'], params['b1'], params['w2'], params['b2'])
    vmem = pl.BlockSpec(memory_space=pltpu.MemorySpace.VMEM)
    return pl.pallas_call(
        fused_transformer_kernel,
        out_shape=jax.ShapeDtypeStruct((B, E), jnp.float32),
        in_specs=[vmem] * len(operands),
        out_specs=vmem,
    )(*operands)


if __name__ == "__main__":
    key = jax.random.PRNGKey(0)
    pkey, xkey = jax.random.split(key)
    params = init_params(pkey)
    x = jax.random.normal(xkey, (B, S, D_IN), jnp.float32)        # (batch, seq, input_dim)

    out = transformer_backbone(params, x)
    jax.block_until_ready(out)
    assert out.shape == (B, E), out.shape
    assert bool(jnp.all(jnp.isfinite(out)))
    # TODO(synk): dropout inside nn.TransformerEncoderLayer is identity here (eval mode).
    print("KERNEL_OK")
</pallas_src>

<mosaic_0001>
module attributes {stable_mosaic.version = 11 : i64} {
  func.func @fused_transformer_kernel(%arg0: memref<16x16xf32, #tpu.memory_space<vmem>>, %arg1: memref<16x32xf32, #tpu.memory_space<vmem>>, %arg2: memref<1x32xf32, #tpu.memory_space<vmem>>, %arg3: memref<16x32xf32, #tpu.memory_space<vmem>>, %arg4: memref<2x32x96xf32, #tpu.memory_space<vmem>>, %arg5: memref<2x1x96xf32, #tpu.memory_space<vmem>>, %arg6: memref<2x32x32xf32, #tpu.memory_space<vmem>>, %arg7: memref<2x1x32xf32, #tpu.memory_space<vmem>>, %arg8: memref<2x1x32xf32, #tpu.memory_space<vmem>>, %arg9: memref<2x1x32xf32, #tpu.memory_space<vmem>>, %arg10: memref<2x1x32xf32, #tpu.memory_space<vmem>>, %arg11: memref<2x1x32xf32, #tpu.memory_space<vmem>>, %arg12: memref<2x32x2048xf32, #tpu.memory_space<vmem>>, %arg13: memref<2x1x2048xf32, #tpu.memory_space<vmem>>, %arg14: memref<2x2048x32xf32, #tpu.memory_space<vmem>>, %arg15: memref<2x1x32xf32, #tpu.memory_space<vmem>>, %arg16: memref<2x32xf32, #tpu.memory_space<vmem>>) attributes {dimension_semantics = [], scalar_prefetch = 0 : i64, scratch_operands = 0 : i64, tpu.core_type = #tpu.core_type<tc>} {
    %c0 = arith.constant 0 : index
    %c0_0 = arith.constant 0 : index
    %0 = vector.load %arg0[%c0, %c0_0] : memref<16x16xf32, #tpu.memory_space<vmem>>, vector<16x16xf32>
    %c0_1 = arith.constant 0 : index
    %c0_2 = arith.constant 0 : index
    %1 = vector.load %arg1[%c0_1, %c0_2] : memref<16x32xf32, #tpu.memory_space<vmem>>, vector<16x32xf32>
    %cst = arith.constant dense<0.000000e+00> : vector<16x32xf32>
    %2 = tpu.matmul %0, %1, %cst {dimension_numbers = #tpu.dot_dimension_numbers<[1], [0], [0], [1], [0, 0, 1, 1], [], []>} : vector<16x16xf32>, vector<16x32xf32>, vector<16x32xf32> -> vector<16x32xf32>
    %c0_3 = arith.constant 0 : index
    %c0_4 = arith.constant 0 : index
    %3 = vector.load %arg2[%c0_3, %c0_4] : memref<1x32xf32, #tpu.memory_space<vmem>>, vector<1x32xf32>
    %4 = vector.broadcast %3 : vector<1x32xf32> to vector<16x32xf32>
    %5 = arith.addf %2, %4 : vector<16x32xf32>
    %c0_5 = arith.constant 0 : index
    %c0_6 = arith.constant 0 : index
    %6 = vector.load %arg3[%c0_5, %c0_6] : memref<16x32xf32, #tpu.memory_space<vmem>>, vector<16x32xf32>
    %7 = arith.addf %5, %6 : vector<16x32xf32>
    %c0_7 = arith.constant 0 : index
    %c0_8 = arith.constant 0 : index
    %c0_9 = arith.constant 0 : index
    %8 = vector.load %arg4[%c0_7, %c0_8, %c0_9] : memref<2x32x96xf32, #tpu.memory_space<vmem>>, vector<1x32x96xf32>
    %9 = vector.shape_cast %8 : vector<1x32x96xf32> to vector<32x96xf32>
    %cst_10 = arith.constant dense<0.000000e+00> : vector<16x96xf32>
    %10 = tpu.matmul %7, %9, %cst_10 {dimension_numbers = #tpu.dot_dimension_numbers<[1], [0], [0], [1], [0, 0, 1, 1], [], []>} : vector<16x32xf32>, vector<32x96xf32>, vector<16x96xf32> -> vector<16x96xf32>
    %c0_11 = arith.constant 0 : index
    %c0_12 = arith.constant 0 : index
    %c0_13 = arith.constant 0 : index
    %11 = vector.load %arg5[%c0_11, %c0_12, %c0_13] : memref<2x1x96xf32, #tpu.memory_space<vmem>>, vector<1x1x96xf32>
    %12 = vector.shape_cast %11 : vector<1x1x96xf32> to vector<1x96xf32>
    %13 = vector.broadcast %12 : vector<1x96xf32> to vector<16x96xf32>
    %14 = arith.addf %10, %13 : vector<16x96xf32>
    %15 = vector.shape_cast %14 : vector<16x96xf32> to vector<2x8x96xf32>
    %cst_14 = arith.constant 0.000000e+00 : f32
    %16 = vector.broadcast %cst_14 : f32 to vector<16x32xf32>
    %17 = vector.extract_strided_slice %15 {offsets = [0, 0, 0], sizes = [2, 8, 8], strides = [1, 1, 1]} : vector<2x8x96xf32> to vector<2x8x8xf32>
    %18 = vector.extract_strided_slice %15 {offsets = [0, 0, 32], sizes = [2, 8, 8], strides = [1, 1, 1]} : vector<2x8x96xf32> to vector<2x8x8xf32>
    %19 = vector.extract_strided_slice %15 {offsets = [0, 0, 64], sizes = [2, 8, 8], strides = [1, 1, 1]} : vector<2x8x96xf32> to vector<2x8x8xf32>
    "tpu.trace_start"() <{level = 10 : i32, message = "bqd,bkd->bqk"}> : () -> ()
    %cst_15 = arith.constant dense<0.000000e+00> : vector<2x8x8xf32>
    %20 = tpu.matmul %17, %18, %cst_15 {dimension_numbers = #tpu.dot_dimension_numbers<[2], [2], [1], [1], [0, 0, 0, 1, 1, 1], [0], [0]>} : vector<2x8x8xf32>, vector<2x8x8xf32>, vector<2x8x8xf32> -> vector<2x8x8xf32>
    "tpu.trace_stop"() : () -> ()
    %cst_16 = arith.constant 0.353553385 : f32
    %21 = vector.broadcast %cst_16 : f32 to vector<2x8x8xf32>
    %22 = arith.mulf %20, %21 : vector<2x8x8xf32>
    %cst_17 = arith.constant dense<0xFF800000> : vector<2x8xf32>
    %23 = vector.multi_reduction <maximumf>, %22, %cst_17 [2] : vector<2x8x8xf32> to vector<2x8xf32>
    %24 = vector.shape_cast %23 : vector<2x8xf32> to vector<2x8x1xf32>
    %25 = vector.broadcast %24 : vector<2x8x1xf32> to vector<2x8x8xf32>
    %26 = arith.subf %22, %25 : vector<2x8x8xf32>
    %27 = math.exp %26 : vector<2x8x8xf32>
    %cst_18 = arith.constant dense<0.000000e+00> : vector<2x8xf32>
    %28 = vector.multi_reduction <add>, %27, %cst_18 [2] : vector<2x8x8xf32> to vector<2x8xf32>
    %29 = vector.shape_cast %28 : vector<2x8xf32> to vector<2x8x1xf32>
    %30 = tpu.reciprocal %29 {approx = true} : vector<2x8x1xf32> -> vector<2x8x1xf32>
    %31 = vector.broadcast %30 : vector<2x8x1xf32> to vector<2x8x8xf32>
    %32 = arith.mulf %27, %31 : vector<2x8x8xf32>
    "tpu.trace_start"() <{level = 10 : i32, message = "bqk,bkd->bqd"}> : () -> ()
    %cst_19 = arith.constant dense<0.000000e+00> : vector<2x8x8xf32>
    %33 = tpu.matmul %32, %19, %cst_19 {dimension_numbers = #tpu.dot_dimension_numbers<[2], [1], [1], [2], [0, 0, 0, 1, 1, 2], [0], [0]>} : vector<2x8x8xf32>, vector<2x8x8xf32>, vector<2x8x8xf32> -> vector<2x8x8xf32>
    "tpu.trace_stop"() : () -> ()
    %34 = vector.shape_cast %33 : vector<2x8x8xf32> to vector<16x8xf32>
    %c0_20 = arith.constant 0 : index
    %c0_21 = arith.constant 0 : index
    %c0_22 = arith.constant 0 : index
    %35 = vector.load %arg6[%c0_20, %c0_21, %c0_22] : memref<2x32x32xf32, #tpu.memory_space<vmem>>, vector<1x8x32xf32>
    %36 = vector.shape_cast %35 : vector<1x8x32xf32> to vector<8x32xf32>
    %cst_23 = arith.constant dense<0.000000e+00> : vector<16x32xf32>
    %37 = tpu.matmul %34, %36, %cst_23 {dimension_numbers = #tpu.dot_dimension_numbers<[1], [0], [0], [1], [0, 0, 1, 1], [], []>} : vector<16x8xf32>, vector<8x32xf32>, vector<16x32xf32> -> vector<16x32xf32>
    %38 = arith.addf %16, %37 : vector<16x32xf32>
    %39 = vector.extract_strided_slice %15 {offsets = [0, 0, 8], sizes = [2, 8, 8], strides = [1, 1, 1]} : vector<2x8x96xf32> to vector<2x8x8xf32>
    %40 = vector.extract_strided_slice %15 {offsets = [0, 0, 40], sizes = [2, 8, 8], strides = [1, 1, 1]} : vector<2x8x96xf32> to vector<2x8x8xf32>
    %41 = vector.extract_strided_slice %15 {offsets = [0, 0, 72], sizes = [2, 8, 8], strides = [1, 1, 1]} : vector<2x8x96xf32> to vector<2x8x8xf32>
    "tpu.trace_start"() <{level = 10 : i32, message = "bqd,bkd->bqk"}> : () -> ()
    %cst_24 = arith.constant dense<0.000000e+00> : vector<2x8x8xf32>
    %42 = tpu.matmul %39, %40, %cst_24 {dimension_numbers = #tpu.dot_dimension_numbers<[2], [2], [1], [1], [0, 0, 0, 1, 1, 1], [0], [0]>} : vector<2x8x8xf32>, vector<2x8x8xf32>, vector<2x8x8xf32> -> vector<2x8x8xf32>
    "tpu.trace_stop"() : () -> ()
    %cst_25 = arith.constant 0.353553385 : f32
    %43 = vector.broadcast %cst_25 : f32 to vector<2x8x8xf32>
    %44 = arith.mulf %42, %43 : vector<2x8x8xf32>
    %cst_26 = arith.constant dense<0xFF800000> : vector<2x8xf32>
    %45 = vector.multi_reduction <maximumf>, %44, %cst_26 [2] : vector<2x8x8xf32> to vector<2x8xf32>
    %46 = vector.shape_cast %45 : vector<2x8xf32> to vector<2x8x1xf32>
    %47 = vector.broadcast %46 : vector<2x8x1xf32> to vector<2x8x8xf32>
    %48 = arith.subf %44, %47 : vector<2x8x8xf32>
    %49 = math.exp %48 : vector<2x8x8xf32>
    %cst_27 = arith.constant dense<0.000000e+00> : vector<2x8xf32>
    %50 = vector.multi_reduction <add>, %49, %cst_27 [2] : vector<2x8x8xf32> to vector<2x8xf32>
    %51 = vector.shape_cast %50 : vector<2x8xf32> to vector<2x8x1xf32>
    %52 = tpu.reciprocal %51 {approx = true} : vector<2x8x1xf32> -> vector<2x8x1xf32>
    %53 = vector.broadcast %52 : vector<2x8x1xf32> to vector<2x8x8xf32>
    %54 = arith.mulf %49, %53 : vector<2x8x8xf32>
    "tpu.trace_start"() <{level = 10 : i32, message = "bqk,bkd->bqd"}> : () -> ()
    %cst_28 = arith.constant dense<0.000000e+00> : vector<2x8x8xf32>
    %55 = tpu.matmul %54, %41, %cst_28 {dimension_numbers = #tpu.dot_dimension_numbers<[2], [1], [1], [2], [0, 0, 0, 1, 1, 2], [0], [0]>} : vector<2x8x8xf32>, vector<2x8x8xf32>, vector<2x8x8xf32> -> vector<2x8x8xf32>
    "tpu.trace_stop"() : () -> ()
    %56 = vector.shape_cast %55 : vector<2x8x8xf32> to vector<16x8xf32>
    %c0_29 = arith.constant 0 : index
    %c8 = arith.constant 8 : index
    %c0_30 = arith.constant 0 : index
    %57 = vector.load %arg6[%c0_29, %c8, %c0_30] : memref<2x32x32xf32, #tpu.memory_space<vmem>>, vector<1x8x32xf32>
    %58 = vector.shape_cast %57 : vector<1x8x32xf32> to vector<8x32xf32>
    %cst_31 = arith.constant dense<0.000000e+00> : vector<16x32xf32>
    %59 = tpu.matmul %56, %58, %cst_31 {dimension_numbers = #tpu.dot_dimension_numbers<[1], [0], [0], [1], [0, 0, 1, 1], [], []>} : vector<16x8xf32>, vector<8x32xf32>, vector<16x32xf32> -> vector<16x32xf32>
    %60 = arith.addf %38, %59 : vector<16x32xf32>
    %61 = vector.extract_strided_slice %15 {offsets = [0, 0, 16], sizes = [2, 8, 8], strides = [1, 1, 1]} : vector<2x8x96xf32> to vector<2x8x8xf32>
    %62 = vector.extract_strided_slice %15 {offsets = [0, 0, 48], sizes = [2, 8, 8], strides = [1, 1, 1]} : vector<2x8x96xf32> to vector<2x8x8xf32>
    %63 = vector.extract_strided_slice %15 {offsets = [0, 0, 80], sizes = [2, 8, 8], strides = [1, 1, 1]} : vector<2x8x96xf32> to vector<2x8x8xf32>
    "tpu.trace_start"() <{level = 10 : i32, message = "bqd,bkd->bqk"}> : () -> ()
    %cst_32 = arith.constant dense<0.000000e+00> : vector<2x8x8xf32>
    %64 = tpu.matmul %61, %62, %cst_32 {dimension_numbers = #tpu.dot_dimension_numbers<[2], [2], [1], [1], [0, 0, 0, 1, 1, 1], [0], [0]>} : vector<2x8x8xf32>, vector<2x8x8xf32>, vector<2x8x8xf32> -> vector<2x8x8xf32>
    "tpu.trace_stop"() : () -> ()
    %cst_33 = arith.constant 0.353553385 : f32
    %65 = vector.broadcast %cst_33 : f32 to vector<2x8x8xf32>
    %66 = arith.mulf %64, %65 : vector<2x8x8xf32>
    %cst_34 = arith.constant dense<0xFF800000> : vector<2x8xf32>
    %67 = vector.multi_reduction <maximumf>, %66, %cst_34 [2] : vector<2x8x8xf32> to vector<2x8xf32>
    %68 = vector.shape_cast %67 : vector<2x8xf32> to vector<2x8x1xf32>
    %69 = vector.broadcast %68 : vector<2x8x1xf32> to vector<2x8x8xf32>
    %70 = arith.subf %66, %69 : vector<2x8x8xf32>
    %71 = math.exp %70 : vector<2x8x8xf32>
    %cst_35 = arith.constant dense<0.000000e+00> : vector<2x8xf32>
    %72 = vector.multi_reduction <add>, %71, %cst_35 [2] : vector<2x8x8xf32> to vector<2x8xf32>
    %73 = vector.shape_cast %72 : vector<2x8xf32> to vector<2x8x1xf32>
    %74 = tpu.reciprocal %73 {approx = true} : vector<2x8x1xf32> -> vector<2x8x1xf32>
    %75 = vector.broadcast %74 : vector<2x8x1xf32> to vector<2x8x8xf32>
    %76 = arith.mulf %71, %75 : vector<2x8x8xf32>
    "tpu.trace_start"() <{level = 10 : i32, message = "bqk,bkd->bqd"}> : () -> ()
    %cst_36 = arith.constant dense<0.000000e+00> : vector<2x8x8xf32>
    %77 = tpu.matmul %76, %63, %cst_36 {dimension_numbers = #tpu.dot_dimension_numbers<[2], [1], [1], [2], [0, 0, 0, 1, 1, 2], [0], [0]>} : vector<2x8x8xf32>, vector<2x8x8xf32>, vector<2x8x8xf32> -> vector<2x8x8xf32>
    "tpu.trace_stop"() : () -> ()
    %78 = vector.shape_cast %77 : vector<2x8x8xf32> to vector<16x8xf32>
    %c0_37 = arith.constant 0 : index
    %c16 = arith.constant 16 : index
    %c0_38 = arith.constant 0 : index
    %79 = vector.load %arg6[%c0_37, %c16, %c0_38] : memref<2x32x32xf32, #tpu.memory_space<vmem>>, vector<1x8x32xf32>
    %80 = vector.shape_cast %79 : vector<1x8x32xf32> to vector<8x32xf32>
    %cst_39 = arith.constant dense<0.000000e+00> : vector<16x32xf32>
    %81 = tpu.matmul %78, %80, %cst_39 {dimension_numbers = #tpu.dot_dimension_numbers<[1], [0], [0], [1], [0, 0, 1, 1], [], []>} : vector<16x8xf32>, vector<8x32xf32>, vector<16x32xf32> -> vector<16x32xf32>
    %82 = arith.addf %60, %81 : vector<16x32xf32>
    %83 = vector.extract_strided_slice %15 {offsets = [0, 0, 24], sizes = [2, 8, 8], strides = [1, 1, 1]} : vector<2x8x96xf32> to vector<2x8x8xf32>
    %84 = vector.extract_strided_slice %15 {offsets = [0, 0, 56], sizes = [2, 8, 8], strides = [1, 1, 1]} : vector<2x8x96xf32> to vector<2x8x8xf32>
    %85 = vector.extract_strided_slice %15 {offsets = [0, 0, 88], sizes = [2, 8, 8], strides = [1, 1, 1]} : vector<2x8x96xf32> to vector<2x8x8xf32>
    "tpu.trace_start"() <{level = 10 : i32, message = "bqd,bkd->bqk"}> : () -> ()
    %cst_40 = arith.constant dense<0.000000e+00> : vector<2x8x8xf32>
    %86 = tpu.matmul %83, %84, %cst_40 {dimension_numbers = #tpu.dot_dimension_numbers<[2], [2], [1], [1], [0, 0, 0, 1, 1, 1], [0], [0]>} : vector<2x8x8xf32>, vector<2x8x8xf32>, vector<2x8x8xf32> -> vector<2x8x8xf32>
    "tpu.trace_stop"() : () -> ()
    %cst_41 = arith.constant 0.353553385 : f32
    %87 = vector.broadcast %cst_41 : f32 to vector<2x8x8xf32>
    %88 = arith.mulf %86, %87 : vector<2x8x8xf32>
    %cst_42 = arith.constant dense<0xFF800000> : vector<2x8xf32>
    %89 = vector.multi_reduction <maximumf>, %88, %cst_42 [2] : vector<2x8x8xf32> to vector<2x8xf32>
    %90 = vector.shape_cast %89 : vector<2x8xf32> to vector<2x8x1xf32>
    %91 = vector.broadcast %90 : vector<2x8x1xf32> to vector<2x8x8xf32>
    %92 = arith.subf %88, %91 : vector<2x8x8xf32>
    %93 = math.exp %92 : vector<2x8x8xf32>
    %cst_43 = arith.constant dense<0.000000e+00> : vector<2x8xf32>
    %94 = vector.multi_reduction <add>, %93, %cst_43 [2] : vector<2x8x8xf32> to vector<2x8xf32>
    %95 = vector.shape_cast %94 : vector<2x8xf32> to vector<2x8x1xf32>
    %96 = tpu.reciprocal %95 {approx = true} : vector<2x8x1xf32> -> vector<2x8x1xf32>
    %97 = vector.broadcast %96 : vector<2x8x1xf32> to vector<2x8x8xf32>
    %98 = arith.mulf %93, %97 : vector<2x8x8xf32>
    "tpu.trace_start"() <{level = 10 : i32, message = "bqk,bkd->bqd"}> : () -> ()
    %cst_44 = arith.constant dense<0.000000e+00> : vector<2x8x8xf32>
    %99 = tpu.matmul %98, %85, %cst_44 {dimension_numbers = #tpu.dot_dimension_numbers<[2], [1], [1], [2], [0, 0, 0, 1, 1, 2], [0], [0]>} : vector<2x8x8xf32>, vector<2x8x8xf32>, vector<2x8x8xf32> -> vector<2x8x8xf32>
    "tpu.trace_stop"() : () -> ()
    %100 = vector.shape_cast %99 : vector<2x8x8xf32> to vector<16x8xf32>
    %c0_45 = arith.constant 0 : index
    %c24 = arith.constant 24 : index
    %c0_46 = arith.constant 0 : index
    %101 = vector.load %arg6[%c0_45, %c24, %c0_46] : memref<2x32x32xf32, #tpu.memory_space<vmem>>, vector<1x8x32xf32>
    %102 = vector.shape_cast %101 : vector<1x8x32xf32> to vector<8x32xf32>
    %cst_47 = arith.constant dense<0.000000e+00> : vector<16x32xf32>
    %103 = tpu.matmul %100, %102, %cst_47 {dimension_numbers = #tpu.dot_dimension_numbers<[1], [0], [0], [1], [0, 0, 1, 1], [], []>} : vector<16x8xf32>, vector<8x32xf32>, vector<16x32xf32> -> vector<16x32xf32>
    %104 = arith.addf %82, %103 : vector<16x32xf32>
    %c0_48 = arith.constant 0 : index
    %c0_49 = arith.constant 0 : index
    %c0_50 = arith.constant 0 : index
    %105 = vector.load %arg7[%c0_48, %c0_49, %c0_50] : memref<2x1x32xf32, #tpu.memory_space<vmem>>, vector<1x1x32xf32>
    %106 = vector.shape_cast %105 : vector<1x1x32xf32> to vector<1x32xf32>
    %107 = vector.broadcast %106 : vector<1x32xf32> to vector<16x32xf32>
    %108 = arith.addf %104, %107 : vector<16x32xf32>
    %109 = arith.addf %7, %108 : vector<16x32xf32>
    %c0_51 = arith.constant 0 : index
    %c0_52 = arith.constant 0 : index
    %c0_53 = arith.constant 0 : index
    %110 = vector.load %arg8[%c0_51, %c0_52, %c0_53] : memref<2x1x32xf32, #tpu.memory_space<vmem>>, vector<1x1x32xf32>
    %111 = vector.shape_cast %110 : vector<1x1x32xf32> to vector<1x32xf32>
    %c0_54 = arith.constant 0 : index
    %c0_55 = arith.constant 0 : index
    %c0_56 = arith.constant 0 : index
    %112 = vector.load %arg9[%c0_54, %c0_55, %c0_56] : memref<2x1x32xf32, #tpu.memory_space<vmem>>, vector<1x1x32xf32>
    %113 = vector.shape_cast %112 : vector<1x1x32xf32> to vector<1x32xf32>
    %cst_57 = arith.constant dense<0.000000e+00> : vector<16xf32>
    %114 = vector.multi_reduction <add>, %109, %cst_57 [1] : vector<16x32xf32> to vector<16xf32>
    %115 = vector.shape_cast %114 : vector<16xf32> to vector<16x1xf32>
    %cst_58 = arith.constant 3.200000e+01 : f32
    %116 = vector.broadcast %cst_58 : f32 to vector<16x1xf32>
    %117 = arith.divf %115, %116 : vector<16x1xf32>
    %118 = vector.broadcast %117 : vector<16x1xf32> to vector<16x32xf32>
    %119 = arith.subf %109, %118 : vector<16x32xf32>
    %120 = arith.mulf %119, %119 : vector<16x32xf32>
    %cst_59 = arith.constant dense<0.000000e+00> : vector<16xf32>
    %121 = vector.multi_reduction <add>, %120, %cst_59 [1] : vector<16x32xf32> to vector<16xf32>
    %122 = vector.shape_cast %121 : vector<16xf32> to vector<16x1xf32>
    %cst_60 = arith.constant 3.200000e+01 : f32
    %123 = vector.broadcast %cst_60 : f32 to vector<16x1xf32>
    %124 = arith.divf %122, %123 : vector<16x1xf32>
    %125 = vector.broadcast %117 : vector<16x1xf32> to vector<16x32xf32>
    %126 = arith.subf %109, %125 : vector<16x32xf32>
    %cst_61 = arith.constant 9.99999974E-6 : f32
    %127 = vector.broadcast %cst_61 : f32 to vector<16x1xf32>
    %128 = arith.addf %124, %127 : vector<16x1xf32>
    %129 = math.rsqrt %128 : vector<16x1xf32>
    %130 = vector.broadcast %129 : vector<16x1xf32> to vector<16x32xf32>
    %131 = arith.mulf %126, %130 : vector<16x32xf32>
    %132 = vector.broadcast %111 : vector<1x32xf32> to vector<16x32xf32>
    %133 = arith.mulf %131, %132 : vector<16x32xf32>
    %134 = vector.broadcast %113 : vector<1x32xf32> to vector<16x32xf32>
    %135 = arith.addf %133, %134 : vector<16x32xf32>
    %cst_62 = arith.constant 0.000000e+00 : f32
    %136 = vector.broadcast %cst_62 : f32 to vector<16x32xf32>
    %c0_63 = arith.constant 0 : index
    %c0_64 = arith.constant 0 : index
    %c0_65 = arith.constant 0 : index
    %137 = vector.load %arg12[%c0_63, %c0_64, %c0_65] : memref<2x32x2048xf32, #tpu.memory_space<vmem>>, vector<1x32x256xf32>
    %138 = vector.shape_cast %137 : vector<1x32x256xf32> to vector<32x256xf32>
    %cst_66 = arith.constant dense<0.000000e+00> : vector<16x256xf32>
    %139 = tpu.matmul %135, %138, %cst_66 {dimension_numbers = #tpu.dot_dimension_numbers<[1], [0], [0], [1], [0, 0, 1, 1], [], []>} : vector<16x32xf32>, vector<32x256xf32>, vector<16x256xf32> -> vector<16x256xf32>
    %c0_67 = arith.constant 0 : index
    %c0_68 = arith.constant 0 : index
    %c0_69 = arith.constant 0 : index
    %140 = vector.load %arg13[%c0_67, %c0_68, %c0_69] : memref<2x1x2048xf32, #tpu.memory_space<vmem>>, vector<1x1x256xf32>
    %141 = vector.shape_cast %140 : vector<1x1x256xf32> to vector<1x256xf32>
    %142 = vector.broadcast %141 : vector<1x256xf32> to vector<16x256xf32>
    %143 = arith.addf %139, %142 : vector<16x256xf32>
    %cst_70 = arith.constant 0.000000e+00 : f32
    %144 = vector.broadcast %cst_70 : f32 to vector<16x256xf32>
    %145 = arith.maximumf %143, %144 : vector<16x256xf32>
    %c0_71 = arith.constant 0 : index
    %c0_72 = arith.constant 0 : index
    %c0_73 = arith.constant 0 : index
    %146 = vector.load %arg14[%c0_71, %c0_72, %c0_73] : memref<2x2048x32xf32, #tpu.memory_space<vmem>>, vector<1x256x32xf32>
    %147 = vector.shape_cast %146 : vector<1x256x32xf32> to vector<256x32xf32>
    %cst_74 = arith.constant dense<0.000000e+00> : vector<16x32xf32>
    %148 = tpu.matmul %145, %147, %cst_74 {dimension_numbers = #tpu.dot_dimension_numbers<[1], [0], [0], [1], [0, 0, 1, 1], [], []>} : vector<16x256xf32>, vector<256x32xf32>, vector<16x32xf32> -> vector<16x32xf32>
    %149 = arith.addf %136, %148 : vector<16x32xf32>
    %c0_75 = arith.constant 0 : index
    %c0_76 = arith.constant 0 : index
    %c256 = arith.constant 256 : index
    %150 = vector.load %arg12[%c0_75, %c0_76, %c256] : memref<2x32x2048xf32, #tpu.memory_space<vmem>>, vector<1x32x256xf32>
    %151 = vector.shape_cast %150 : vector<1x32x256xf32> to vector<32x256xf32>
    %cst_77 = arith.constant dense<0.000000e+00> : vector<16x256xf32>
    %152 = tpu.matmul %135, %151, %cst_77 {dimension_numbers = #tpu.dot_dimension_numbers<[1], [0], [0], [1], [0, 0, 1, 1], [], []>} : vector<16x32xf32>, vector<32x256xf32>, vector<16x256xf32> -> vector<16x256xf32>
    %c0_78 = arith.constant 0 : index
    %c0_79 = arith.constant 0 : index
    %c256_80 = arith.constant 256 : index
    %153 = vector.load %arg13[%c0_78, %c0_79, %c256_80] : memref<2x1x2048xf32, #tpu.memory_space<vmem>>, vector<1x1x256xf32>
    %154 = vector.shape_cast %153 : vector<1x1x256xf32> to vector<1x256xf32>
    %155 = vector.broadcast %154 : vector<1x256xf32> to vector<16x256xf32>
    %156 = arith.addf %152, %155 : vector<16x256xf32>
    %cst_81 = arith.constant 0.000000e+00 : f32
    %157 = vector.broadcast %cst_81 : f32 to vector<16x256xf32>
    %158 = arith.maximumf %156, %157 : vector<16x256xf32>
    %c0_82 = arith.constant 0 : index
    %c256_83 = arith.constant 256 : index
    %c0_84 = arith.constant 0 : index
    %159 = vector.load %arg14[%c0_82, %c256_83, %c0_84] : memref<2x2048x32xf32, #tpu.memory_space<vmem>>, vector<1x256x32xf32>
    %160 = vector.shape_cast %159 : vector<1x256x32xf32> to vector<256x32xf32>
    %cst_85 = arith.constant dense<0.000000e+00> : vector<16x32xf32>
    %161 = tpu.matmul %158, %160, %cst_85 {dimension_numbers = #tpu.dot_dimension_numbers<[1], [0], [0], [1], [0, 0, 1, 1], [], []>} : vector<16x256xf32>, vector<256x32xf32>, vector<16x32xf32> -> vector<16x32xf32>
    %162 = arith.addf %149, %161 : vector<16x32xf32>
    %c0_86 = arith.constant 0 : index
    %c0_87 = arith.constant 0 : index
    %c512 = arith.constant 512 : index
    %163 = vector.load %arg12[%c0_86, %c0_87, %c512] : memref<2x32x2048xf32, #tpu.memory_space<vmem>>, vector<1x32x256xf32>
    %164 = vector.shape_cast %163 : vector<1x32x256xf32> to vector<32x256xf32>
    %cst_88 = arith.constant dense<0.000000e+00> : vector<16x256xf32>
    %165 = tpu.matmul %135, %164, %cst_88 {dimension_numbers = #tpu.dot_dimension_numbers<[1], [0], [0], [1], [0, 0, 1, 1], [], []>} : vector<16x32xf32>, vector<32x256xf32>, vector<16x256xf32> -> vector<16x256xf32>
    %c0_89 = arith.constant 0 : index
    %c0_90 = arith.constant 0 : index
    %c512_91 = arith.constant 512 : index
    %166 = vector.load %arg13[%c0_89, %c0_90, %c512_91] : memref<2x1x2048xf32, #tpu.memory_space<vmem>>, vector<1x1x256xf32>
    %167 = vector.shape_cast %166 : vector<1x1x256xf32> to vector<1x256xf32>
    %168 = vector.broadcast %167 : vector<1x256xf32> to vector<16x256xf32>
    %169 = arith.addf %165, %168 : vector<16x256xf32>
    %cst_92 = arith.constant 0.000000e+00 : f32
    %170 = vector.broadcast %cst_92 : f32 to vector<16x256xf32>
    %171 = arith.maximumf %169, %170 : vector<16x256xf32>
    %c0_93 = arith.constant 0 : index
    %c512_94 = arith.constant 512 : index
    %c0_95 = arith.constant 0 : index
    %172 = vector.load %arg14[%c0_93, %c512_94, %c0_95] : memref<2x2048x32xf32, #tpu.memory_space<vmem>>, vector<1x256x32xf32>
    %173 = vector.shape_cast %172 : vector<1x256x32xf32> to vector<256x32xf32>
    %cst_96 = arith.constant dense<0.000000e+00> : vector<16x32xf32>
    %174 = tpu.matmul %171, %173, %cst_96 {dimension_numbers = #tpu.dot_dimension_numbers<[1], [0], [0], [1], [0, 0, 1, 1], [], []>} : vector<16x256xf32>, vector<256x32xf32>, vector<16x32xf32> -> vector<16x32xf32>
    %175 = arith.addf %162, %174 : vector<16x32xf32>
    %c0_97 = arith.constant 0 : index
    %c0_98 = arith.constant 0 : index
    %c768 = arith.constant 768 : index
    %176 = vector.load %arg12[%c0_97, %c0_98, %c768] : memref<2x32x2048xf32, #tpu.memory_space<vmem>>, vector<1x32x256xf32>
    %177 = vector.shape_cast %176 : vector<1x32x256xf32> to vector<32x256xf32>
    %cst_99 = arith.constant dense<0.000000e+00> : vector<16x256xf32>
    %178 = tpu.matmul %135, %177, %cst_99 {dimension_numbers = #tpu.dot_dimension_numbers<[1], [0], [0], [1], [0, 0, 1, 1], [], []>} : vector<16x32xf32>, vector<32x256xf32>, vector<16x256xf32> -> vector<16x256xf32>
    %c0_100 = arith.constant 0 : index
    %c0_101 = arith.constant 0 : index
    %c768_102 = arith.constant 768 : index
    %179 = vector.load %arg13[%c0_100, %c0_101, %c768_102] : memref<2x1x2048xf32, #tpu.memory_space<vmem>>, vector<1x1x256xf32>
    %180 = vector.shape_cast %179 : vector<1x1x256xf32> to vector<1x256xf32>
    %181 = vector.broadcast %180 : vector<1x256xf32> to vector<16x256xf32>
    %182 = arith.addf %178, %181 : vector<16x256xf32>
    %cst_103 = arith.constant 0.000000e+00 : f32
    %183 = vector.broadcast %cst_103 : f32 to vector<16x256xf32>
    %184 = arith.maximumf %182, %183 : vector<16x256xf32>
    %c0_104 = arith.constant 0 : index
    %c768_105 = arith.constant 768 : index
    %c0_106 = arith.constant 0 : index
    %185 = vector.load %arg14[%c0_104, %c768_105, %c0_106] : memref<2x2048x32xf32, #tpu.memory_space<vmem>>, vector<1x256x32xf32>
    %186 = vector.shape_cast %185 : vector<1x256x32xf32> to vector<256x32xf32>
    %cst_107 = arith.constant dense<0.000000e+00> : vector<16x32xf32>
    %187 = tpu.matmul %184, %186, %cst_107 {dimension_numbers = #tpu.dot_dimension_numbers<[1], [0], [0], [1], [0, 0, 1, 1], [], []>} : vector<16x256xf32>, vector<256x32xf32>, vector<16x32xf32> -> vector<16x32xf32>
    %188 = arith.addf %175, %187 : vector<16x32xf32>
    %c0_108 = arith.constant 0 : index
    %c0_109 = arith.constant 0 : index
    %c1024 = arith.constant 1024 : index
    %189 = vector.load %arg12[%c0_108, %c0_109, %c1024] : memref<2x32x2048xf32, #tpu.memory_space<vmem>>, vector<1x32x256xf32>
    %190 = vector.shape_cast %189 : vector<1x32x256xf32> to vector<32x256xf32>
    %cst_110 = arith.constant dense<0.000000e+00> : vector<16x256xf32>
    %191 = tpu.matmul %135, %190, %cst_110 {dimension_numbers = #tpu.dot_dimension_numbers<[1], [0], [0], [1], [0, 0, 1, 1], [], []>} : vector<16x32xf32>, vector<32x256xf32>, vector<16x256xf32> -> vector<16x256xf32>
    %c0_111 = arith.constant 0 : index
    %c0_112 = arith.constant 0 : index
    %c1024_113 = arith.constant 1024 : index
    %192 = vector.load %arg13[%c0_111, %c0_112, %c1024_113] : memref<2x1x2048xf32, #tpu.memory_space<vmem>>, vector<1x1x256xf32>
    %193 = vector.shape_cast %192 : vector<1x1x256xf32> to vector<1x256xf32>
    %194 = vector.broadcast %193 : vector<1x256xf32> to vector<16x256xf32>
    %195 = arith.addf %191, %194 : vector<16x256xf32>
    %cst_114 = arith.constant 0.000000e+00 : f32
    %196 = vector.broadcast %cst_114 : f32 to vector<16x256xf32>
    %197 = arith.maximumf %195, %196 : vector<16x256xf32>
    %c0_115 = arith.constant 0 : index
    %c1024_116 = arith.constant 1024 : index
    %c0_117 = arith.constant 0 : index
    %198 = vector.load %arg14[%c0_115, %c1024_116, %c0_117] : memref<2x2048x32xf32, #tpu.memory_space<vmem>>, vector<1x256x32xf32>
    %199 = vector.shape_cast %198 : vector<1x256x32xf32> to vector<256x32xf32>
    %cst_118 = arith.constant dense<0.000000e+00> : vector<16x32xf32>
    %200 = tpu.matmul %197, %199, %cst_118 {dimension_numbers = #tpu.dot_dimension_numbers<[1], [0], [0], [1], [0, 0, 1, 1], [], []>} : vector<16x256xf32>, vector<256x32xf32>, vector<16x32xf32> -> vector<16x32xf32>
    %201 = arith.addf %188, %200 : vector<16x32xf32>
    %c0_119 = arith.constant 0 : index
    %c0_120 = arith.constant 0 : index
    %c1280 = arith.constant 1280 : index
    %202 = vector.load %arg12[%c0_119, %c0_120, %c1280] : memref<2x32x2048xf32, #tpu.memory_space<vmem>>, vector<1x32x256xf32>
    %203 = vector.shape_cast %202 : vector<1x32x256xf32> to vector<32x256xf32>
    %cst_121 = arith.constant dense<0.000000e+00> : vector<16x256xf32>
    %204 = tpu.matmul %135, %203, %cst_121 {dimension_numbers = #tpu.dot_dimension_numbers<[1], [0], [0], [1], [0, 0, 1, 1], [], []>} : vector<16x32xf32>, vector<32x256xf32>, vector<16x256xf32> -> vector<16x256xf32>
    %c0_122 = arith.constant 0 : index
    %c0_123 = arith.constant 0 : index
    %c1280_124 = arith.constant 1280 : index
    %205 = vector.load %arg13[%c0_122, %c0_123, %c1280_124] : memref<2x1x2048xf32, #tpu.memory_space<vmem>>, vector<1x1x256xf32>
    %206 = vector.shape_cast %205 : vector<1x1x256xf32> to vector<1x256xf32>
    %207 = vector.broadcast %206 : vector<1x256xf32> to vector<16x256xf32>
    %208 = arith.addf %204, %207 : vector<16x256xf32>
    %cst_125 = arith.constant 0.000000e+00 : f32
    %209 = vector.broadcast %cst_125 : f32 to vector<16x256xf32>
    %210 = arith.maximumf %208, %209 : vector<16x256xf32>
    %c0_126 = arith.constant 0 : index
    %c1280_127 = arith.constant 1280 : index
    %c0_128 = arith.constant 0 : index
    %211 = vector.load %arg14[%c0_126, %c1280_127, %c0_128] : memref<2x2048x32xf32, #tpu.memory_space<vmem>>, vector<1x256x32xf32>
    %212 = vector.shape_cast %211 : vector<1x256x32xf32> to vector<256x32xf32>
    %cst_129 = arith.constant dense<0.000000e+00> : vector<16x32xf32>
    %213 = tpu.matmul %210, %212, %cst_129 {dimension_numbers = #tpu.dot_dimension_numbers<[1], [0], [0], [1], [0, 0, 1, 1], [], []>} : vector<16x256xf32>, vector<256x32xf32>, vector<16x32xf32> -> vector<16x32xf32>
    %214 = arith.addf %201, %213 : vector<16x32xf32>
    %c0_130 = arith.constant 0 : index
    %c0_131 = arith.constant 0 : index
    %c1536 = arith.constant 1536 : index
    %215 = vector.load %arg12[%c0_130, %c0_131, %c1536] : memref<2x32x2048xf32, #tpu.memory_space<vmem>>, vector<1x32x256xf32>
    %216 = vector.shape_cast %215 : vector<1x32x256xf32> to vector<32x256xf32>
    %cst_132 = arith.constant dense<0.000000e+00> : vector<16x256xf32>
    %217 = tpu.matmul %135, %216, %cst_132 {dimension_numbers = #tpu.dot_dimension_numbers<[1], [0], [0], [1], [0, 0, 1, 1], [], []>} : vector<16x32xf32>, vector<32x256xf32>, vector<16x256xf32> -> vector<16x256xf32>
    %c0_133 = arith.constant 0 : index
    %c0_134 = arith.constant 0 : index
    %c1536_135 = arith.constant 1536 : index
    %218 = vector.load %arg13[%c0_133, %c0_134, %c1536_135] : memref<2x1x2048xf32, #tpu.memory_space<vmem>>, vector<1x1x256xf32>
    %219 = vector.shape_cast %218 : vector<1x1x256xf32> to vector<1x256xf32>
    %220 = vector.broadcast %219 : vector<1x256xf32> to vector<16x256xf32>
    %221 = arith.addf %217, %220 : vector<16x256xf32>
    %cst_136 = arith.constant 0.000000e+00 : f32
    %222 = vector.broadcast %cst_136 : f32 to vector<16x256xf32>
    %223 = arith.maximumf %221, %222 : vector<16x256xf32>
    %c0_137 = arith.constant 0 : index
    %c1536_138 = arith.constant 1536 : index
    %c0_139 = arith.constant 0 : index
    %224 = vector.load %arg14[%c0_137, %c1536_138, %c0_139] : memref<2x2048x32xf32, #tpu.memory_space<vmem>>, vector<1x256x32xf32>
    %225 = vector.shape_cast %224 : vector<1x256x32xf32> to vector<256x32xf32>
    %cst_140 = arith.constant dense<0.000000e+00> : vector<16x32xf32>
    %226 = tpu.matmul %223, %225, %cst_140 {dimension_numbers = #tpu.dot_dimension_numbers<[1], [0], [0], [1], [0, 0, 1, 1], [], []>} : vector<16x256xf32>, vector<256x32xf32>, vector<16x32xf32> -> vector<16x32xf32>
    %227 = arith.addf %214, %226 : vector<16x32xf32>
    %c0_141 = arith.constant 0 : index
    %c0_142 = arith.constant 0 : index
    %c1792 = arith.constant 1792 : index
    %228 = vector.load %arg12[%c0_141, %c0_142, %c1792] : memref<2x32x2048xf32, #tpu.memory_space<vmem>>, vector<1x32x256xf32>
    %229 = vector.shape_cast %228 : vector<1x32x256xf32> to vector<32x256xf32>
    %cst_143 = arith.constant dense<0.000000e+00> : vector<16x256xf32>
    %230 = tpu.matmul %135, %229, %cst_143 {dimension_numbers = #tpu.dot_dimension_numbers<[1], [0], [0], [1], [0, 0, 1, 1], [], []>} : vector<16x32xf32>, vector<32x256xf32>, vector<16x256xf32> -> vector<16x256xf32>
    %c0_144 = arith.constant 0 : index
    %c0_145 = arith.constant 0 : index
    %c1792_146 = arith.constant 1792 : index
    %231 = vector.load %arg13[%c0_144, %c0_145, %c1792_146] : memref<2x1x2048xf32, #tpu.memory_space<vmem>>, vector<1x1x256xf32>
    %232 = vector.shape_cast %231 : vector<1x1x256xf32> to vector<1x256xf32>
    %233 = vector.broadcast %232 : vector<1x256xf32> to vector<16x256xf32>
    %234 = arith.addf %230, %233 : vector<16x256xf32>
    %cst_147 = arith.constant 0.000000e+00 : f32
    %235 = vector.broadcast %cst_147 : f32 to vector<16x256xf32>
    %236 = arith.maximumf %234, %235 : vector<16x256xf32>
    %c0_148 = arith.constant 0 : index
    %c1792_149 = arith.constant 1792 : index
    %c0_150 = arith.constant 0 : index
    %237 = vector.load %arg14[%c0_148, %c1792_149, %c0_150] : memref<2x2048x32xf32, #tpu.memory_space<vmem>>, vector<1x256x32xf32>
    %238 = vector.shape_cast %237 : vector<1x256x32xf32> to vector<256x32xf32>
    %cst_151 = arith.constant dense<0.000000e+00> : vector<16x32xf32>
    %239 = tpu.matmul %236, %238, %cst_151 {dimension_numbers = #tpu.dot_dimension_numbers<[1], [0], [0], [1], [0, 0, 1, 1], [], []>} : vector<16x256xf32>, vector<256x32xf32>, vector<16x32xf32> -> vector<16x32xf32>
    %240 = arith.addf %227, %239 : vector<16x32xf32>
    %c0_152 = arith.constant 0 : index
    %c0_153 = arith.constant 0 : index
    %c0_154 = arith.constant 0 : index
    %241 = vector.load %arg15[%c0_152, %c0_153, %c0_154] : memref<2x1x32xf32, #tpu.memory_space<vmem>>, vector<1x1x32xf32>
    %242 = vector.shape_cast %241 : vector<1x1x32xf32> to vector<1x32xf32>
    %243 = vector.broadcast %242 : vector<1x32xf32> to vector<16x32xf32>
    %244 = arith.addf %240, %243 : vector<16x32xf32>
    %245 = arith.addf %135, %244 : vector<16x32xf32>
    %c0_155 = arith.constant 0 : index
    %c0_156 = arith.constant 0 : index
    %c0_157 = arith.constant 0 : index
    %246 = vector.load %arg10[%c0_155, %c0_156, %c0_157] : memref<2x1x32xf32, #tpu.memory_space<vmem>>, vector<1x1x32xf32>
    %247 = vector.shape_cast %246 : vector<1x1x32xf32> to vector<1x32xf32>
    %c0_158 = arith.constant 0 : index
    %c0_159 = arith.constant 0 : index
    %c0_160 = arith.constant 0 : index
    %248 = vector.load %arg11[%c0_158, %c0_159, %c0_160] : memref<2x1x32xf32, #tpu.memory_space<vmem>>, vector<1x1x32xf32>
    %249 = vector.shape_cast %248 : vector<1x1x32xf32> to vector<1x32xf32>
    %cst_161 = arith.constant dense<0.000000e+00> : vector<16xf32>
    %250 = vector.multi_reduction <add>, %245, %cst_161 [1] : vector<16x32xf32> to vector<16xf32>
    %251 = vector.shape_cast %250 : vector<16xf32> to vector<16x1xf32>
    %cst_162 = arith.constant 3.200000e+01 : f32
    %252 = vector.broadcast %cst_162 : f32 to vector<16x1xf32>
    %253 = arith.divf %251, %252 : vector<16x1xf32>
    %254 = vector.broadcast %253 : vector<16x1xf32> to vector<16x32xf32>
    %255 = arith.subf %245, %254 : vector<16x32xf32>
    %256 = arith.mulf %255, %255 : vector<16x32xf32>
    %cst_163 = arith.constant dense<0.000000e+00> : vector<16xf32>
    %257 = vector.multi_reduction <add>, %256, %cst_163 [1] : vector<16x32xf32> to vector<16xf32>
    %258 = vector.shape_cast %257 : vector<16xf32> to vector<16x1xf32>
    %cst_164 = arith.constant 3.200000e+01 : f32
    %259 = vector.broadcast %cst_164 : f32 to vector<16x1xf32>
    %260 = arith.divf %258, %259 : vector<16x1xf32>
    %261 = vector.broadcast %253 : vector<16x1xf32> to vector<16x32xf32>
    %262 = arith.subf %245, %261 : vector<16x32xf32>
    %cst_165 = arith.constant 9.99999974E-6 : f32
    %263 = vector.broadcast %cst_165 : f32 to vector<16x1xf32>
    %264 = arith.addf %260, %263 : vector<16x1xf32>
    %265 = math.rsqrt %264 : vector<16x1xf32>
    %266 = vector.broadcast %265 : vector<16x1xf32> to vector<16x32xf32>
    %267 = arith.mulf %262, %266 : vector<16x32xf32>
    %268 = vector.broadcast %247 : vector<1x32xf32> to vector<16x32xf32>
    %269 = arith.mulf %267, %268 : vector<16x32xf32>
    %270 = vector.broadcast %249 : vector<1x32xf32> to vector<16x32xf32>
    %271 = arith.addf %269, %270 : vector<16x32xf32>
    %c1 = arith.constant 1 : index
    %c0_166 = arith.constant 0 : index
    %c0_167 = arith.constant 0 : index
    %272 = vector.load %arg4[%c1, %c0_166, %c0_167] : memref<2x32x96xf32, #tpu.memory_space<vmem>>, vector<1x32x96xf32>
    %273 = vector.shape_cast %272 : vector<1x32x96xf32> to vector<32x96xf32>
    %cst_168 = arith.constant dense<0.000000e+00> : vector<16x96xf32>
    %274 = tpu.matmul %271, %273, %cst_168 {dimension_numbers = #tpu.dot_dimension_numbers<[1], [0], [0], [1], [0, 0, 1, 1], [], []>} : vector<16x32xf32>, vector<32x96xf32>, vector<16x96xf32> -> vector<16x96xf32>
    %c1_169 = arith.constant 1 : index
    %c0_170 = arith.constant 0 : index
    %c0_171 = arith.constant 0 : index
    %275 = vector.load %arg5[%c1_169, %c0_170, %c0_171] : memref<2x1x96xf32, #tpu.memory_space<vmem>>, vector<1x1x96xf32>
    %276 = vector.shape_cast %275 : vector<1x1x96xf32> to vector<1x96xf32>
    %277 = vector.broadcast %276 : vector<1x96xf32> to vector<16x96xf32>
    %278 = arith.addf %274, %277 : vector<16x96xf32>
    %279 = vector.shape_cast %278 : vector<16x96xf32> to vector<2x8x96xf32>
    %cst_172 = arith.constant 0.000000e+00 : f32
    %280 = vector.broadcast %cst_172 : f32 to vector<16x32xf32>
    %281 = vector.extract_strided_slice %279 {offsets = [0, 0, 0], sizes = [2, 8, 8], strides = [1, 1, 1]} : vector<2x8x96xf32> to vector<2x8x8xf32>
    %282 = vector.extract_strided_slice %279 {offsets = [0, 0, 32], sizes = [2, 8, 8], strides = [1, 1, 1]} : vector<2x8x96xf32> to vector<2x8x8xf32>
    %283 = vector.extract_strided_slice %279 {offsets = [0, 0, 64], sizes = [2, 8, 8], strides = [1, 1, 1]} : vector<2x8x96xf32> to vector<2x8x8xf32>
    "tpu.trace_start"() <{level = 10 : i32, message = "bqd,bkd->bqk"}> : () -> ()
    %cst_173 = arith.constant dense<0.000000e+00> : vector<2x8x8xf32>
    %284 = tpu.matmul %281, %282, %cst_173 {dimension_numbers = #tpu.dot_dimension_numbers<[2], [2], [1], [1], [0, 0, 0, 1, 1, 1], [0], [0]>} : vector<2x8x8xf32>, vector<2x8x8xf32>, vector<2x8x8xf32> -> vector<2x8x8xf32>
    "tpu.trace_stop"() : () -> ()
    %cst_174 = arith.constant 0.353553385 : f32
    %285 = vector.broadcast %cst_174 : f32 to vector<2x8x8xf32>
    %286 = arith.mulf %284, %285 : vector<2x8x8xf32>
    %cst_175 = arith.constant dense<0xFF800000> : vector<2x8xf32>
    %287 = vector.multi_reduction <maximumf>, %286, %cst_175 [2] : vector<2x8x8xf32> to vector<2x8xf32>
    %288 = vector.shape_cast %287 : vector<2x8xf32> to vector<2x8x1xf32>
    %289 = vector.broadcast %288 : vector<2x8x1xf32> to vector<2x8x8xf32>
    %290 = arith.subf %286, %289 : vector<2x8x8xf32>
    %291 = math.exp %290 : vector<2x8x8xf32>
    %cst_176 = arith.constant dense<0.000000e+00> : vector<2x8xf32>
    %292 = vector.multi_reduction <add>, %291, %cst_176 [2] : vector<2x8x8xf32> to vector<2x8xf32>
    %293 = vector.shape_cast %292 : vector<2x8xf32> to vector<2x8x1xf32>
    %294 = tpu.reciprocal %293 {approx = true} : vector<2x8x1xf32> -> vector<2x8x1xf32>
    %295 = vector.broadcast %294 : vector<2x8x1xf32> to vector<2x8x8xf32>
    %296 = arith.mulf %291, %295 : vector<2x8x8xf32>
    "tpu.trace_start"() <{level = 10 : i32, message = "bqk,bkd->bqd"}> : () -> ()
    %cst_177 = arith.constant dense<0.000000e+00> : vector<2x8x8xf32>
    %297 = tpu.matmul %296, %283, %cst_177 {dimension_numbers = #tpu.dot_dimension_numbers<[2], [1], [1], [2], [0, 0, 0, 1, 1, 2], [0], [0]>} : vector<2x8x8xf32>, vector<2x8x8xf32>, vector<2x8x8xf32> -> vector<2x8x8xf32>
    "tpu.trace_stop"() : () -> ()
    %298 = vector.shape_cast %297 : vector<2x8x8xf32> to vector<16x8xf32>
    %c1_178 = arith.constant 1 : index
    %c0_179 = arith.constant 0 : index
    %c0_180 = arith.constant 0 : index
    %299 = vector.load %arg6[%c1_178, %c0_179, %c0_180] : memref<2x32x32xf32, #tpu.memory_space<vmem>>, vector<1x8x32xf32>
    %300 = vector.shape_cast %299 : vector<1x8x32xf32> to vector<8x32xf32>
    %cst_181 = arith.constant dense<0.000000e+00> : vector<16x32xf32>
    %301 = tpu.matmul %298, %300, %cst_181 {dimension_numbers = #tpu.dot_dimension_numbers<[1], [0], [0], [1], [0, 0, 1, 1], [], []>} : vector<16x8xf32>, vector<8x32xf32>, vector<16x32xf32> -> vector<16x32xf32>
    %302 = arith.addf %280, %301 : vector<16x32xf32>
    %303 = vector.extract_strided_slice %279 {offsets = [0, 0, 8], sizes = [2, 8, 8], strides = [1, 1, 1]} : vector<2x8x96xf32> to vector<2x8x8xf32>
    %304 = vector.extract_strided_slice %279 {offsets = [0, 0, 40], sizes = [2, 8, 8], strides = [1, 1, 1]} : vector<2x8x96xf32> to vector<2x8x8xf32>
    %305 = vector.extract_strided_slice %279 {offsets = [0, 0, 72], sizes = [2, 8, 8], strides = [1, 1, 1]} : vector<2x8x96xf32> to vector<2x8x8xf32>
    "tpu.trace_start"() <{level = 10 : i32, message = "bqd,bkd->bqk"}> : () -> ()
    %cst_182 = arith.constant dense<0.000000e+00> : vector<2x8x8xf32>
    %306 = tpu.matmul %303, %304, %cst_182 {dimension_numbers = #tpu.dot_dimension_numbers<[2], [2], [1], [1], [0, 0, 0, 1, 1, 1], [0], [0]>} : vector<2x8x8xf32>, vector<2x8x8xf32>, vector<2x8x8xf32> -> vector<2x8x8xf32>
    "tpu.trace_stop"() : () -> ()
    %cst_183 = arith.constant 0.353553385 : f32
    %307 = vector.broadcast %cst_183 : f32 to vector<2x8x8xf32>
    %308 = arith.mulf %306, %307 : vector<2x8x8xf32>
    %cst_184 = arith.constant dense<0xFF800000> : vector<2x8xf32>
    %309 = vector.multi_reduction <maximumf>, %308, %cst_184 [2] : vector<2x8x8xf32> to vector<2x8xf32>
    %310 = vector.shape_cast %309 : vector<2x8xf32> to vector<2x8x1xf32>
    %311 = vector.broadcast %310 : vector<2x8x1xf32> to vector<2x8x8xf32>
    %312 = arith.subf %308, %311 : vector<2x8x8xf32>
    %313 = math.exp %312 : vector<2x8x8xf32>
    %cst_185 = arith.constant dense<0.000000e+00> : vector<2x8xf32>
    %314 = vector.multi_reduction <add>, %313, %cst_185 [2] : vector<2x8x8xf32> to vector<2x8xf32>
    %315 = vector.shape_cast %314 : vector<2x8xf32> to vector<2x8x1xf32>
    %316 = tpu.reciprocal %315 {approx = true} : vector<2x8x1xf32> -> vector<2x8x1xf32>
    %317 = vector.broadcast %316 : vector<2x8x1xf32> to vector<2x8x8xf32>
    %318 = arith.mulf %313, %317 : vector<2x8x8xf32>
    "tpu.trace_start"() <{level = 10 : i32, message = "bqk,bkd->bqd"}> : () -> ()
    %cst_186 = arith.constant dense<0.000000e+00> : vector<2x8x8xf32>
    %319 = tpu.matmul %318, %305, %cst_186 {dimension_numbers = #tpu.dot_dimension_numbers<[2], [1], [1], [2], [0, 0, 0, 1, 1, 2], [0], [0]>} : vector<2x8x8xf32>, vector<2x8x8xf32>, vector<2x8x8xf32> -> vector<2x8x8xf32>
    "tpu.trace_stop"() : () -> ()
    %320 = vector.shape_cast %319 : vector<2x8x8xf32> to vector<16x8xf32>
    %c1_187 = arith.constant 1 : index
    %c8_188 = arith.constant 8 : index
    %c0_189 = arith.constant 0 : index
    %321 = vector.load %arg6[%c1_187, %c8_188, %c0_189] : memref<2x32x32xf32, #tpu.memory_space<vmem>>, vector<1x8x32xf32>
    %322 = vector.shape_cast %321 : vector<1x8x32xf32> to vector<8x32xf32>
    %cst_190 = arith.constant dense<0.000000e+00> : vector<16x32xf32>
    %323 = tpu.matmul %320, %322, %cst_190 {dimension_numbers = #tpu.dot_dimension_numbers<[1], [0], [0], [1], [0, 0, 1, 1], [], []>} : vector<16x8xf32>, vector<8x32xf32>, vector<16x32xf32> -> vector<16x32xf32>
    %324 = arith.addf %302, %323 : vector<16x32xf32>
    %325 = vector.extract_strided_slice %279 {offsets = [0, 0, 16], sizes = [2, 8, 8], strides = [1, 1, 1]} : vector<2x8x96xf32> to vector<2x8x8xf32>
    %326 = vector.extract_strided_slice %279 {offsets = [0, 0, 48], sizes = [2, 8, 8], strides = [1, 1, 1]} : vector<2x8x96xf32> to vector<2x8x8xf32>
    %327 = vector.extract_strided_slice %279 {offsets = [0, 0, 80], sizes = [2, 8, 8], strides = [1, 1, 1]} : vector<2x8x96xf32> to vector<2x8x8xf32>
    "tpu.trace_start"() <{level = 10 : i32, message = "bqd,bkd->bqk"}> : () -> ()
    %cst_191 = arith.constant dense<0.000000e+00> : vector<2x8x8xf32>
    %328 = tpu.matmul %325, %326, %cst_191 {dimension_numbers = #tpu.dot_dimension_numbers<[2], [2], [1], [1], [0, 0, 0, 1, 1, 1], [0], [0]>} : vector<2x8x8xf32>, vector<2x8x8xf32>, vector<2x8x8xf32> -> vector<2x8x8xf32>
    "tpu.trace_stop"() : () -> ()
    %cst_192 = arith.constant 0.353553385 : f32
    %329 = vector.broadcast %cst_192 : f32 to vector<2x8x8xf32>
    %330 = arith.mulf %328, %329 : vector<2x8x8xf32>
    %cst_193 = arith.constant dense<0xFF800000> : vector<2x8xf32>
    %331 = vector.multi_reduction <maximumf>, %330, %cst_193 [2] : vector<2x8x8xf32> to vector<2x8xf32>
    %332 = vector.shape_cast %331 : vector<2x8xf32> to vector<2x8x1xf32>
    %333 = vector.broadcast %332 : vector<2x8x1xf32> to vector<2x8x8xf32>
    %334 = arith.subf %330, %333 : vector<2x8x8xf32>
    %335 = math.exp %334 : vector<2x8x8xf32>
    %cst_194 = arith.constant dense<0.000000e+00> : vector<2x8xf32>
    %336 = vector.multi_reduction <add>, %335, %cst_194 [2] : vector<2x8x8xf32> to vector<2x8xf32>
    %337 = vector.shape_cast %336 : vector<2x8xf32> to vector<2x8x1xf32>
    %338 = tpu.reciprocal %337 {approx = true} : vector<2x8x1xf32> -> vector<2x8x1xf32>
    %339 = vector.broadcast %338 : vector<2x8x1xf32> to vector<2x8x8xf32>
    %340 = arith.mulf %335, %339 : vector<2x8x8xf32>
    "tpu.trace_start"() <{level = 10 : i32, message = "bqk,bkd->bqd"}> : () -> ()
    %cst_195 = arith.constant dense<0.000000e+00> : vector<2x8x8xf32>
    %341 = tpu.matmul %340, %327, %cst_195 {dimension_numbers = #tpu.dot_dimension_numbers<[2], [1], [1], [2], [0, 0, 0, 1, 1, 2], [0], [0]>} : vector<2x8x8xf32>, vector<2x8x8xf32>, vector<2x8x8xf32> -> vector<2x8x8xf32>
    "tpu.trace_stop"() : () -> ()
    %342 = vector.shape_cast %341 : vector<2x8x8xf32> to vector<16x8xf32>
    %c1_196 = arith.constant 1 : index
    %c16_197 = arith.constant 16 : index
    %c0_198 = arith.constant 0 : index
    %343 = vector.load %arg6[%c1_196, %c16_197, %c0_198] : memref<2x32x32xf32, #tpu.memory_space<vmem>>, vector<1x8x32xf32>
    %344 = vector.shape_cast %343 : vector<1x8x32xf32> to vector<8x32xf32>
    %cst_199 = arith.constant dense<0.000000e+00> : vector<16x32xf32>
    %345 = tpu.matmul %342, %344, %cst_199 {dimension_numbers = #tpu.dot_dimension_numbers<[1], [0], [0], [1], [0, 0, 1, 1], [], []>} : vector<16x8xf32>, vector<8x32xf32>, vector<16x32xf32> -> vector<16x32xf32>
    %346 = arith.addf %324, %345 : vector<16x32xf32>
    %347 = vector.extract_strided_slice %279 {offsets = [0, 0, 24], sizes = [2, 8, 8], strides = [1, 1, 1]} : vector<2x8x96xf32> to vector<2x8x8xf32>
    %348 = vector.extract_strided_slice %279 {offsets = [0, 0, 56], sizes = [2, 8, 8], strides = [1, 1, 1]} : vector<2x8x96xf32> to vector<2x8x8xf32>
    %349 = vector.extract_strided_slice %279 {offsets = [0, 0, 88], sizes = [2, 8, 8], strides = [1, 1, 1]} : vector<2x8x96xf32> to vector<2x8x8xf32>
    "tpu.trace_start"() <{level = 10 : i32, message = "bqd,bkd->bqk"}> : () -> ()
    %cst_200 = arith.constant dense<0.000000e+00> : vector<2x8x8xf32>
    %350 = tpu.matmul %347, %348, %cst_200 {dimension_numbers = #tpu.dot_dimension_numbers<[2], [2], [1], [1], [0, 0, 0, 1, 1, 1], [0], [0]>} : vector<2x8x8xf32>, vector<2x8x8xf32>, vector<2x8x8xf32> -> vector<2x8x8xf32>
    "tpu.trace_stop"() : () -> ()
    %cst_201 = arith.constant 0.353553385 : f32
    %351 = vector.broadcast %cst_201 : f32 to vector<2x8x8xf32>
    %352 = arith.mulf %350, %351 : vector<2x8x8xf32>
    %cst_202 = arith.constant dense<0xFF800000> : vector<2x8xf32>
    %353 = vector.multi_reduction <maximumf>, %352, %cst_202 [2] : vector<2x8x8xf32> to vector<2x8xf32>
    %354 = vector.shape_cast %353 : vector<2x8xf32> to vector<2x8x1xf32>
    %355 = vector.broadcast %354 : vector<2x8x1xf32> to vector<2x8x8xf32>
    %356 = arith.subf %352, %355 : vector<2x8x8xf32>
    %357 = math.exp %356 : vector<2x8x8xf32>
    %cst_203 = arith.constant dense<0.000000e+00> : vector<2x8xf32>
    %358 = vector.multi_reduction <add>, %357, %cst_203 [2] : vector<2x8x8xf32> to vector<2x8xf32>
    %359 = vector.shape_cast %358 : vector<2x8xf32> to vector<2x8x1xf32>
    %360 = tpu.reciprocal %359 {approx = true} : vector<2x8x1xf32> -> vector<2x8x1xf32>
    %361 = vector.broadcast %360 : vector<2x8x1xf32> to vector<2x8x8xf32>
    %362 = arith.mulf %357, %361 : vector<2x8x8xf32>
    "tpu.trace_start"() <{level = 10 : i32, message = "bqk,bkd->bqd"}> : () -> ()
    %cst_204 = arith.constant dense<0.000000e+00> : vector<2x8x8xf32>
    %363 = tpu.matmul %362, %349, %cst_204 {dimension_numbers = #tpu.dot_dimension_numbers<[2], [1], [1], [2], [0, 0, 0, 1, 1, 2], [0], [0]>} : vector<2x8x8xf32>, vector<2x8x8xf32>, vector<2x8x8xf32> -> vector<2x8x8xf32>
    "tpu.trace_stop"() : () -> ()
    %364 = vector.shape_cast %363 : vector<2x8x8xf32> to vector<16x8xf32>
    %c1_205 = arith.constant 1 : index
    %c24_206 = arith.constant 24 : index
    %c0_207 = arith.constant 0 : index
    %365 = vector.load %arg6[%c1_205, %c24_206, %c0_207] : memref<2x32x32xf32, #tpu.memory_space<vmem>>, vector<1x8x32xf32>
    %366 = vector.shape_cast %365 : vector<1x8x32xf32> to vector<8x32xf32>
    %cst_208 = arith.constant dense<0.000000e+00> : vector<16x32xf32>
    %367 = tpu.matmul %364, %366, %cst_208 {dimension_numbers = #tpu.dot_dimension_numbers<[1], [0], [0], [1], [0, 0, 1, 1], [], []>} : vector<16x8xf32>, vector<8x32xf32>, vector<16x32xf32> -> vector<16x32xf32>
    %368 = arith.addf %346, %367 : vector<16x32xf32>
    %c1_209 = arith.constant 1 : index
    %c0_210 = arith.constant 0 : index
    %c0_211 = arith.constant 0 : index
    %369 = vector.load %arg7[%c1_209, %c0_210, %c0_211] : memref<2x1x32xf32, #tpu.memory_space<vmem>>, vector<1x1x32xf32>
    %370 = vector.shape_cast %369 : vector<1x1x32xf32> to vector<1x32xf32>
    %371 = vector.broadcast %370 : vector<1x32xf32> to vector<16x32xf32>
    %372 = arith.addf %368, %371 : vector<16x32xf32>
    %373 = arith.addf %271, %372 : vector<16x32xf32>
    %c1_212 = arith.constant 1 : index
    %c0_213 = arith.constant 0 : index
    %c0_214 = arith.constant 0 : index
    %374 = vector.load %arg8[%c1_212, %c0_213, %c0_214] : memref<2x1x32xf32, #tpu.memory_space<vmem>>, vector<1x1x32xf32>
    %375 = vector.shape_cast %374 : vector<1x1x32xf32> to vector<1x32xf32>
    %c1_215 = arith.constant 1 : index
    %c0_216 = arith.constant 0 : index
    %c0_217 = arith.constant 0 : index
    %376 = vector.load %arg9[%c1_215, %c0_216, %c0_217] : memref<2x1x32xf32, #tpu.memory_space<vmem>>, vector<1x1x32xf32>
    %377 = vector.shape_cast %376 : vector<1x1x32xf32> to vector<1x32xf32>
    %cst_218 = arith.constant dense<0.000000e+00> : vector<16xf32>
    %378 = vector.multi_reduction <add>, %373, %cst_218 [1] : vector<16x32xf32> to vector<16xf32>
    %379 = vector.shape_cast %378 : vector<16xf32> to vector<16x1xf32>
    %cst_219 = arith.constant 3.200000e+01 : f32
    %380 = vector.broadcast %cst_219 : f32 to vector<16x1xf32>
    %381 = arith.divf %379, %380 : vector<16x1xf32>
    %382 = vector.broadcast %381 : vector<16x1xf32> to vector<16x32xf32>
    %383 = arith.subf %373, %382 : vector<16x32xf32>
    %384 = arith.mulf %383, %383 : vector<16x32xf32>
    %cst_220 = arith.constant dense<0.000000e+00> : vector<16xf32>
    %385 = vector.multi_reduction <add>, %384, %cst_220 [1] : vector<16x32xf32> to vector<16xf32>
    %386 = vector.shape_cast %385 : vector<16xf32> to vector<16x1xf32>
    %cst_221 = arith.constant 3.200000e+01 : f32
    %387 = vector.broadcast %cst_221 : f32 to vector<16x1xf32>
    %388 = arith.divf %386, %387 : vector<16x1xf32>
    %389 = vector.broadcast %381 : vector<16x1xf32> to vector<16x32xf32>
    %390 = arith.subf %373, %389 : vector<16x32xf32>
    %cst_222 = arith.constant 9.99999974E-6 : f32
    %391 = vector.broadcast %cst_222 : f32 to vector<16x1xf32>
    %392 = arith.addf %388, %391 : vector<16x1xf32>
    %393 = math.rsqrt %392 : vector<16x1xf32>
    %394 = vector.broadcast %393 : vector<16x1xf32> to vector<16x32xf32>
    %395 = arith.mulf %390, %394 : vector<16x32xf32>
    %396 = vector.broadcast %375 : vector<1x32xf32> to vector<16x32xf32>
    %397 = arith.mulf %395, %396 : vector<16x32xf32>
    %398 = vector.broadcast %377 : vector<1x32xf32> to vector<16x32xf32>
    %399 = arith.addf %397, %398 : vector<16x32xf32>
    %cst_223 = arith.constant 0.000000e+00 : f32
    %400 = vector.broadcast %cst_223 : f32 to vector<16x32xf32>
    %c1_224 = arith.constant 1 : index
    %c0_225 = arith.constant 0 : index
    %c0_226 = arith.constant 0 : index
    %401 = vector.load %arg12[%c1_224, %c0_225, %c0_226] : memref<2x32x2048xf32, #tpu.memory_space<vmem>>, vector<1x32x256xf32>
    %402 = vector.shape_cast %401 : vector<1x32x256xf32> to vector<32x256xf32>
    %cst_227 = arith.constant dense<0.000000e+00> : vector<16x256xf32>
    %403 = tpu.matmul %399, %402, %cst_227 {dimension_numbers = #tpu.dot_dimension_numbers<[1], [0], [0], [1], [0, 0, 1, 1], [], []>} : vector<16x32xf32>, vector<32x256xf32>, vector<16x256xf32> -> vector<16x256xf32>
    %c1_228 = arith.constant 1 : index
    %c0_229 = arith.constant 0 : index
    %c0_230 = arith.constant 0 : index
    %404 = vector.load %arg13[%c1_228, %c0_229, %c0_230] : memref<2x1x2048xf32, #tpu.memory_space<vmem>>, vector<1x1x256xf32>
    %405 = vector.shape_cast %404 : vector<1x1x256xf32> to vector<1x256xf32>
    %406 = vector.broadcast %405 : vector<1x256xf32> to vector<16x256xf32>
    %407 = arith.addf %403, %406 : vector<16x256xf32>
    %cst_231 = arith.constant 0.000000e+00 : f32
    %408 = vector.broadcast %cst_231 : f32 to vector<16x256xf32>
    %409 = arith.maximumf %407, %408 : vector<16x256xf32>
    %c1_232 = arith.constant 1 : index
    %c0_233 = arith.constant 0 : index
    %c0_234 = arith.constant 0 : index
    %410 = vector.load %arg14[%c1_232, %c0_233, %c0_234] : memref<2x2048x32xf32, #tpu.memory_space<vmem>>, vector<1x256x32xf32>
    %411 = vector.shape_cast %410 : vector<1x256x32xf32> to vector<256x32xf32>
    %cst_235 = arith.constant dense<0.000000e+00> : vector<16x32xf32>
    %412 = tpu.matmul %409, %411, %cst_235 {dimension_numbers = #tpu.dot_dimension_numbers<[1], [0], [0], [1], [0, 0, 1, 1], [], []>} : vector<16x256xf32>, vector<256x32xf32>, vector<16x32xf32> -> vector<16x32xf32>
    %413 = arith.addf %400, %412 : vector<16x32xf32>
    %c1_236 = arith.constant 1 : index
    %c0_237 = arith.constant 0 : index
    %c256_238 = arith.constant 256 : index
    %414 = vector.load %arg12[%c1_236, %c0_237, %c256_238] : memref<2x32x2048xf32, #tpu.memory_space<vmem>>, vector<1x32x256xf32>
    %415 = vector.shape_cast %414 : vector<1x32x256xf32> to vector<32x256xf32>
    %cst_239 = arith.constant dense<0.000000e+00> : vector<16x256xf32>
    %416 = tpu.matmul %399, %415, %cst_239 {dimension_numbers = #tpu.dot_dimension_numbers<[1], [0], [0], [1], [0, 0, 1, 1], [], []>} : vector<16x32xf32>, vector<32x256xf32>, vector<16x256xf32> -> vector<16x256xf32>
    %c1_240 = arith.constant 1 : index
    %c0_241 = arith.constant 0 : index
    %c256_242 = arith.constant 256 : index
    %417 = vector.load %arg13[%c1_240, %c0_241, %c256_242] : memref<2x1x2048xf32, #tpu.memory_space<vmem>>, vector<1x1x256xf32>
    %418 = vector.shape_cast %417 : vector<1x1x256xf32> to vector<1x256xf32>
    %419 = vector.broadcast %418 : vector<1x256xf32> to vector<16x256xf32>
    %420 = arith.addf %416, %419 : vector<16x256xf32>
    %cst_243 = arith.constant 0.000000e+00 : f32
    %421 = vector.broadcast %cst_243 : f32 to vector<16x256xf32>
    %422 = arith.maximumf %420, %421 : vector<16x256xf32>
    %c1_244 = arith.constant 1 : index
    %c256_245 = arith.constant 256 : index
    %c0_246 = arith.constant 0 : index
    %423 = vector.load %arg14[%c1_244, %c256_245, %c0_246] : memref<2x2048x32xf32, #tpu.memory_space<vmem>>, vector<1x256x32xf32>
    %424 = vector.shape_cast %423 : vector<1x256x32xf32> to vector<256x32xf32>
    %cst_247 = arith.constant dense<0.000000e+00> : vector<16x32xf32>
    %425 = tpu.matmul %422, %424, %cst_247 {dimension_numbers = #tpu.dot_dimension_numbers<[1], [0], [0], [1], [0, 0, 1, 1], [], []>} : vector<16x256xf32>, vector<256x32xf32>, vector<16x32xf32> -> vector<16x32xf32>
    %426 = arith.addf %413, %425 : vector<16x32xf32>
    %c1_248 = arith.constant 1 : index
    %c0_249 = arith.constant 0 : index
    %c512_250 = arith.constant 512 : index
    %427 = vector.load %arg12[%c1_248, %c0_249, %c512_250] : memref<2x32x2048xf32, #tpu.memory_space<vmem>>, vector<1x32x256xf32>
    %428 = vector.shape_cast %427 : vector<1x32x256xf32> to vector<32x256xf32>
    %cst_251 = arith.constant dense<0.000000e+00> : vector<16x256xf32>
    %429 = tpu.matmul %399, %428, %cst_251 {dimension_numbers = #tpu.dot_dimension_numbers<[1], [0], [0], [1], [0, 0, 1, 1], [], []>} : vector<16x32xf32>, vector<32x256xf32>, vector<16x256xf32> -> vector<16x256xf32>
    %c1_252 = arith.constant 1 : index
    %c0_253 = arith.constant 0 : index
    %c512_254 = arith.constant 512 : index
    %430 = vector.load %arg13[%c1_252, %c0_253, %c512_254] : memref<2x1x2048xf32, #tpu.memory_space<vmem>>, vector<1x1x256xf32>
    %431 = vector.shape_cast %430 : vector<1x1x256xf32> to vector<1x256xf32>
    %432 = vector.broadcast %431 : vector<1x256xf32> to vector<16x256xf32>
    %433 = arith.addf %429, %432 : vector<16x256xf32>
    %cst_255 = arith.constant 0.000000e+00 : f32
    %434 = vector.broadcast %cst_255 : f32 to vector<16x256xf32>
    %435 = arith.maximumf %433, %434 : vector<16x256xf32>
    %c1_256 = arith.constant 1 : index
    %c512_257 = arith.constant 512 : index
    %c0_258 = arith.constant 0 : index
    %436 = vector.load %arg14[%c1_256, %c512_257, %c0_258] : memref<2x2048x32xf32, #tpu.memory_space<vmem>>, vector<1x256x32xf32>
    %437 = vector.shape_cast %436 : vector<1x256x32xf32> to vector<256x32xf32>
    %cst_259 = arith.constant dense<0.000000e+00> : vector<16x32xf32>
    %438 = tpu.matmul %435, %437, %cst_259 {dimension_numbers = #tpu.dot_dimension_numbers<[1], [0], [0], [1], [0, 0, 1, 1], [], []>} : vector<16x256xf32>, vector<256x32xf32>, vector<16x32xf32> -> vector<16x32xf32>
    %439 = arith.addf %426, %438 : vector<16x32xf32>
    %c1_260 = arith.constant 1 : index
    %c0_261 = arith.constant 0 : index
    %c768_262 = arith.constant 768 : index
    %440 = vector.load %arg12[%c1_260, %c0_261, %c768_262] : memref<2x32x2048xf32, #tpu.memory_space<vmem>>, vector<1x32x256xf32>
    %441 = vector.shape_cast %440 : vector<1x32x256xf32> to vector<32x256xf32>
    %cst_263 = arith.constant dense<0.000000e+00> : vector<16x256xf32>
    %442 = tpu.matmul %399, %441, %cst_263 {dimension_numbers = #tpu.dot_dimension_numbers<[1], [0], [0], [1], [0, 0, 1, 1], [], []>} : vector<16x32xf32>, vector<32x256xf32>, vector<16x256xf32> -> vector<16x256xf32>
    %c1_264 = arith.constant 1 : index
    %c0_265 = arith.constant 0 : index
    %c768_266 = arith.constant 768 : index
    %443 = vector.load %arg13[%c1_264, %c0_265, %c768_266] : memref<2x1x2048xf32, #tpu.memory_space<vmem>>, vector<1x1x256xf32>
    %444 = vector.shape_cast %443 : vector<1x1x256xf32> to vector<1x256xf32>
    %445 = vector.broadcast %444 : vector<1x256xf32> to vector<16x256xf32>
    %446 = arith.addf %442, %445 : vector<16x256xf32>
    %cst_267 = arith.constant 0.000000e+00 : f32
    %447 = vector.broadcast %cst_267 : f32 to vector<16x256xf32>
    %448 = arith.maximumf %446, %447 : vector<16x256xf32>
    %c1_268 = arith.constant 1 : index
    %c768_269 = arith.constant 768 : index
    %c0_270 = arith.constant 0 : index
    %449 = vector.load %arg14[%c1_268, %c768_269, %c0_270] : memref<2x2048x32xf32, #tpu.memory_space<vmem>>, vector<1x256x32xf32>
    %450 = vector.shape_cast %449 : vector<1x256x32xf32> to vector<256x32xf32>
    %cst_271 = arith.constant dense<0.000000e+00> : vector<16x32xf32>
    %451 = tpu.matmul %448, %450, %cst_271 {dimension_numbers = #tpu.dot_dimension_numbers<[1], [0], [0], [1], [0, 0, 1, 1], [], []>} : vector<16x256xf32>, vector<256x32xf32>, vector<16x32xf32> -> vector<16x32xf32>
    %452 = arith.addf %439, %451 : vector<16x32xf32>
    %c1_272 = arith.constant 1 : index
    %c0_273 = arith.constant 0 : index
    %c1024_274 = arith.constant 1024 : index
    %453 = vector.load %arg12[%c1_272, %c0_273, %c1024_274] : memref<2x32x2048xf32, #tpu.memory_space<vmem>>, vector<1x32x256xf32>
    %454 = vector.shape_cast %453 : vector<1x32x256xf32> to vector<32x256xf32>
    %cst_275 = arith.constant dense<0.000000e+00> : vector<16x256xf32>
    %455 = tpu.matmul %399, %454, %cst_275 {dimension_numbers = #tpu.dot_dimension_numbers<[1], [0], [0], [1], [0, 0, 1, 1], [], []>} : vector<16x32xf32>, vector<32x256xf32>, vector<16x256xf32> -> vector<16x256xf32>
    %c1_276 = arith.constant 1 : index
    %c0_277 = arith.constant 0 : index
    %c1024_278 = arith.constant 1024 : index
    %456 = vector.load %arg13[%c1_276, %c0_277, %c1024_278] : memref<2x1x2048xf32, #tpu.memory_space<vmem>>, vector<1x1x256xf32>
    %457 = vector.shape_cast %456 : vector<1x1x256xf32> to vector<1x256xf32>
    %458 = vector.broadcast %457 : vector<1x256xf32> to vector<16x256xf32>
    %459 = arith.addf %455, %458 : vector<16x256xf32>
    %cst_279 = arith.constant 0.000000e+00 : f32
    %460 = vector.broadcast %cst_279 : f32 to vector<16x256xf32>
    %461 = arith.maximumf %459, %460 : vector<16x256xf32>
    %c1_280 = arith.constant 1 : index
    %c1024_281 = arith.constant 1024 : index
    %c0_282 = arith.constant 0 : index
    %462 = vector.load %arg14[%c1_280, %c1024_281, %c0_282] : memref<2x2048x32xf32, #tpu.memory_space<vmem>>, vector<1x256x32xf32>
    %463 = vector.shape_cast %462 : vector<1x256x32xf32> to vector<256x32xf32>
    %cst_283 = arith.constant dense<0.000000e+00> : vector<16x32xf32>
    %464 = tpu.matmul %461, %463, %cst_283 {dimension_numbers = #tpu.dot_dimension_numbers<[1], [0], [0], [1], [0, 0, 1, 1], [], []>} : vector<16x256xf32>, vector<256x32xf32>, vector<16x32xf32> -> vector<16x32xf32>
    %465 = arith.addf %452, %464 : vector<16x32xf32>
    %c1_284 = arith.constant 1 : index
    %c0_285 = arith.constant 0 : index
    %c1280_286 = arith.constant 1280 : index
    %466 = vector.load %arg12[%c1_284, %c0_285, %c1280_286] : memref<2x32x2048xf32, #tpu.memory_space<vmem>>, vector<1x32x256xf32>
    %467 = vector.shape_cast %466 : vector<1x32x256xf32> to vector<32x256xf32>
    %cst_287 = arith.constant dense<0.000000e+00> : vector<16x256xf32>
    %468 = tpu.matmul %399, %467, %cst_287 {dimension_numbers = #tpu.dot_dimension_numbers<[1], [0], [0], [1], [0, 0, 1, 1], [], []>} : vector<16x32xf32>, vector<32x256xf32>, vector<16x256xf32> -> vector<16x256xf32>
    %c1_288 = arith.constant 1 : index
    %c0_289 = arith.constant 0 : index
    %c1280_290 = arith.constant 1280 : index
    %469 = vector.load %arg13[%c1_288, %c0_289, %c1280_290] : memref<2x1x2048xf32, #tpu.memory_space<vmem>>, vector<1x1x256xf32>
    %470 = vector.shape_cast %469 : vector<1x1x256xf32> to vector<1x256xf32>
    %471 = vector.broadcast %470 : vector<1x256xf32> to vector<16x256xf32>
    %472 = arith.addf %468, %471 : vector<16x256xf32>
    %cst_291 = arith.constant 0.000000e+00 : f32
    %473 = vector.broadcast %cst_291 : f32 to vector<16x256xf32>
    %474 = arith.maximumf %472, %473 : vector<16x256xf32>
    %c1_292 = arith.constant 1 : index
    %c1280_293 = arith.constant 1280 : index
    %c0_294 = arith.constant 0 : index
    %475 = vector.load %arg14[%c1_292, %c1280_293, %c0_294] : memref<2x2048x32xf32, #tpu.memory_space<vmem>>, vector<1x256x32xf32>
    %476 = vector.shape_cast %475 : vector<1x256x32xf32> to vector<256x32xf32>
    %cst_295 = arith.constant dense<0.000000e+00> : vector<16x32xf32>
    %477 = tpu.matmul %474, %476, %cst_295 {dimension_numbers = #tpu.dot_dimension_numbers<[1], [0], [0], [1], [0, 0, 1, 1], [], []>} : vector<16x256xf32>, vector<256x32xf32>, vector<16x32xf32> -> vector<16x32xf32>
    %478 = arith.addf %465, %477 : vector<16x32xf32>
    %c1_296 = arith.constant 1 : index
    %c0_297 = arith.constant 0 : index
    %c1536_298 = arith.constant 1536 : index
    %479 = vector.load %arg12[%c1_296, %c0_297, %c1536_298] : memref<2x32x2048xf32, #tpu.memory_space<vmem>>, vector<1x32x256xf32>
    %480 = vector.shape_cast %479 : vector<1x32x256xf32> to vector<32x256xf32>
    %cst_299 = arith.constant dense<0.000000e+00> : vector<16x256xf32>
    %481 = tpu.matmul %399, %480, %cst_299 {dimension_numbers = #tpu.dot_dimension_numbers<[1], [0], [0], [1], [0, 0, 1, 1], [], []>} : vector<16x32xf32>, vector<32x256xf32>, vector<16x256xf32> -> vector<16x256xf32>
    %c1_300 = arith.constant 1 : index
    %c0_301 = arith.constant 0 : index
    %c1536_302 = arith.constant 1536 : index
    %482 = vector.load %arg13[%c1_300, %c0_301, %c1536_302] : memref<2x1x2048xf32, #tpu.memory_space<vmem>>, vector<1x1x256xf32>
    %483 = vector.shape_cast %482 : vector<1x1x256xf32> to vector<1x256xf32>
    %484 = vector.broadcast %483 : vector<1x256xf32> to vector<16x256xf32>
    %485 = arith.addf %481, %484 : vector<16x256xf32>
    %cst_303 = arith.constant 0.000000e+00 : f32
    %486 = vector.broadcast %cst_303 : f32 to vector<16x256xf32>
    %487 = arith.maximumf %485, %486 : vector<16x256xf32>
    %c1_304 = arith.constant 1 : index
    %c1536_305 = arith.constant 1536 : index
    %c0_306 = arith.constant 0 : index
    %488 = vector.load %arg14[%c1_304, %c1536_305, %c0_306] : memref<2x2048x32xf32, #tpu.memory_space<vmem>>, vector<1x256x32xf32>
    %489 = vector.shape_cast %488 : vector<1x256x32xf32> to vector<256x32xf32>
    %cst_307 = arith.constant dense<0.000000e+00> : vector<16x32xf32>
    %490 = tpu.matmul %487, %489, %cst_307 {dimension_numbers = #tpu.dot_dimension_numbers<[1], [0], [0], [1], [0, 0, 1, 1], [], []>} : vector<16x256xf32>, vector<256x32xf32>, vector<16x32xf32> -> vector<16x32xf32>
    %491 = arith.addf %478, %490 : vector<16x32xf32>
    %c1_308 = arith.constant 1 : index
    %c0_309 = arith.constant 0 : index
    %c1792_310 = arith.constant 1792 : index
    %492 = vector.load %arg12[%c1_308, %c0_309, %c1792_310] : memref<2x32x2048xf32, #tpu.memory_space<vmem>>, vector<1x32x256xf32>
    %493 = vector.shape_cast %492 : vector<1x32x256xf32> to vector<32x256xf32>
    %cst_311 = arith.constant dense<0.000000e+00> : vector<16x256xf32>
    %494 = tpu.matmul %399, %493, %cst_311 {dimension_numbers = #tpu.dot_dimension_numbers<[1], [0], [0], [1], [0, 0, 1, 1], [], []>} : vector<16x32xf32>, vector<32x256xf32>, vector<16x256xf32> -> vector<16x256xf32>
    %c1_312 = arith.constant 1 : index
    %c0_313 = arith.constant 0 : index
    %c1792_314 = arith.constant 1792 : index
    %495 = vector.load %arg13[%c1_312, %c0_313, %c1792_314] : memref<2x1x2048xf32, #tpu.memory_space<vmem>>, vector<1x1x256xf32>
    %496 = vector.shape_cast %495 : vector<1x1x256xf32> to vector<1x256xf32>
    %497 = vector.broadcast %496 : vector<1x256xf32> to vector<16x256xf32>
    %498 = arith.addf %494, %497 : vector<16x256xf32>
    %cst_315 = arith.constant 0.000000e+00 : f32
    %499 = vector.broadcast %cst_315 : f32 to vector<16x256xf32>
    %500 = arith.maximumf %498, %499 : vector<16x256xf32>
    %c1_316 = arith.constant 1 : index
    %c1792_317 = arith.constant 1792 : index
    %c0_318 = arith.constant 0 : index
    %501 = vector.load %arg14[%c1_316, %c1792_317, %c0_318] : memref<2x2048x32xf32, #tpu.memory_space<vmem>>, vector<1x256x32xf32>
    %502 = vector.shape_cast %501 : vector<1x256x32xf32> to vector<256x32xf32>
    %cst_319 = arith.constant dense<0.000000e+00> : vector<16x32xf32>
    %503 = tpu.matmul %500, %502, %cst_319 {dimension_numbers = #tpu.dot_dimension_numbers<[1], [0], [0], [1], [0, 0, 1, 1], [], []>} : vector<16x256xf32>, vector<256x32xf32>, vector<16x32xf32> -> vector<16x32xf32>
    %504 = arith.addf %491, %503 : vector<16x32xf32>
    %c1_320 = arith.constant 1 : index
    %c0_321 = arith.constant 0 : index
    %c0_322 = arith.constant 0 : index
    %505 = vector.load %arg15[%c1_320, %c0_321, %c0_322] : memref<2x1x32xf32, #tpu.memory_space<vmem>>, vector<1x1x32xf32>
    %506 = vector.shape_cast %505 : vector<1x1x32xf32> to vector<1x32xf32>
    %507 = vector.broadcast %506 : vector<1x32xf32> to vector<16x32xf32>
    %508 = arith.addf %504, %507 : vector<16x32xf32>
    %509 = arith.addf %399, %508 : vector<16x32xf32>
    %c1_323 = arith.constant 1 : index
    %c0_324 = arith.constant 0 : index
    %c0_325 = arith.constant 0 : index
    %510 = vector.load %arg10[%c1_323, %c0_324, %c0_325] : memref<2x1x32xf32, #tpu.memory_space<vmem>>, vector<1x1x32xf32>
    %511 = vector.shape_cast %510 : vector<1x1x32xf32> to vector<1x32xf32>
    %c1_326 = arith.constant 1 : index
    %c0_327 = arith.constant 0 : index
    %c0_328 = arith.constant 0 : index
    %512 = vector.load %arg11[%c1_326, %c0_327, %c0_328] : memref<2x1x32xf32, #tpu.memory_space<vmem>>, vector<1x1x32xf32>
    %513 = vector.shape_cast %512 : vector<1x1x32xf32> to vector<1x32xf32>
    %cst_329 = arith.constant dense<0.000000e+00> : vector<16xf32>
    %514 = vector.multi_reduction <add>, %509, %cst_329 [1] : vector<16x32xf32> to vector<16xf32>
    %515 = vector.shape_cast %514 : vector<16xf32> to vector<16x1xf32>
    %cst_330 = arith.constant 3.200000e+01 : f32
    %516 = vector.broadcast %cst_330 : f32 to vector<16x1xf32>
    %517 = arith.divf %515, %516 : vector<16x1xf32>
    %518 = vector.broadcast %517 : vector<16x1xf32> to vector<16x32xf32>
    %519 = arith.subf %509, %518 : vector<16x32xf32>
    %520 = arith.mulf %519, %519 : vector<16x32xf32>
    %cst_331 = arith.constant dense<0.000000e+00> : vector<16xf32>
    %521 = vector.multi_reduction <add>, %520, %cst_331 [1] : vector<16x32xf32> to vector<16xf32>
    %522 = vector.shape_cast %521 : vector<16xf32> to vector<16x1xf32>
    %cst_332 = arith.constant 3.200000e+01 : f32
    %523 = vector.broadcast %cst_332 : f32 to vector<16x1xf32>
    %524 = arith.divf %522, %523 : vector<16x1xf32>
    %525 = vector.broadcast %517 : vector<16x1xf32> to vector<16x32xf32>
    %526 = arith.subf %509, %525 : vector<16x32xf32>
    %cst_333 = arith.constant 9.99999974E-6 : f32
    %527 = vector.broadcast %cst_333 : f32 to vector<16x1xf32>
    %528 = arith.addf %524, %527 : vector<16x1xf32>
    %529 = math.rsqrt %528 : vector<16x1xf32>
    %530 = vector.broadcast %529 : vector<16x1xf32> to vector<16x32xf32>
    %531 = arith.mulf %526, %530 : vector<16x32xf32>
    %532 = vector.broadcast %511 : vector<1x32xf32> to vector<16x32xf32>
    %533 = arith.mulf %531, %532 : vector<16x32xf32>
    %534 = vector.broadcast %513 : vector<1x32xf32> to vector<16x32xf32>
    %535 = arith.addf %533, %534 : vector<16x32xf32>
    %536 = vector.shape_cast %535 : vector<16x32xf32> to vector<2x8x32xf32>
    %cst_334 = arith.constant dense<0.000000e+00> : vector<2x32xf32>
    %537 = vector.multi_reduction <add>, %536, %cst_334 [1] : vector<2x8x32xf32> to vector<2x32xf32>
    %cst_335 = arith.constant 8.000000e+00 : f32
    %538 = vector.broadcast %cst_335 : f32 to vector<2x32xf32>
    %539 = arith.divf %537, %538 : vector<2x32xf32>
    %c0_336 = arith.constant 0 : index
    %c0_337 = arith.constant 0 : index
    %540 = vector.load %arg16[%c0_336, %c0_337] : memref<2x32xf32, #tpu.memory_space<vmem>>, vector<2x32xf32>
    tpu.vector_store %arg16[%c0_336, %c0_337], %539 {strides = array<i32>} : memref<2x32xf32, #tpu.memory_space<vmem>>, vector<2x32xf32>,
    return
  }
}

</mosaic_0001>

<bundles_post_ra>
// kernel: transformer_backbone.1
= control target key start
LH: loop header
LB: loop body
LE: loop exit
PB: predicated region body
PF: predicated region fallthrough
CT: control target
= control target key end

     0   :  { %s11518_s0 = inlined_call_operand.vmem [shape: f32[16,16], index: 0, kind: input, shape index: {}]   ;;  %s11519_s1 = inlined_call_operand.vmem [shape: f32[16,32], index: 1, kind: input, shape index: {}]   ;;  %s11520_s2 = inlined_call_operand.vmem [shape: f32[1,32], index: 2, kind: input, shape index: {}]   ;;  %s11521_s3 = inlined_call_operand.vmem [shape: f32[16,32], index: 3, kind: input, shape index: {}]   ;;  %s11522_s4 = inlined_call_operand.vmem [shape: f32[2,32,96], index: 4, kind: input, shape index: {}]   ;;  %s11523_s5 = inlined_call_operand.vmem [shape: f32[2,1,96], index: 5, kind: input, shape index: {}]   ;;  %s11524_s6 = inlined_call_operand.vmem [shape: f32[2,32,32], index: 6, kind: input, shape index: {}]   ;;  %s11525_s7 = inlined_call_operand.vmem [shape: f32[2,1,32], index: 7, kind: input, shape index: {}]   ;;  %s11526_s8 = inlined_call_operand.vmem [shape: f32[2,1,32], index: 8, kind: input, shape index: {}]   ;;  %s11527_s9 = inlined_call_operand.vmem [shape: f32[2,1,32], index: 9, kind: input, shape index: {}]   ;;  %s11528_s10 = inlined_call_operand.vmem [shape: f32[2,1,32], index: 10, kind: input, shape index: {}]   ;;  %s11529_s11 = inlined_call_operand.vmem [shape: f32[2,1,32], index: 11, kind: input, shape index: {}]   ;;  %s11530_s12 = inlined_call_operand.vmem [shape: f32[2,32,2048], index: 12, kind: input, shape index: {}]   ;;  %s11531_s13 = inlined_call_operand.vmem [shape: f32[2,1,2048], index: 13, kind: input, shape index: {}]   ;;  %s11532_s14 = inlined_call_operand.vmem [shape: f32[2,2048,32], index: 14, kind: input, shape index: {}]   ;;  %s11533_s15 = inlined_call_operand.vmem [shape: f32[2,1,32], index: 15, kind: input, shape index: {}]   ;;  %s11534_s16 = inlined_call_operand.hbm [shape: f32[2,32], index: 16, kind: output, shape index: {}]  }
   0x1   :  { %11542 = sst [smem:[#allocation5_spill]] %s11518_s0 }
   0x2   :  { %v57_v0 = vld [vmem:[%s11519_s1 + $0x8] sm:$0xff]  ;;  %v56_v1 = vld [vmem:[%s11519_s1] sm:$0xff]  ;;  %s11543_s27 = sld [smem:[#allocation5_spill]]  ;;  %vm65_vm0 = vcmask 130048  }
   0x3   :  { %8460 = vmatprep.subr.mxu0 %v57_v0 }
   0x8   :  { %v54_v2 = vld [vmem:[%s11543_s27] sm:$0xff] }
   0x9   :  { %8464 = vmatprep.mubr.msk.f32.mxu0 %vm65_vm0, %v54_v2 }
   0xa   :  { %21 = vsyncpa [#allocation3], 0  ;;  %8461 = vmatpush3.msra.mxu0 %v57_v0  ;;  %v55_v3 = vld [vmem:[%s11543_s27 + $0x8] sm:$0xff]  ;;  %v154_v4 = vld [vmem:[%s11522_s4 + $0x18] sm:$0xff]  ;;  %vm162_vm1 = vcmask 261120   ;;  %v8805_v17 = vmov 0.0  }
   0xb   :  { %8462 = vmatprep.subr.mxu0 %v56_v1  ;;  %8467 = vmatprep.subr.mxu1 %v154_v4  ;;  %v153_v5 = vld [vmem:[%s11522_s4 + $0x10] sm:$0xff]  ;;  %v152_v6 = vld [vmem:[%s11522_s4 + $0x8] sm:$0xff]  ;;  %v151_v7 = vld [vmem:[%s11522_s4] sm:$0xff]  ;;  %vm8806_vm2 = vmmov 0   ;;  %s8807_s28 = smov 96   ;;  %vm247_vm3 = vcmask 64512  }
   0xc   :  { %8463 = vmatpush3.msra.mxu0 %v56_v1  ;;  %8468 = vmatpush3.msra.mxu1 %v154_v4  ;;  %v7288_v8 = vld [vmem:[%s11520_s2] ss:$0 sm:$0xff]  ;;  %v148_v13 = vld [vmem:[%s11521_s3 + $0x8] sm:$0xff]  ;;  %s8808_s29 = smov 64   ;;  %s8809_s30 = smov 88   ;;  %vm7269_vm4 = vcmask 1041409  }
   0xd   :  { %8465 = vmatmul.mubr.msk.f32.vlgmr.msra.gmra.mxu0 %vm65_vm0, %v55_v3  ;;  %8469 = vmatprep.subr.mxu1 %v153_v5  ;;  %v147_v12 = vld [vmem:[%s11521_s3] sm:$0xff]  ;;  %s8810_s0 = smov 120   ;;  %s8811_s1 = smov 56   ;;  %vm7272_vm5 = vcmask 254976  }
   0xe   :  { %8470 = vmatpush3.msra.mxu1 %v153_v5  ;;  %8478 = vmatprep.subr.mxu0 %v8805_v17  ;;  %v7291_v19 = vld [vmem:[%s11523_s5] ss:$0 sm:$0xff]  ;;  %s8812_s17 = smov 112   ;;  %s8813_s18 = smov 80  }
   0xf   :  { %8471 = vmatprep.subr.mxu1 %v152_v6  ;;  %8480 = vmatprep.mubr.msk.f32.mxu0 %vm8806_vm2, %v8805_v17  ;;  %s8814_s23 = smov 48   ;;  %s11540_s24 = smov 72  }
  0x10   :  { %8472 = vmatpush3.msra.mxu1 %v152_v6  ;;  %s11538_s25 = smov 104   ;;  %s11536_s2 = smov 40  }
  0x11   :  { %8473 = vmatprep.subr.mxu1 %v151_v7 }
  0x12   :  { %8474 = vmatpush3.msra.mxu1 %v151_v7 }
  0x13   :  { %8488 = vmatprep.subr.mxu1 %v8805_v17 }
  0xcd   :  { %v8466_v9 = vpop.f32.mrf.mxu0 }
  0xce   :  { %v144_v10 = vadd.f32 %v8466_v9, %v7288_v8 }
  0xcf   :  { %v138_v11 = vpop.f32.mrf.mxu0 }
  0xd0   :  { %v139_v14 = vadd.f32 %v7288_v8, %v138_v11  ;;  %v8939_v16 = vadd.f32 %v148_v13, %v144_v10 }
  0xd2   :  { %v8937_v15 = vadd.f32 %v147_v12, %v139_v14  ;;  %v575_v14 = vld [vmem:[%s11524_s6] sm:$0xff] }
  0xd4   :  { %8475 = vmatprep.mubr.msk.f32.mxu1 %vm162_vm1, %v8937_v15 }
  0xd5   :  { %8476 = vmatmul.mubr.msk.f32.vlgmr.msra.gmra.mxu1 %vm162_vm1, %v8939_v16 }
  0xd6   :  { %8490 = vmatprep.mubr.msk.f32.mxu1 %vm8806_vm2, %v8805_v17 }
 0x195   :  { %v8477_v18 = vpop.f32.mrf.mxu1 }
 0x196   :  { %v8958_v22 = vadd.f32 %v8477_v18, %v7291_v19 }
 0x197   :  { %v235_v20 = vpop.f32.mrf.mxu1 }
 0x198   :  { %v8954_v21 = vadd.f32 %v7291_v19, %v235_v20 }
 0x19a   :  { %245 = vrot.lane.b32.xlu0 %v8954_v21, %s8807_s28 }
 0x19e   :  { %323 = vrot.lane.b32.xlu0 %v8958_v22, %s8807_s28 }
 0x20c   :  { %v246_v23 = vpop.permute.xlu0 %245 }
 0x20d   :  { %8479 = vmatpush3.xpose.msk.msra.mxu0 %vm247_vm3, %v246_v23 }
 0x20e   :  { %8483 = vmatprep.subr.mxu0 %v8805_v17 }
 0x210   :  { %8481 = vmatmul.mubr.msk.f32.vlgmr.msra.gmra.mxu0 %vm247_vm3, %v8954_v21  ;;  %v324_v24 = vpop.permute.xlu0 %323 }
 0x211   :  { %8484 = vmatpush3.xpose.msk.msra.mxu0 %vm247_vm3, %v324_v24  ;;  %8485 = vmatprep.mubr.msk.f32.mxu0 %vm8806_vm2, %v8805_v17 }
 0x212   :  { %8493 = vmatprep.subr.mxu0 %v8805_v17 }
 0x214   :  { %8486 = vmatmul.mubr.msk.f32.vlgmr.msra.gmra.mxu0 %vm247_vm3, %v8958_v22 }
 0x215   :  { %8495 = vmatprep.mubr.msk.f32.mxu0 %vm8806_vm2, %v8805_v17 }
 0x2d0   :  { %v318_v25 = vpop.f32.mrf.mxu0 }
 0x2d1   :  { %v399_v26 = vmul.f32 0.35355338, %v318_v25 }
 0x2d2   :  { %v8482_v27 = vpop.f32.mrf.mxu0 }
 0x2d3   :  { %v401_v28 = vsel %vm247_vm3, %v399_v26, -inf }
 0x2d4   :  { %402 = vmax.xlane.f32.xlu1 %v401_v28  ;;  %v395_v29 = vpop.f32.mrf.mxu0 }
 0x2d5   :  { %v400_v30 = vmul.f32 0.35355338, %v395_v29 }
 0x2d6   :  { %v8487_v31 = vpop.f32.mrf.mxu0 }
 0x2d7   :  { %v404_v32 = vsel %vm247_vm3, %v400_v30, -inf }
 0x2d8   :  { %405 = vmax.xlane.f32.xlu1 %v404_v32 }
 0x2e9   :  { %423 = vrot.lane.b32.xlu1 %v8954_v21, %s8808_s29 }
 0x2ed   :  { %499 = vrot.lane.b32.xlu1 %v8958_v22, %s8808_s29 }
 0x2f1   :  { %578 = vrot.lane.b32.xlu1 %v8954_v21, %s8809_s30 }
 0x2f5   :  { %656 = vrot.lane.b32.xlu1 %v8958_v22, %s8809_s30 }
 0x35d   :  { %v403_v33 = vpop.xlane.xlu1 %402 }
 0x35e   :  { %v407_v34 = vsub.f32 %v399_v26, %v403_v33 }
 0x360   :  { %v409_v35 = vmul.f32 1.442695, %v407_v34 }
 0x361   :  { %v406_v36 = vpop.xlane.xlu1 %405 }
 0x362   :  { %8703 = vpow2.f32 %v409_v35  ;;  %v408_v37 = vsub.f32 %v400_v30, %v406_v36  ;;  %v908_v30 = vld [vmem:[%s11524_s6 + $0x8] sm:$0xff] }
 0x364   :  { %v411_v38 = vmul.f32 1.442695, %v408_v37 }
 0x365   :  { %v424_v39 = vpop.permute.xlu1 %423 }
 0x366   :  { %8705 = vpow2.f32 %v411_v38  ;;  %8489 = vmatpush3.msra.mxu1 %v424_v39 }
 0x367   :  { %8498 = vmatprep.subr.mxu1 %v8805_v17 }
 0x369   :  { %v500_v40 = vpop.permute.xlu1 %499 }
 0x36a   :  { %8494 = vmatpush3.msra.mxu0 %v500_v40 }
 0x36b   :  { %8503 = vmatprep.subr.mxu0 %v8805_v17 }
 0x36d   :  { %v579_v45 = vpop.permute.xlu1 %578 }
 0x36f   :  { %v8704_v41 = vpop.eup %8703 }
 0x370   :  { %v413_v42 = vsel %vm247_vm3, %v8704_v41, 0.0 }
 0x371   :  { %414 = vadd.xlane.f32.xlu0 %v413_v42  ;;  %v657_v46 = vpop.permute.xlu1 %656 }
 0x373   :  { %v8706_v43 = vpop.eup %8705 }
 0x374   :  { %v416_v44 = vsel %vm247_vm3, %v8706_v43, 0.0 }
 0x375   :  { %417 = vadd.xlane.f32.xlu1 %v416_v44 }
 0x386   :  { %654 = vrot.lane.b32.xlu1 %v8958_v22, %s8810_s0 }
 0x387   :  { %576 = vrot.lane.b32.xlu0 %v8954_v21, %s8810_s0 }
 0x3fa   :  { %v415_v47 = vpop.xlane.xlu0 %414 }
 0x3fb   :  { %8707 = vrcp.f32 %v415_v47 }
 0x3fe   :  { %v418_v48 = vpop.xlane.xlu1 %417  ;;  %v577_v53 = vpop.permute.xlu0 %576 }
 0x3ff   :  { %8709 = vrcp.f32 %v418_v48 }
 0x402   :  { %v655_v54 = vpop.permute.xlu1 %654 }
 0x408   :  { %v8708_v49 = vpop.eup %8707 }
 0x409   :  { %v421_v50 = vmul.f32 %v8708_v49, %v8704_v41 }
 0x40b   :  { %8491 = vmatmul.mubr.msk.f32.vlgmr.msra.gmra.mxu1 %vm247_vm3, %v421_v50 }
 0x40c   :  { %v8710_v51 = vpop.eup %8709  ;;  %8499 = vmatpush3.xpose.msk.msra.mxu1 %vm247_vm3, %v579_v45  ;;  %8500 = vmatprep.mubr.msk.f32.mxu1 %vm8806_vm2, %v8805_v17 }
 0x40d   :  { %v422_v52 = vmul.f32 %v8710_v51, %v8706_v43  ;;  %8508 = vmatprep.subr.mxu1 %v8805_v17 }
 0x40f   :  { %8496 = vmatmul.mubr.msk.f32.vlgmr.msra.gmra.mxu0 %vm247_vm3, %v422_v52  ;;  %8501 = vmatmul.mubr.msk.f32.vlgmr.msra.gmra.mxu1 %vm247_vm3, %v577_v53 }
 0x410   :  { %8504 = vmatpush3.xpose.msk.msra.mxu0 %vm247_vm3, %v657_v46  ;;  %8505 = vmatprep.mubr.msk.f32.mxu0 %vm8806_vm2, %v8805_v17 }
 0x411   :  { %8513 = vmatprep.subr.mxu0 %v8805_v17  ;;  %8510 = vmatprep.mubr.msk.f32.mxu1 %vm8806_vm2, %v8805_v17 }
 0x413   :  { %8506 = vmatmul.mubr.msk.f32.vlgmr.msra.gmra.mxu0 %vm247_vm3, %v655_v54 }
 0x414   :  { %8515 = vmatprep.mubr.msk.f32.mxu0 %vm8806_vm2, %v8805_v17 }
 0x4cb   :  { %v495_v55 = vpop.f32.mrf.mxu1 }
 0x4cd   :  { %v8492_v56 = vpop.f32.mrf.mxu1 }
 0x4cf   :  { %v571_v57 = vpop.f32.mrf.mxu0  ;;  %v650_v58 = vpop.f32.mrf.mxu1 }
 0x4d0   :  { %v732_v59 = vmul.f32 0.35355338, %v650_v58 }
 0x4d1   :  { %v8497_v60 = vpop.f32.mrf.mxu0  ;;  %v8502_v61 = vpop.f32.mrf.mxu1 }
 0x4d2   :  { %v734_v62 = vsel %vm247_vm3, %v732_v59, -inf }
 0x4d3   :  { %v728_v63 = vpop.f32.mrf.mxu0  ;;  %735 = vmax.xlane.f32.xlu1 %v734_v62 }
 0x4d4   :  { %v733_v0 = vmul.f32 0.35355338, %v728_v63 }
 0x4d5   :  { %v8507_v1 = vpop.f32.mrf.mxu0 }
 0x4d6   :  { %v737_v2 = vsel %vm247_vm3, %v733_v0, -inf }
 0x4d7   :  { %738 = vmax.xlane.f32.xlu0 %v737_v2 }
 0x4ed   :  { %832 = vrot.lane.b32.xlu0 %v8958_v22, %s8811_s1 }
 0x4f1   :  { %1071 = vrot.lane.b32.xlu0 %v8954_v21, %s8812_s17 }
 0x55c   :  { %v736_v3 = vpop.xlane.xlu1 %735 }
 0x55d   :  { %v740_v4 = vsub.f32 %v732_v59, %v736_v3 }
 0x55f   :  { %v742_v5 = vmul.f32 1.442695, %v740_v4  ;;  %v1403_v4 = vld [vmem:[%s11524_s6 + $0x10] sm:$0xff] }
 0x560   :  { %v739_v6 = vpop.xlane.xlu0 %738 }
 0x561   :  { %8711 = vpow2.f32 %v742_v5  ;;  %v741_v7 = vsub.f32 %v733_v0, %v739_v6 }
 0x563   :  { %v744_v8 = vmul.f32 1.442695, %v741_v7 }
 0x564   :  { %v833_v9 = vpop.permute.xlu0 %832 }
 0x565   :  { %8713 = vpow2.f32 %v744_v8  ;;  %8514 = vmatpush3.msra.mxu0 %v833_v9 }
 0x566   :  { %8523 = vmatprep.subr.mxu0 %v575_v14 }
 0x568   :  { %v1072_v35 = vpop.permute.xlu0 %1071 }
 0x56e   :  { %v8712_v10 = vpop.eup %8711 }
 0x56f   :  { %v746_v11 = vsel %vm247_vm3, %v8712_v10, 0.0 }
 0x570   :  { %747 = vadd.xlane.f32.xlu1 %v746_v11 }
 0x572   :  { %v8714_v12 = vpop.eup %8713 }
 0x573   :  { %v749_v13 = vsel %vm247_vm3, %v8714_v12, 0.0 }
 0x574   :  { %750 = vadd.xlane.f32.xlu1 %v749_v13 }
 0x585   :  { %756 = vrot.lane.b32.xlu1 %v8954_v21, %s8811_s1 }
 0x589   :  { %1073 = vrot.lane.b32.xlu1 %v8954_v21, %s8813_s18 }
 0x58d   :  { %1151 = vrot.lane.b32.xlu1 %v8958_v22, %s8813_s18 }
 0x591   :  { %1149 = vrot.lane.b32.xlu1 %v8958_v22, %s8812_s17 }
 0x5f9   :  { %v748_v18 = vpop.xlane.xlu1 %747 }
 0x5fa   :  { %8715 = vrcp.f32 %v748_v18 }
 0x5fd   :  { %v751_v19 = vpop.xlane.xlu1 %750 }
 0x5fe   :  { %8717 = vrcp.f32 %v751_v19 }
 0x601   :  { %v757_v20 = vpop.permute.xlu1 %756 }
 0x602   :  { %8509 = vmatpush3.msra.mxu1 %v757_v20 }
 0x603   :  { %8518 = vmatprep.subr.mxu1 %v908_v30 }
 0x605   :  { %v1074_v25 = vpop.permute.xlu1 %1073 }
 0x607   :  { %v8716_v23 = vpop.eup %8715 }
 0x608   :  { %v754_v24 = vmul.f32 %v8716_v23, %v8712_v10 }
 0x609   :  { %v1152_v28 = vpop.permute.xlu1 %1151 }
 0x60a   :  { %8511 = vmatmul.mubr.msk.f32.vlgmr.msra.gmra.mxu1 %vm247_vm3, %v754_v24 }
 0x60b   :  { %v8718_v26 = vpop.eup %8717  ;;  %8519 = vmatpush3.msra.mxu1 %v908_v30 }
 0x60c   :  { %v755_v27 = vmul.f32 %v8718_v26, %v8714_v12  ;;  %8528 = vmatprep.subr.mxu1 %v8805_v17 }
 0x60d   :  { %v1150_v29 = vpop.permute.xlu1 %1149 }
 0x60e   :  { %8516 = vmatmul.mubr.msk.f32.vlgmr.msra.gmra.mxu0 %vm247_vm3, %v755_v27 }
 0x60f   :  { %8525 = vmatprep.mubr.msk.f32.mxu0 %vm247_vm3, %v495_v55  ;;  %8524 = vmatpush3.msra.mxu0 %v575_v14 }
 0x610   :  { %8533 = vmatprep.subr.mxu0 %v8805_v17 }
 0x612   :  { %8526 = vmatmul.mubr.msk.f32.vlgmr.msra.gmra.mxu0 %vm247_vm3, %v571_v57 }
 0x613   :  { %8534 = vmatpush3.xpose.msk.msra.mxu0 %vm247_vm3, %v1152_v28  ;;  %8535 = vmatprep.mubr.msk.f32.mxu0 %vm8806_vm2, %v8805_v17 }
 0x614   :  { %8543 = vmatprep.subr.mxu0 %v8805_v17 }
 0x616   :  { %8536 = vmatmul.mubr.msk.f32.vlgmr.msra.gmra.mxu0 %vm247_vm3, %v1150_v29 }
 0x617   :  { %8545 = vmatprep.mubr.msk.f32.mxu0 %vm8806_vm2, %v8805_v17 }
 0x6ca   :  { %v828_v31 = vpop.f32.mrf.mxu1 }
 0x6cb   :  { %8520 = vmatprep.mubr.msk.f32.mxu1 %vm247_vm3, %v828_v31 }
 0x6cc   :  { %v8512_v32 = vpop.f32.mrf.mxu1 }
 0x6ce   :  { %v904_v33 = vpop.f32.mrf.mxu0 }
 0x6cf   :  { %8521 = vmatmul.mubr.msk.f32.vlgmr.msra.gmra.mxu1 %vm247_vm3, %v904_v33 }
 0x6d0   :  { %8529 = vmatpush3.xpose.msk.msra.mxu1 %vm247_vm3, %v1074_v25  ;;  %v8517_v34 = vpop.f32.mrf.mxu0  ;;  %8530 = vmatprep.mubr.msk.f32.mxu1 %vm8806_vm2, %v8805_v17 }
 0x6d1   :  { %8538 = vmatprep.subr.mxu1 %v8805_v17 }
 0x6d2   :  { %v9049_v36 = vpop.f32.mrf.mxu0 }
 0x6d3   :  { %8531 = vmatmul.mubr.msk.f32.vlgmr.msra.gmra.mxu1 %vm247_vm3, %v1072_v35 }
 0x6d4   :  { %v9052_v37 = vpop.f32.mrf.mxu0  ;;  %8540 = vmatprep.mubr.msk.f32.mxu1 %vm8806_vm2, %v8805_v17 }
 0x6d6   :  { %v1223_v38 = vpop.f32.mrf.mxu0 }
 0x6d7   :  { %v1228_v39 = vmul.f32 0.35355338, %v1223_v38 }
 0x6d8   :  { %v8537_v40 = vpop.f32.mrf.mxu0 }
 0x6d9   :  { %v1232_v41 = vsel %vm247_vm3, %v1228_v39, -inf }
 0x6da   :  { %1233 = vmax.xlane.f32.xlu1 %v1232_v41 }
 0x6eb   :  { %1251 = vrot.lane.b32.xlu1 %v8954_v21, %s8814_s23 }
 0x6ef   :  { %1489 = vrot.lane.b32.xlu1 %v8954_v21, %s11540_s24 }
 0x6f3   :  { %1567 = vrot.lane.b32.xlu1 %v8958_v22, %s11540_s24 }
 0x6f7   :  { %1565 = vrot.lane.b32.xlu1 %v8958_v22, %s11538_s25 }
 0x763   :  { %v1234_v42 = vpop.xlane.xlu1 %1233 }
 0x764   :  { %v1236_v44 = vsub.f32 %v1228_v39, %v1234_v42 }
 0x766   :  { %v1239_v45 = vmul.f32 1.442695, %v1236_v44 }
 0x767   :  { %v1252_v43 = vpop.permute.xlu1 %1251 }
 0x768   :  { %8539 = vmatpush3.msra.mxu1 %v1252_v43  ;;  %8719 = vpow2.f32 %v1239_v45 }
 0x769   :  { %8548 = vmatprep.subr.mxu1 %v1403_v4 }
 0x76b   :  { %v1490_v0 = vpop.permute.xlu1 %1489 }
 0x76f   :  { %v1568_v11 = vpop.permute.xlu1 %1567 }
 0x773   :  { %v1566_v14 = vpop.permute.xlu1 %1565 }
 0x775   :  { %v8720_v52 = vpop.eup %8719 }
 0x776   :  { %v1244_v53 = vsel %vm247_vm3, %v8720_v52, 0.0 }
 0x78f   :  { %v9065_v46 = vpop.f32.mrf.mxu1 }
 0x790   :  { %v1068_v25 = vadd.f32 %v9049_v36, %v9065_v46 }
 0x791   :  { %v9067_v47 = vpop.f32.mrf.mxu1 }
 0x792   :  { %v1063_v27 = vadd.f32 %v9052_v37, %v9067_v47 }
 0x793   :  { %v1145_v48 = vpop.f32.mrf.mxu1 }
 0x794   :  { %v1227_v49 = vmul.f32 0.35355338, %v1145_v48 }
 0x795   :  { %v8532_v50 = vpop.f32.mrf.mxu1 }
 0x796   :  { %v1229_v51 = vsel %vm247_vm3, %v1227_v49, -inf }
 0x797   :  { %1230 = vmax.xlane.f32.xlu0 %v1229_v51 }
 0x79b   :  { %1245 = vadd.xlane.f32.xlu0 %v1244_v53 }
 0x820   :  { %v1231_v54 = vpop.xlane.xlu0 %1230 }
 0x821   :  { %v1235_v55 = vsub.f32 %v1227_v49, %v1231_v54 }
 0x823   :  { %v1237_v56 = vmul.f32 1.442695, %v1235_v55 }
 0x824   :  { %v1246_v59 = vpop.xlane.xlu0 %1245 }
 0x825   :  { %8721 = vpow2.f32 %v1237_v56 }
 0x826   :  { %8723 = vrcp.f32 %v1246_v59 }
 0x832   :  { %v8722_v57 = vpop.eup %8721 }
 0x833   :  { %v1241_v58 = vsel %vm247_vm3, %v8722_v57, 0.0  ;;  %v8724_v61 = vpop.eup %8723 }
 0x834   :  { %1242 = vadd.xlane.f32.xlu0 %v1241_v58  ;;  %v1250_v63 = vmul.f32 %v8724_v61, %v8720_v52  ;;  %v7326_v52 = vld [vmem:[%s11525_s7] ss:$0 sm:$0xff] }
 0x84a   :  { %1327 = vrot.lane.b32.xlu0 %v8958_v22, %s8814_s23 }
 0x84e   :  { %1487 = vrot.lane.b32.xlu0 %v8954_v21, %s11538_s25 }
 0x8bd   :  { %v1243_v60 = vpop.xlane.xlu0 %1242 }
 0x8be   :  { %8725 = vrcp.f32 %v1243_v60 }
 0x8c1   :  { %v1328_v62 = vpop.permute.xlu0 %1327 }
 0x8c2   :  { %8544 = vmatpush3.msra.mxu0 %v1328_v62 }
 0x8c3   :  { %8546 = vmatmul.mubr.msk.f32.vlgmr.msra.gmra.mxu0 %vm247_vm3, %v1250_v63  ;;  %8553 = vmatprep.subr.mxu0 %v8805_v17 }
 0x8c4   :  { %8554 = vmatpush3.xpose.msk.msra.mxu0 %vm247_vm3, %v1490_v0  ;;  %8555 = vmatprep.mubr.msk.f32.mxu0 %vm8806_vm2, %v8805_v17 }
 0x8c5   :  { %v1488_v1 = vpop.permute.xlu0 %1487  ;;  %8563 = vmatprep.subr.mxu0 %v8805_v17 }
 0x8c7   :  { %8556 = vmatmul.mubr.msk.f32.vlgmr.msra.gmra.mxu0 %vm247_vm3, %v1488_v1 }
 0x8c8   :  { %8565 = vmatprep.mubr.msk.f32.mxu0 %vm8806_vm2, %v8805_v17 }
 0x8cb   :  { %v8726_v2 = vpop.eup %8725 }
 0x8cc   :  { %v1249_v3 = vmul.f32 %v8726_v2, %v8722_v57 }
 0x8ce   :  { %8541 = vmatmul.mubr.msk.f32.vlgmr.msra.gmra.mxu1 %vm247_vm3, %v1249_v3 }
 0x8cf   :  { %8549 = vmatpush3.msra.mxu1 %v1403_v4 }
 0x8d0   :  { %8558 = vmatprep.subr.mxu1 %v8805_v17 }
 0x983   :  { %v1399_v5 = vpop.f32.mrf.mxu0 }
 0x985   :  { %v8547_v6 = vpop.f32.mrf.mxu0 }
 0x986   :  { %v1966_v6 = vld [vmem:[%s11530_s12 + $0x188] sm:$0xff] }
 0x987   :  { %v1561_v7 = vpop.f32.mrf.mxu0 }
 0x988   :  { %v1643_v8 = vmul.f32 0.35355338, %v1561_v7  ;;  %v1965_v7 = vld [vmem:[%s11530_s12 + $0x180] sm:$0xff] }
 0x989   :  { %v8557_v9 = vpop.f32.mrf.mxu0 }
 0x98a   :  { %v1645_v10 = vsel %vm247_vm3, %v1643_v8, -inf  ;;  %v1963_v9 = vld [vmem:[%s11530_s12 + $0x100] sm:$0xff] }
 0x98b   :  { %1646 = vmax.xlane.f32.xlu0 %v1645_v10  ;;  %v1962_v10 = vld [vmem:[%s11530_s12 + $0x88] sm:$0xff] }
 0x98e   :  { %v1323_v12 = vpop.f32.mrf.mxu1 }
 0x98f   :  { %8550 = vmatprep.mubr.msk.f32.mxu1 %vm247_vm3, %v1323_v12  ;;  %v1960_v12 = vld [vmem:[%s11530_s12 + $0x8] sm:$0xff] }
 0x990   :  { %v8542_v13 = vpop.f32.mrf.mxu1  ;;  %8551 = vmatmul.mubr.msk.f32.vlgmr.msra.gmra.mxu1 %vm247_vm3, %v1399_v5 }
 0x991   :  { %8559 = vmatpush3.xpose.msk.msra.mxu1 %vm247_vm3, %v1568_v11  ;;  %8560 = vmatprep.mubr.msk.f32.mxu1 %vm8806_vm2, %v8805_v17  ;;  %v1961_v11 = vld [vmem:[%s11530_s12 + $0x80] sm:$0xff] }
 0x992   :  { %8568 = vmatprep.subr.mxu1 %v8805_v17  ;;  %v1959_v13 = vld [vmem:[%s11530_s12] sm:$0xff] }
 0x994   :  { %8561 = vmatmul.mubr.msk.f32.vlgmr.msra.gmra.mxu1 %vm247_vm3, %v1566_v14  ;;  %v2105_v14 = vld [vmem:[%s11530_s12 + $0x198] sm:$0xff] }
 0x995   :  { %8570 = vmatprep.mubr.msk.f32.mxu1 %vm8806_vm2, %v8805_v17 }
 0xa14   :  { %v1647_v18 = vpop.xlane.xlu0 %1646 }
 0xa15   :  { %v1651_v19 = vsub.f32 %v1643_v8, %v1647_v18  ;;  %v1964_v8 = vld [vmem:[%s11530_s12 + $0x108] sm:$0xff]  ;;  %v2097_v18 = vld [vmem:[%s11532_s14 + $0xf8] sm:$0xff] }
 0xa17   :  { %v1653_v20 = vmul.f32 1.442695, %v1651_v19  ;;  %v2081_v19 = vld [vmem:[%s11532_s14 + $0x78] sm:$0xff] }
 0xa19   :  { %8727 = vpow2.f32 %v1653_v20  ;;  %v2096_v20 = vld [vmem:[%s11532_s14 + $0xf0] sm:$0xff] }
 0xa26   :  { %v8728_v23 = vpop.eup %8727 }
 0xa27   :  { %v1657_v24 = vsel %vm247_vm3, %v8728_v23, 0.0 }
 0xa28   :  { %1658 = vadd.xlane.f32.xlu0 %v1657_v24  ;;  %v2095_v24 = vld [vmem:[%s11532_s14 + $0xe8] sm:$0xff] }
 0xa50   :  { %v8552_v26 = vpop.f32.mrf.mxu1 }
 0xa51   :  { %v1486_v28 = vadd.f32 %v8552_v26, %v1068_v25  ;;  %v2079_v25 = vld [vmem:[%s11532_s14 + $0x68] sm:$0xff]  ;;  %v2094_v26 = vld [vmem:[%s11532_s14 + $0xe0] sm:$0xff] }
 0xa52   :  { %v1476_v29 = vpop.f32.mrf.mxu1 }
 0xa53   :  { %v1485_v30 = vadd.f32 %v1476_v29, %v1063_v27  ;;  %v2078_v27 = vld [vmem:[%s11532_s14 + $0x60] sm:$0xff]  ;;  %v2077_v29 = vld [vmem:[%s11532_s14 + $0x58] sm:$0xff] }
 0xa54   :  { %v1639_v31 = vpop.f32.mrf.mxu1 }
 0xa55   :  { %v1644_v32 = vmul.f32 0.35355338, %v1639_v31  ;;  %v2076_v31 = vld [vmem:[%s11532_s14 + $0x50] sm:$0xff] }
 0xa56   :  { %v8562_v33 = vpop.f32.mrf.mxu1 }
 0xa57   :  { %v1648_v34 = vsel %vm247_vm3, %v1644_v32, -inf  ;;  %v2075_v33 = vld [vmem:[%s11532_s14 + $0x48] sm:$0xff] }
 0xa58   :  { %1649 = vmax.xlane.f32.xlu1 %v1648_v34  ;;  %v2090_v34 = vld [vmem:[%s11532_s14 + $0xc0] sm:$0xff] }
 0xa69   :  { %1667 = vrot.lane.b32.xlu1 %v8954_v21, %s11536_s2  ;;  %v1819_v21 = vld [vmem:[%s11524_s6 + $0x18] sm:$0xff] }
 0xab1   :  { %v1659_v35 = vpop.xlane.xlu0 %1658 }
 0xab2   :  { %8729 = vrcp.f32 %v1659_v35  ;;  %v2074_v35 = vld [vmem:[%s11532_s14 + $0x40] sm:$0xff] }
 0xabf   :  { %v8730_v38 = vpop.eup %8729 }
 0xac0   :  { %v1665_v41 = vmul.f32 %v8730_v38, %v8728_v23  ;;  %v2080_v23 = vld [vmem:[%s11532_s14 + $0x70] sm:$0xff]  ;;  %v2073_v38 = vld [vmem:[%s11532_s14 + $0x38] sm:$0xff] }
 0xae1   :  { %v1650_v36 = vpop.xlane.xlu1 %1649 }
 0xae2   :  { %v1652_v39 = vsub.f32 %v1644_v32, %v1650_v36  ;;  %v2091_v32 = vld [vmem:[%s11532_s14 + $0xc8] sm:$0xff]  ;;  %v2089_v36 = vld [vmem:[%s11532_s14 + $0xb8] sm:$0xff] }
 0xae4   :  { %v1655_v40 = vmul.f32 1.442695, %v1652_v39  ;;  %v2088_v39 = vld [vmem:[%s11532_s14 + $0xb0] sm:$0xff] }
 0xae5   :  { %v1668_v37 = vpop.permute.xlu1 %1667 }
 0xae6   :  { %8731 = vpow2.f32 %v1655_v40  ;;  %8564 = vmatpush3.msra.mxu0 %v1668_v37  ;;  %v2072_v40 = vld [vmem:[%s11532_s14 + $0x30] sm:$0xff]  ;;  %v2087_v37 = vld [vmem:[%s11532_s14 + $0xa8] sm:$0xff] }
 0xae7   :  { %8566 = vmatmul.mubr.msk.f32.vlgmr.msra.gmra.mxu0 %vm247_vm3, %v1665_v41  ;;  %8573 = vmatprep.subr.mxu0 %v1819_v21  ;;  %v2071_v41 = vld [vmem:[%s11532_s14 + $0x28] sm:$0xff] }
 0xae8   :  { %8574 = vmatpush3.msra.mxu0 %v1819_v21 }
 0xae9   :  { %7840 = vmatprep.subr.mxu0 %v2097_v18  ;;  %v2222_v18 = vld [vmem:[%s11532_s14 + $0x1b8] sm:$0xff] }
 0xaf3   :  { %v8732_v42 = vpop.eup %8731 }
 0xaf4   :  { %v1660_v43 = vsel %vm247_vm3, %v8732_v42, 0.0 }
 0xaf5   :  { %1661 = vadd.xlane.f32.xlu0 %v1660_v43  ;;  %v2070_v43 = vld [vmem:[%s11532_s14 + $0x20] sm:$0xff] }
 0xb0b   :  { %1743 = vrot.lane.b32.xlu0 %v8958_v22, %s11536_s2 }
 0xb7e   :  { %v1662_v44 = vpop.xlane.xlu0 %1661 }
 0xb7f   :  { %8733 = vrcp.f32 %v1662_v44 }
 0xb82   :  { %v1744_v45 = vpop.permute.xlu0 %1743 }
 0xb83   :  { %8569 = vmatpush3.msra.mxu1 %v1744_v45 }
 0xb84   :  { %2009 = vmatprep.subr.mxu1 %v1966_v6  ;;  %v2211_v6 = vld [vmem:[%s11532_s14 + $0x160] sm:$0xff] }
 0xb8c   :  { %v8734_v46 = vpop.eup %8733 }
 0xb8d   :  { %v1666_v47 = vmul.f32 %v8734_v46, %v8732_v42  ;;  %v2086_v42 = vld [vmem:[%s11532_s14 + $0xa0] sm:$0xff] }
 0xb8f   :  { %8571 = vmatmul.mubr.msk.f32.vlgmr.msra.gmra.mxu1 %vm247_vm3, %v1666_v47 }
 0xb90   :  { %2049 = vmatprep.mubr.f32.mxu1 %v8805_v17  ;;  %2010 = vmatpush1.msra.mxu1 %v1965_v7  ;;  %v2226_v7 = vld [vmem:[%s11532_s14 + $0x1d8] sm:$0xff] }
 0xb91   :  { %2011 = vmatprep.subr.mxu1 %v1964_v8  ;;  %v2210_v8 = vld [vmem:[%s11532_s14 + $0x158] sm:$0xff] }
 0xb92   :  { %2012 = vmatpush1.msra.mxu1 %v1963_v9  ;;  %v2225_v9 = vld [vmem:[%s11532_s14 + $0x1d0] sm:$0xff] }
 0xb93   :  { %2013 = vmatprep.subr.mxu1 %v1962_v10  ;;  %v2209_v10 = vld [vmem:[%s11532_s14 + $0x150] sm:$0xff] }
 0xb94   :  { %2014 = vmatpush1.msra.mxu1 %v1961_v11  ;;  %v2224_v11 = vld [vmem:[%s11532_s14 + $0x1c8] sm:$0xff] }
 0xb95   :  { %2015 = vmatprep.subr.mxu1 %v1960_v12  ;;  %v2208_v12 = vld [vmem:[%s11532_s14 + $0x148] sm:$0xff] }
 0xb96   :  { %2016 = vmatpush1.msra.mxu1 %v1959_v13  ;;  %v2223_v13 = vld [vmem:[%s11532_s14 + $0x1c0] sm:$0xff] }
 0xb97   :  { %2142 = vmatprep.subr.mxu1 %v2105_v14  ;;  %v2207_v14 = vld [vmem:[%s11532_s14 + $0x140] sm:$0xff] }
 0xba7   :  { %v1739_v48 = vpop.f32.mrf.mxu0 }
 0xba8   :  { %8575 = vmatprep.mubr.msk.f32.mxu0 %vm247_vm3, %v1739_v48 }
 0xba9   :  { %v8567_v22 = vpop.f32.mrf.mxu0 }
 0xc4f   :  { %v1815_v49 = vpop.f32.mrf.mxu1 }
 0xc50   :  { %8576 = vmatmul.mubr.msk.f32.vlgmr.msra.gmra.mxu0 %vm247_vm3, %v1815_v49 }
 0xc51   :  { %v8572_v50 = vpop.f32.mrf.mxu1  ;;  %7841 = vmatpush3.msra.mxu0 %v2081_v19  ;;  %v2085_v19 = vld [vmem:[%s11532_s14 + $0x98] sm:$0xff] }
 0xc52   :  { %7842 = vmatprep.subr.mxu0 %v2096_v20  ;;  %v2206_v20 = vld [vmem:[%s11532_s14 + $0x138] sm:$0xff] }
 0xc53   :  { %7843 = vmatpush3.msra.mxu0 %v2080_v23  ;;  %v2069_v23 = vld [vmem:[%s11532_s14 + $0x18] sm:$0xff] }
 0xc54   :  { %7844 = vmatprep.subr.mxu0 %v2095_v24  ;;  %v2221_v24 = vld [vmem:[%s11532_s14 + $0x1b0] sm:$0xff] }
 0xc55   :  { %7845 = vmatpush3.msra.mxu0 %v2079_v25  ;;  %v2084_v25 = vld [vmem:[%s11532_s14 + $0x90] sm:$0xff] }
 0xc56   :  { %7846 = vmatprep.subr.mxu0 %v2094_v26  ;;  %v2205_v26 = vld [vmem:[%s11532_s14 + $0x130] sm:$0xff] }
 0xc57   :  { %7847 = vmatpush3.msra.mxu0 %v2078_v27  ;;  %v2068_v27 = vld [vmem:[%s11532_s14 + $0x10] sm:$0xff] }
 0xd10   :  { %v8577_v51 = vpop.f32.mrf.mxu0 }
 0xd11   :  { %v1902_v53 = vadd.f32 %v8577_v51, %v1486_v28  ;;  %v2093_v28 = vld [vmem:[%s11532_s14 + $0xd8] sm:$0xff] }
 0xd12   :  { %v1892_v54 = vpop.f32.mrf.mxu0  ;;  %7848 = vmatprep.subr.mxu0 %v2093_v28  ;;  %v2220_v28 = vld [vmem:[%s11532_s14 + $0x1a8] sm:$0xff] }
 0xd13   :  { %v1911_v55 = vadd.f32 %v7326_v52, %v1902_v53  ;;  %v1901_v56 = vadd.f32 %v1892_v54, %v1485_v30  ;;  %v2092_v30 = vld [vmem:[%s11532_s14 + $0xd0] sm:$0xff]  ;;  %7849 = vmatpush3.msra.mxu0 %v2077_v29  ;;  %v7328_v54 = vld [vmem:[%s11527_s9] ss:$0 sm:$0xff]  ;;  %v2083_v29 = vld [vmem:[%s11532_s14 + $0x88] sm:$0xff] }
 0xd14   :  { %7850 = vmatprep.subr.mxu0 %v2092_v30  ;;  %v2204_v30 = vld [vmem:[%s11532_s14 + $0x128] sm:$0xff] }
 0xd15   :  { %v1910_v57 = vadd.f32 %v7326_v52, %v1901_v56  ;;  %v1913_v58 = vadd.f32 %v1911_v55, %v8939_v16  ;;  %7851 = vmatpush3.msra.mxu0 %v2076_v31  ;;  %v7327_v52 = vld [vmem:[%s11526_s8] ss:$0 sm:$0xff]  ;;  %v2067_v31 = vld [vmem:[%s11532_s14 + $0x8] sm:$0xff] }
 0xd16   :  { %7852 = vmatprep.subr.mxu0 %v2091_v32  ;;  %v2219_v32 = vld [vmem:[%s11532_s14 + $0x1a0] sm:$0xff] }
 0xd17   :  { %v1919_v59 = vsel %vm162_vm1, %v1913_v58, 0.0  ;;  %v1912_v60 = vadd.f32 %v1910_v57, %v8937_v15  ;;  %7853 = vmatpush3.msra.mxu0 %v2075_v33  ;;  %v2104_v57 = vld [vmem:[%s11530_s12 + $0x190] sm:$0xff]  ;;  %v2082_v33 = vld [vmem:[%s11532_s14 + $0x80] sm:$0xff] }
 0xd18   :  { %1920 = vadd.xlane.f32.xlu0 %v1919_v59  ;;  %7854 = vmatprep.subr.mxu0 %v2090_v34  ;;  %v2102_v59 = vld [vmem:[%s11530_s12 + $0x110] sm:$0xff]  ;;  %v2203_v34 = vld [vmem:[%s11532_s14 + $0x120] sm:$0xff] }
 0xd19   :  { %v1916_v61 = vsel %vm162_vm1, %v1912_v60, 0.0  ;;  %7855 = vmatpush3.msra.mxu0 %v2074_v35  ;;  %v2066_v35 = vld [vmem:[%s11532_s14] sm:$0xff] }
 0xd1a   :  { %1917 = vadd.xlane.f32.xlu1 %v1916_v61  ;;  %7856 = vmatprep.subr.mxu0 %v2089_v36  ;;  %v2218_v36 = vld [vmem:[%s11532_s14 + $0x198] sm:$0xff] }
 0xd1b   :  { %7857 = vmatpush3.msra.mxu0 %v2073_v38  ;;  %v2202_v38 = vld [vmem:[%s11532_s14 + $0x118] sm:$0xff] }
 0xd1c   :  { %7858 = vmatprep.subr.mxu0 %v2088_v39  ;;  %v2217_v39 = vld [vmem:[%s11532_s14 + $0x190] sm:$0xff] }
 0xd1d   :  { %7859 = vmatpush3.msra.mxu0 %v2072_v40  ;;  %v2201_v40 = vld [vmem:[%s11532_s14 + $0x110] sm:$0xff] }
 0xd1e   :  { %7860 = vmatprep.subr.mxu0 %v2087_v37  ;;  %v2216_v37 = vld [vmem:[%s11532_s14 + $0x188] sm:$0xff] }
 0xd1f   :  { %7861 = vmatpush3.msra.mxu0 %v2071_v41  ;;  %v2200_v41 = vld [vmem:[%s11532_s14 + $0x108] sm:$0xff] }
 0xd20   :  { %7862 = vmatprep.subr.mxu0 %v2086_v42  ;;  %v2215_v42 = vld [vmem:[%s11532_s14 + $0x180] sm:$0xff] }
 0xd21   :  { %7863 = vmatpush3.msra.mxu0 %v2070_v43  ;;  %v2199_v43 = vld [vmem:[%s11532_s14 + $0x100] sm:$0xff] }
 0xd22   :  { %7864 = vmatprep.subr.mxu0 %v2085_v19 }
 0xd23   :  { %7865 = vmatpush3.msra.mxu0 %v2069_v23  ;;  %v2387_v23 = vld [vmem:[%s11530_s12 + $0x1a0] sm:$0xff] }
 0xd24   :  { %7866 = vmatprep.subr.mxu0 %v2084_v25  ;;  %v2386_v25 = vld [vmem:[%s11530_s12 + $0x128] sm:$0xff] }
 0xd25   :  { %7867 = vmatpush3.msra.mxu0 %v2068_v27 }
 0xd26   :  { %7868 = vmatprep.subr.mxu0 %v2083_v29 }
 0xd27   :  { %7869 = vmatpush3.msra.mxu0 %v2067_v31  ;;  %v2382_v31 = vld [vmem:[%s11530_s12 + $0x28] sm:$0xff] }
 0xd28   :  { %7870 = vmatprep.subr.mxu0 %v2082_v33  ;;  %v2598_v33 = vld [vmem:[%s11530_s12 + $0x1b8] sm:$0xff] }
 0xd29   :  { %7871 = vmatpush3.msra.mxu0 %v2066_v35  ;;  %v2596_v35 = vld [vmem:[%s11530_s12 + $0x138] sm:$0xff] }
 0xda1   :  { %v1921_v62 = vpop.xlane.xlu0 %1920 }
 0xda2   :  { %v1924_v63 = vmul.f32 0.03125, %v1921_v62  ;;  %v2100_v62 = vld [vmem:[%s11530_s12 + $0x90] sm:$0xff] }
 0xda3   :  { %v1918_v0 = vpop.xlane.xlu1 %1917 }
 0xda4   :  { %v9126_v1 = vsub.f32 %v1913_v58, %v1924_v63  ;;  %v1923_v2 = vmul.f32 0.03125, %v1918_v0  ;;  %v2103_v58 = vld [vmem:[%s11530_s12 + $0x118] sm:$0xff]  ;;  %v2098_v0 = vld [vmem:[%s11530_s12 + $0x10] sm:$0xff] }
 0xda5   :  { %v2099_v63 = vld [vmem:[%s11530_s12 + $0x18] sm:$0xff] }
 0xda6   :  { %v9128_v3 = vsub.f32 %v1912_v60, %v1923_v2  ;;  %v1928_v4 = vmul.f32 %v9126_v1, %v9126_v1  ;;  %v2101_v60 = vld [vmem:[%s11530_s12 + $0x98] sm:$0xff] }
 0xda7   :  { %v2214_v2 = vld [vmem:[%s11532_s14 + $0x178] sm:$0xff] }
 0xda8   :  { %v1932_v16 = vsel %vm162_vm1, %v1928_v4, 0.0  ;;  %v1927_v15 = vmul.f32 %v9128_v3, %v9128_v3  ;;  %v2213_v4 = vld [vmem:[%s11532_s14 + $0x170] sm:$0xff] }
 0xda9   :  { %1933 = vadd.xlane.f32.xlu0 %v1932_v16  ;;  %v2228_v16 = vld [vmem:[%s11532_s14 + $0x1e8] sm:$0xff] }
 0xdaa   :  { %v1929_v5 = vsel %vm162_vm1, %v1927_v15, 0.0  ;;  %v2212_v15 = vld [vmem:[%s11532_s14 + $0x168] sm:$0xff] }
 0xdab   :  { %1930 = vadd.xlane.f32.xlu1 %v1929_v5  ;;  %v2227_v5 = vld [vmem:[%s11532_s14 + $0x1e0] sm:$0xff] }
 0xe32   :  { %v1934_v21 = vpop.xlane.xlu0 %1933 }
 0xe33   :  { %v1936_v44 = vmul.f32 0.03125, %v1934_v21  ;;  %v2388_v21 = vld [vmem:[%s11530_s12 + $0x1a8] sm:$0xff] }
 0xe34   :  { %v1931_v45 = vpop.xlane.xlu1 %1930 }
 0xe35   :  { %v1938_v46 = vadd.f32 1e-05, %v1936_v44  ;;  %v1935_v47 = vmul.f32 0.03125, %v1931_v45  ;;  %v2513_v44 = vld [vmem:[%s11532_s14 + $0x2f8] sm:$0xff]  ;;  %v1969_v45 = vlaneseq }
 0xe36   :  { %7878 = vmatprep.subr.mxu0 %v2513_v44  ;;  %v2508_v44 = vld [vmem:[%s11532_s14 + $0x2d0] sm:$0xff] }
 0xe37   :  { %8735 = vrsqrt.f32 %v1938_v46  ;;  %v1937_v48 = vadd.f32 1e-05, %v1935_v47  ;;  %v1970_v46 = vshrl.u32 %v1969_v45, 7  ;;  %v2722_v45 = vld [vmem:[%s11532_s14 + $0x3f0] sm:$0xff] }
 0xe39   :  { %8737 = vrsqrt.f32 %v1937_v48  ;;  %v9405_v47 = vsub.s32 0, %v1970_v46  ;;  %v1967_v48 = vld [vmem:[%s11531_s13] sm:$0x3] }
 0xe44   :  { %v8736_v22 = vpop.eup %8735 }
 0xe45   :  { %v1942_v50 = vmul.f32 %v8736_v22, %v9126_v1  ;;  %v2230_v1 = vld [vmem:[%s11532_s14 + $0x1f8] sm:$0xff]  ;;  %v9410_v22 = vsub.s32 1, %v1970_v46  ;;  %v2492_v46 = vld [vmem:[%s11532_s14 + $0x250] sm:$0xff] }
 0xe46   :  { %v8738_v49 = vpop.eup %8737 }
 0xe47   :  { %v1941_v51 = vmul.f32 %v8738_v49, %v9128_v3  ;;  %v1950_v55 = vmul.f32 %v7327_v52, %v1942_v50  ;;  %v2229_v3 = vld [vmem:[%s11532_s14 + $0x1f0] sm:$0xff]  ;;  %v1972_v49 = vrot.slane %v1967_v48, %v9405_v47  ;;  %v1976_v50 = vrot.slane %v1967_v48, %v9410_v22 }
 0xe48   :  { %v2706_v48 = vld [vmem:[%s11532_s14 + $0x370] sm:$0xff] }
 0xe49   :  { %v1949_v53 = vmul.f32 %v7327_v52, %v1941_v51  ;;  %v9260_v61 = vadd.f32 %v7328_v54, %v1950_v55  ;;  %v2106_v55 = vld [vmem:[%s11531_s13 + $0x2] sm:$0x3] }
 0xe4b   :  { %v9243_v56 = vadd.f32 %v7328_v54, %v1949_v53 }
 0xe4d   :  { %7329 = vmatmul.mubr.msk.f32.vlgmr.msra.gmra.mxu1 %vm162_vm1, %v9243_v56 }
 0xe4e   :  { %2143 = vmatpush1.msra.mxu1 %v2104_v57  ;;  %2055 = vmatprep.mubr.f32.mxu1 %v8805_v17 }
 0xe4f   :  { %2144 = vmatprep.subr.mxu1 %v2103_v58 }
 0xe50   :  { %2145 = vmatpush1.msra.mxu1 %v2102_v59 }
 0xe51   :  { %7330 = vmatmul.mubr.msk.f32.gmra.mxu1 %vm162_vm1, %v9260_v61  ;;  %2146 = vmatprep.subr.mxu1 %v2101_v60 }
 0xe52   :  { %2147 = vmatpush1.msra.mxu1 %v2100_v62  ;;  %2182 = vmatprep.mubr.f32.mxu1 %v8805_v17 }
 0xe53   :  { %2148 = vmatprep.subr.mxu1 %v2099_v63  ;;  %v2111_v63 = vrot.slane %v2106_v55, %v9405_v47 }
 0xe54   :  { %2149 = vmatpush1.msra.mxu1 %v2098_v0  ;;  %v2497_v0 = vld [vmem:[%s11532_s14 + $0x278] sm:$0xff] }
 0xe55   :  { %7331 = vmatmul.mubr.msk.f32.vlgmr.msra.gmra.mxu1 %vm162_vm1, %v9243_v56  ;;  %7802 = vmatprep.subr.mxu1 %v2230_v1 }
 0xe56   :  { %2188 = vmatprep.mubr.f32.mxu1 %v8805_v17  ;;  %7803 = vmatpush3.msra.mxu1 %v2214_v2  ;;  %v2115_v2 = vrot.slane %v2106_v55, %v9410_v22  ;;  %v2490_v55 = vld [vmem:[%s11532_s14 + $0x240] sm:$0xff] }
 0xe57   :  { %7804 = vmatprep.subr.mxu1 %v2229_v3  ;;  %v2512_v3 = vld [vmem:[%s11532_s14 + $0x2f0] sm:$0xff] }
 0xe58   :  { %7805 = vmatpush3.msra.mxu1 %v2213_v4 }
 0xe59   :  { %7332 = vmatmul.mubr.msk.f32.gmra.mxu1 %vm162_vm1, %v9260_v61  ;;  %7806 = vmatprep.subr.mxu1 %v2228_v16  ;;  %v2496_v16 = vld [vmem:[%s11532_s14 + $0x270] sm:$0xff] }
 0xe5a   :  { %7807 = vmatpush3.msra.mxu1 %v2212_v15 }
 0xe5b   :  { %7808 = vmatprep.subr.mxu1 %v2227_v5  ;;  %v2511_v5 = vld [vmem:[%s11532_s14 + $0x2e8] sm:$0xff] }
 0xe5c   :  { %7809 = vmatpush3.msra.mxu1 %v2211_v6 }
 0xe5d   :  { %7810 = vmatprep.subr.mxu1 %v2226_v7 }
 0xe5e   :  { %7811 = vmatpush3.msra.mxu1 %v2210_v8 }
 0xe5f   :  { %7812 = vmatprep.subr.mxu1 %v2225_v9  ;;  %v2495_v9 = vld [vmem:[%s11532_s14 + $0x268] sm:$0xff] }
 0xe60   :  { %7813 = vmatpush3.msra.mxu1 %v2209_v10 }
 0xe61   :  { %7814 = vmatprep.subr.mxu1 %v2224_v11  ;;  %v2510_v11 = vld [vmem:[%s11532_s14 + $0x2e0] sm:$0xff] }
 0xe62   :  { %7815 = vmatpush3.msra.mxu1 %v2208_v12 }
 0xe63   :  { %7816 = vmatprep.subr.mxu1 %v2223_v13  ;;  %v2494_v13 = vld [vmem:[%s11532_s14 + $0x260] sm:$0xff] }
 0xe64   :  { %7817 = vmatpush3.msra.mxu1 %v2207_v14 }
 0xe65   :  { %7818 = vmatprep.subr.mxu1 %v2222_v18 }
 0xe66   :  { %7819 = vmatpush3.msra.mxu1 %v2206_v20 }
 0xe67   :  { %7820 = vmatprep.subr.mxu1 %v2221_v24 }
 0xe68   :  { %7821 = vmatpush3.msra.mxu1 %v2205_v26  ;;  %v2385_v26 = vld [vmem:[%s11530_s12 + $0x120] sm:$0xff] }
 0xe69   :  { %7822 = vmatprep.subr.mxu1 %v2220_v28  ;;  %v2384_v28 = vld [vmem:[%s11530_s12 + $0xa8] sm:$0xff] }
 0xe6a   :  { %7823 = vmatpush3.msra.mxu1 %v2204_v30  ;;  %v2383_v30 = vld [vmem:[%s11530_s12 + $0xa0] sm:$0xff] }
 0xe6b   :  { %7824 = vmatprep.subr.mxu1 %v2219_v32  ;;  %v2381_v32 = vld [vmem:[%s11530_s12 + $0x20] sm:$0xff] }
 0xe6c   :  { %7825 = vmatpush3.msra.mxu1 %v2203_v34  ;;  %v2597_v34 = vld [vmem:[%s11530_s12 + $0x1b0] sm:$0xff] }
 0xe6d   :  { %7826 = vmatprep.subr.mxu1 %v2218_v36  ;;  %v2595_v36 = vld [vmem:[%s11530_s12 + $0x130] sm:$0xff] }
 0xe6e   :  { %7827 = vmatpush3.msra.mxu1 %v2202_v38  ;;  %v2594_v38 = vld [vmem:[%s11530_s12 + $0xb8] sm:$0xff] }
 0xe6f   :  { %7828 = vmatprep.subr.mxu1 %v2217_v39  ;;  %v2593_v39 = vld [vmem:[%s11530_s12 + $0xb0] sm:$0xff] }
 0xe70   :  { %7829 = vmatpush3.msra.mxu1 %v2201_v40  ;;  %v2592_v40 = vld [vmem:[%s11530_s12 + $0x38] sm:$0xff] }
 0xe71   :  { %7830 = vmatprep.subr.mxu1 %v2216_v37  ;;  %v2591_v37 = vld [vmem:[%s11530_s12 + $0x30] sm:$0xff] }
 0xe72   :  { %7831 = vmatpush3.msra.mxu1 %v2200_v41  ;;  %v2509_v41 = vld [vmem:[%s11532_s14 + $0x2d8] sm:$0xff] }
 0xe73   :  { %7832 = vmatprep.subr.mxu1 %v2215_v42  ;;  %v2723_v42 = vld [vmem:[%s11532_s14 + $0x3f8] sm:$0xff] }
 0xe74   :  { %7833 = vmatpush3.msra.mxu1 %v2199_v43  ;;  %v2493_v43 = vld [vmem:[%s11532_s14 + $0x258] sm:$0xff] }
 0xe75   :  { %2425 = vmatprep.subr.mxu1 %v2388_v21  ;;  %v2707_v21 = vld [vmem:[%s11532_s14 + $0x378] sm:$0xff] }
 0xf0d   :  { %v2051_v51 = vpop.f32.mrf.mxu1 }
 0xf0e   :  { %v2052_v52 = vadd.f32 %v2051_v51, %v1972_v49  ;;  %v2491_v51 = vld [vmem:[%s11532_s14 + $0x248] sm:$0xff] }
 0xf0f   :  { %v2053_v53 = vpop.f32.mrf.mxu1 }
 0xf10   :  { %v2054_v54 = vadd.f32 %v2053_v53, %v1976_v50  ;;  %v2062_v59 = vmax.f32 %v2052_v52, 0.0  ;;  %v2705_v52 = vld [vmem:[%s11532_s14 + $0x368] sm:$0xff]  ;;  %v2506_v53 = vld [vmem:[%s11532_s14 + $0x2c0] sm:$0xff] }
 0xf11   :  { %v2057_v57 = vpop.f32.mrf.mxu1 }
 0xf12   :  { %v2063_v58 = vmax.f32 %v2054_v54, 0.0  ;;  %v2058_v60 = vadd.f32 %v2057_v57, %v1972_v49  ;;  %v2507_v49 = vld [vmem:[%s11532_s14 + $0x2c8] sm:$0xff]  ;;  %v2720_v54 = vld [vmem:[%s11532_s14 + $0x3e0] sm:$0xff] }
 0xf13   :  { %v2059_v62 = vpop.f32.mrf.mxu1  ;;  %v2704_v57 = vld [vmem:[%s11532_s14 + $0x360] sm:$0xff] }
 0xf14   :  { %v2060_v1 = vadd.f32 %v2059_v62, %v1976_v50  ;;  %2370 = vmatprep.mubr.f32.mxu0 %v2063_v58  ;;  %v2064_v6 = vmax.f32 %v2058_v60, 0.0  ;;  %v2721_v50 = vld [vmem:[%s11532_s14 + $0x3e8] sm:$0xff]  ;;  %v2505_v58 = vld [vmem:[%s11532_s14 + $0x2b8] sm:$0xff] }
 0xf15   :  { %v2184_v4 = vpop.f32.mrf.mxu1  ;;  %2371 = vmatmul.mubr.f32.vlgmr.msra.gmra.mxu0 %v2062_v59  ;;  %v2719_v59 = vld [vmem:[%s11532_s14 + $0x3d8] sm:$0xff] }
 0xf16   :  { %v2065_v15 = vmax.f32 %v2060_v1, 0.0  ;;  %7879 = vmatpush3.msra.mxu0 %v2497_v0  ;;  %v2185_v7 = vadd.f32 %v2184_v4, %v2111_v63  ;;  %v2489_v60 = vld [vmem:[%s11532_s14 + $0x238] sm:$0xff]  ;;  %v2718_v0 = vld [vmem:[%s11532_s14 + $0x3d0] sm:$0xff]  ;;  %v2717_v4 = vld [vmem:[%s11532_s14 + $0x3c8] sm:$0xff] }
 0xf17   :  { %v2186_v8 = vpop.f32.mrf.mxu1  ;;  %7880 = vmatprep.subr.mxu0 %v2512_v3  ;;  %v2703_v62 = vld [vmem:[%s11532_s14 + $0x358] sm:$0xff]  ;;  %v2488_v1 = vld [vmem:[%s11532_s14 + $0x230] sm:$0xff]  ;;  %v2503_v3 = vld [vmem:[%s11532_s14 + $0x2a8] sm:$0xff] }
 0xf18   :  { %v2187_v10 = vadd.f32 %v2186_v8, %v2115_v2  ;;  %2375 = vmatprep.mubr.f32.mxu0 %v2065_v15  ;;  %7881 = vmatpush3.msra.mxu0 %v2496_v16  ;;  %v2195_v18 = vmax.f32 %v2185_v7, 0.0  ;;  %v2487_v16 = vld [vmem:[%s11532_s14 + $0x228] sm:$0xff]  ;;  %v2486_v7 = vld [vmem:[%s11532_s14 + $0x220] sm:$0xff] }
 0xf19   :  { %v2190_v12 = vpop.f32.mrf.mxu1  ;;  %2376 = vmatmul.mubr.f32.gmra.mxu0 %v2064_v6  ;;  %7882 = vmatprep.subr.mxu0 %v2511_v5  ;;  %v2701_v15 = vld [vmem:[%s11532_s14 + $0x348] sm:$0xff]  ;;  %v2502_v5 = vld [vmem:[%s11532_s14 + $0x2a0] sm:$0xff] }
 0xf1a   :  { %v2196_v14 = vmax.f32 %v2187_v10, 0.0  ;;  %7883 = vmatpush3.msra.mxu0 %v2495_v9  ;;  %v2191_v19 = vadd.f32 %v2190_v12, %v2111_v63  ;;  %v2504_v63 = vld [vmem:[%s11532_s14 + $0x2b0] sm:$0xff]  ;;  %v2716_v6 = vld [vmem:[%s11532_s14 + $0x3c0] sm:$0xff]  ;;  %v2501_v9 = vld [vmem:[%s11532_s14 + $0x298] sm:$0xff] }
 0xf1b   :  { %v2192_v20 = vpop.f32.mrf.mxu1  ;;  %7884 = vmatprep.subr.mxu0 %v2510_v11  ;;  %v2700_v8 = vld [vmem:[%s11532_s14 + $0x340] sm:$0xff]  ;;  %v2715_v10 = vld [vmem:[%s11532_s14 + $0x3b8] sm:$0xff] }
 0xf1c   :  { %v2193_v24 = vadd.f32 %v2192_v20, %v2115_v2  ;;  %2295 = vmatprep.mubr.f32.mxu1 %v2196_v14  ;;  %7885 = vmatpush3.msra.mxu0 %v2494_v13  ;;  %v2197_v29 = vmax.f32 %v2191_v19, 0.0  ;;  %v2702_v2 = vld [vmem:[%s11532_s14 + $0x350] sm:$0xff]  ;;  %v2485_v11 = vld [vmem:[%s11532_s14 + $0x218] sm:$0xff]  ;;  %v2499_v20 = vld [vmem:[%s11532_s14 + $0x288] sm:$0xff] }
 0xf1d   :  { %2296 = vmatmul.mubr.f32.vlgmr.msra.gmra.mxu1 %v2195_v18  ;;  %7886 = vmatprep.subr.mxu0 %v2509_v41  ;;  %v2699_v12 = vld [vmem:[%s11532_s14 + $0x338] sm:$0xff]  ;;  %v2500_v13 = vld [vmem:[%s11532_s14 + $0x290] sm:$0xff] }
 0xf1e   :  { %v2198_v27 = vmax.f32 %v2193_v24, 0.0  ;;  %2426 = vmatpush1.msra.mxu1 %v2387_v23  ;;  %7887 = vmatpush3.msra.mxu0 %v2493_v43  ;;  %v2714_v14 = vld [vmem:[%s11532_s14 + $0x3b0] sm:$0xff]  ;;  %v2713_v23 = vld [vmem:[%s11532_s14 + $0x3a8] sm:$0xff] }
 0xf1f   :  { %2427 = vmatprep.subr.mxu1 %v2386_v25  ;;  %7888 = vmatprep.subr.mxu0 %v2508_v44  ;;  %v2484_v18 = vld [vmem:[%s11532_s14 + $0x210] sm:$0xff]  ;;  %v2483_v24 = vld [vmem:[%s11532_s14 + $0x208] sm:$0xff] }
 0xf20   :  { %2300 = vmatprep.mubr.f32.mxu1 %v2198_v27  ;;  %2428 = vmatpush1.msra.mxu1 %v2385_v26  ;;  %v2698_v19 = vld [vmem:[%s11532_s14 + $0x330] sm:$0xff]  ;;  %v2697_v25 = vld [vmem:[%s11532_s14 + $0x328] sm:$0xff]  ;;  %v2498_v26 = vld [vmem:[%s11532_s14 + $0x280] sm:$0xff] }
 0xf21   :  { %2301 = vmatmul.mubr.f32.gmra.mxu1 %v2197_v29  ;;  %2429 = vmatprep.subr.mxu1 %v2384_v28  ;;  %v2712_v27 = vld [vmem:[%s11532_s14 + $0x3a0] sm:$0xff] }
 0xf22   :  { %2430 = vmatpush1.msra.mxu1 %v2383_v30  ;;  %2465 = vmatprep.mubr.f32.mxu1 %v8805_v17  ;;  %v2482_v28 = vld [vmem:[%s11532_s14 + $0x200] sm:$0xff]  ;;  %v2711_v30 = vld [vmem:[%s11532_s14 + $0x398] sm:$0xff] }
 0xf23   :  { %2431 = vmatprep.subr.mxu1 %v2382_v31  ;;  %7889 = vmatpush3.msra.mxu0 %v2492_v46  ;;  %v2696_v29 = vld [vmem:[%s11532_s14 + $0x320] sm:$0xff]  ;;  %v2808_v31 = vld [vmem:[%s11530_s12 + $0x1c8] sm:$0xff] }
 0xf24   :  { %2432 = vmatpush1.msra.mxu1 %v2381_v32  ;;  %7890 = vmatprep.subr.mxu0 %v2507_v49  ;;  %v2695_v32 = vld [vmem:[%s11532_s14 + $0x318] sm:$0xff]  ;;  %v2389_v46 = vld [vmem:[%s11531_s13 + $0x4] sm:$0x3] }
 0xf25   :  { %7333 = vmatmul.mubr.msk.f32.vlgmr.msra.gmra.mxu1 %vm162_vm1, %v9243_v56  ;;  %2635 = vmatprep.subr.mxu1 %v2598_v33  ;;  %v2710_v33 = vld [vmem:[%s11532_s14 + $0x390] sm:$0xff] }
 0xf26   :  { %2636 = vmatpush1.msra.mxu1 %v2597_v34  ;;  %2471 = vmatprep.mubr.f32.mxu1 %v8805_v17  ;;  %v2694_v34 = vld [vmem:[%s11532_s14 + $0x310] sm:$0xff] }
 0xf27   :  { %2637 = vmatprep.subr.mxu1 %v2596_v35  ;;  %7891 = vmatpush3.msra.mxu0 %v2491_v51  ;;  %v2709_v35 = vld [vmem:[%s11532_s14 + $0x388] sm:$0xff] }
 0xf28   :  { %2638 = vmatpush1.msra.mxu1 %v2595_v36  ;;  %7892 = vmatprep.subr.mxu0 %v2506_v53  ;;  %v2693_v36 = vld [vmem:[%s11532_s14 + $0x308] sm:$0xff] }
 0xf29   :  { %7334 = vmatmul.mubr.msk.f32.gmra.mxu1 %vm162_vm1, %v9260_v61  ;;  %2639 = vmatprep.subr.mxu1 %v2594_v38  ;;  %v2708_v38 = vld [vmem:[%s11532_s14 + $0x380] sm:$0xff] }
 0xf2a   :  { %2640 = vmatpush1.msra.mxu1 %v2593_v39  ;;  %2675 = vmatprep.mubr.f32.mxu1 %v8805_v17  ;;  %v2692_v39 = vld [vmem:[%s11532_s14 + $0x300] sm:$0xff] }
 0xf2b   :  { %2641 = vmatprep.subr.mxu1 %v2592_v40  ;;  %7893 = vmatpush3.msra.mxu0 %v2490_v55  ;;  %v3018_v40 = vld [vmem:[%s11530_s12 + $0x1d8] sm:$0xff]  ;;  %v2398_v55 = vrot.slane %v2389_v46, %v9410_v22 }
 0xf2c   :  { %2642 = vmatpush1.msra.mxu1 %v2591_v37  ;;  %7894 = vmatprep.subr.mxu0 %v2505_v58 }
 0xf2d   :  { %7335 = vmatmul.mubr.msk.f32.vlgmr.msra.gmra.mxu1 %vm162_vm1, %v9243_v56  ;;  %7916 = vmatprep.subr.mxu1 %v2723_v42 }
 0xf2e   :  { %2681 = vmatprep.mubr.f32.mxu1 %v8805_v17  ;;  %7917 = vmatpush3.msra.mxu1 %v2707_v21 }
 0xf2f   :  { %7918 = vmatprep.subr.mxu1 %v2722_v45  ;;  %7895 = vmatpush3.msra.mxu0 %v2489_v60 }
 0xf30   :  { %7919 = vmatpush3.msra.mxu1 %v2706_v48  ;;  %7896 = vmatprep.subr.mxu0 %v2504_v63  ;;  %v2599_v63 = vld [vmem:[%s11531_s13 + $0x6] sm:$0x3] }
 0xf31   :  { %7336 = vmatmul.mubr.msk.f32.gmra.mxu1 %vm162_vm1, %v9260_v61  ;;  %7920 = vmatprep.subr.mxu1 %v2721_v50 }
 0xf32   :  { %7921 = vmatpush3.msra.mxu1 %v2705_v52  ;;  %7897 = vmatpush3.msra.mxu0 %v2488_v1  ;;  %v2394_v52 = vrot.slane %v2389_v46, %v9405_v47  ;;  %v2914_v46 = vld [vmem:[%s11532_s14 + $0x460] sm:$0xff] }
 0xf33   :  { %7922 = vmatprep.subr.mxu1 %v2720_v54  ;;  %7898 = vmatprep.subr.mxu0 %v2503_v3 }
 0xf34   :  { %7923 = vmatpush3.msra.mxu1 %v2704_v57  ;;  %7899 = vmatpush3.msra.mxu0 %v2487_v16  ;;  %v2604_v16 = vrot.slane %v2599_v63, %v9405_v47 }
 0xf35   :  { %7924 = vmatprep.subr.mxu1 %v2719_v59  ;;  %7900 = vmatprep.subr.mxu0 %v2502_v5 }
 0xf36   :  { %7925 = vmatpush3.msra.mxu1 %v2703_v62  ;;  %7901 = vmatpush3.msra.mxu0 %v2486_v7  ;;  %v2806_v7 = vld [vmem:[%s11530_s12 + $0x148] sm:$0xff] }
 0xf37   :  { %7926 = vmatprep.subr.mxu1 %v2718_v0  ;;  %7902 = vmatprep.subr.mxu0 %v2501_v9  ;;  %v2805_v9 = vld [vmem:[%s11530_s12 + $0x140] sm:$0xff] }
 0xf38   :  { %7927 = vmatpush3.msra.mxu1 %v2702_v2  ;;  %7903 = vmatpush3.msra.mxu0 %v2485_v11  ;;  %v2804_v11 = vld [vmem:[%s11530_s12 + $0xc8] sm:$0xff] }
 0xf39   :  { %7928 = vmatprep.subr.mxu1 %v2717_v4  ;;  %7904 = vmatprep.subr.mxu0 %v2500_v13 }
 0xf3a   :  { %7929 = vmatpush3.msra.mxu1 %v2701_v15  ;;  %7905 = vmatpush3.msra.mxu0 %v2484_v18  ;;  %v2807_v15 = vld [vmem:[%s11530_s12 + $0x1c0] sm:$0xff] }
 0xf3b   :  { %7930 = vmatprep.subr.mxu1 %v2716_v6  ;;  %7906 = vmatprep.subr.mxu0 %v2499_v20  ;;  %v2608_v6 = vrot.slane %v2599_v63, %v9410_v22  ;;  %v2803_v18 = vld [vmem:[%s11530_s12 + $0xc0] sm:$0xff]  ;;  %v2802_v20 = vld [vmem:[%s11530_s12 + $0x48] sm:$0xff] }
 0xf3c   :  { %7931 = vmatpush3.msra.mxu1 %v2700_v8  ;;  %7907 = vmatpush3.msra.mxu0 %v2483_v24  ;;  %v2801_v24 = vld [vmem:[%s11530_s12 + $0x40] sm:$0xff] }
 0xf3d   :  { %7932 = vmatprep.subr.mxu1 %v2715_v10  ;;  %7908 = vmatprep.subr.mxu0 %v2498_v26  ;;  %v3140_v63 = vld [vmem:[%s11532_s14 + $0x5e0] sm:$0xff] }
 0xf3e   :  { %7933 = vmatpush3.msra.mxu1 %v2699_v12  ;;  %7909 = vmatpush3.msra.mxu0 %v2482_v28 }
 0xf3f   :  { %7934 = vmatprep.subr.mxu1 %v2714_v14  ;;  %2845 = vmatprep.subr.mxu0 %v2808_v31  ;;  %v3016_v31 = vld [vmem:[%s11530_s12 + $0x158] sm:$0xff] }
 0xf40   :  { %7935 = vmatpush3.msra.mxu1 %v2698_v19 }
 0xf41   :  { %7936 = vmatprep.subr.mxu1 %v2713_v23 }
 0xf42   :  { %7937 = vmatpush3.msra.mxu1 %v2697_v25 }
 0xf43   :  { %7938 = vmatprep.subr.mxu1 %v2712_v27 }
 0xf44   :  { %7939 = vmatpush3.msra.mxu1 %v2696_v29  ;;  %v3017_v29 = vld [vmem:[%s11530_s12 + $0x1d0] sm:$0xff] }
 0xf45   :  { %7940 = vmatprep.subr.mxu1 %v2711_v30 }
 0xf46   :  { %7941 = vmatpush3.msra.mxu1 %v2695_v32  ;;  %v2933_v32 = vld [vmem:[%s11532_s14 + $0x4f8] sm:$0xff] }
 0xf47   :  { %7942 = vmatprep.subr.mxu1 %v2710_v33  ;;  %v3015_v33 = vld [vmem:[%s11530_s12 + $0x150] sm:$0xff] }
 0xf48   :  { %7943 = vmatpush3.msra.mxu1 %v2694_v34 }
 0xf49   :  { %7944 = vmatprep.subr.mxu1 %v2709_v35 }
 0xf4a   :  { %7945 = vmatpush3.msra.mxu1 %v2693_v36  ;;  %v3014_v36 = vld [vmem:[%s11530_s12 + $0xd8] sm:$0xff] }
 0xf4b   :  { %7946 = vmatprep.subr.mxu1 %v2708_v38  ;;  %v3013_v38 = vld [vmem:[%s11530_s12 + $0xd0] sm:$0xff] }
 0xf4c   :  { %7947 = vmatpush3.msra.mxu1 %v2692_v39  ;;  %v2917_v39 = vld [vmem:[%s11532_s14 + $0x478] sm:$0xff] }
 0xf4d   :  { %3055 = vmatprep.subr.mxu1 %v3018_v40  ;;  %v3012_v40 = vld [vmem:[%s11530_s12 + $0x58] sm:$0xff] }
 0xfd5   :  { %v7872_v37 = vpop.f32.mrf.mxu0 }
 0xfd7   :  { %v7873_v41 = vpop.f32.mrf.mxu0 }
 0xfd8   :  { %v7874_v42 = vadd.f32 %v7873_v41, %v7872_v37  ;;  %v2932_v37 = vld [vmem:[%s11532_s14 + $0x4f0] sm:$0xff] }
 0xfd9   :  { %v7875_v43 = vpop.f32.mrf.mxu0  ;;  %v3011_v41 = vld [vmem:[%s11530_s12 + $0x50] sm:$0xff] }
 0xfdb   :  { %v7876_v48 = vpop.f32.mrf.mxu0 }
 0xfdc   :  { %v7877_v53 = vadd.f32 %v7876_v48, %v7875_v43  ;;  %v2931_v43 = vld [vmem:[%s11532_s14 + $0x4e8] sm:$0xff]  ;;  %v3127_v48 = vld [vmem:[%s11532_s14 + $0x578] sm:$0xff] }
 0xfdd   :  { %v7834_v21 = vpop.f32.mrf.mxu1 }
 0xfdf   :  { %v7835_v44 = vpop.f32.mrf.mxu1 }
 0xfe0   :  { %v7836_v45 = vadd.f32 %v7835_v44, %v7834_v21  ;;  %v2915_v21 = vld [vmem:[%s11532_s14 + $0x468] sm:$0xff]  ;;  %v2930_v44 = vld [vmem:[%s11532_s14 + $0x4e0] sm:$0xff] }
 0xfe1   :  { %v7837_v49 = vpop.f32.mrf.mxu1 }
 0xfe2   :  { %v9674_v50 = vadd.f32 %v7874_v42, %v7836_v45  ;;  %v2916_v42 = vld [vmem:[%s11532_s14 + $0x470] sm:$0xff]  ;;  %v3143_v45 = vld [vmem:[%s11532_s14 + $0x5f8] sm:$0xff] }
 0xfe3   :  { %v7838_v51 = vpop.f32.mrf.mxu1 }
 0xfe4   :  { %v7839_v54 = vadd.f32 %v7838_v51, %v7837_v49  ;;  %v2929_v49 = vld [vmem:[%s11532_s14 + $0x4d8] sm:$0xff] }
 0xfe5   :  { %v2467_v57 = vpop.f32.mrf.mxu1  ;;  %v2913_v51 = vld [vmem:[%s11532_s14 + $0x458] sm:$0xff] }
 0xfe6   :  { %v9678_v58 = vadd.f32 %v7877_v53, %v7839_v54  ;;  %v2468_v59 = vadd.f32 %v2467_v57, %v2394_v52  ;;  %v2928_v53 = vld [vmem:[%s11532_s14 + $0x4d0] sm:$0xff]  ;;  %v3141_v57 = vld [vmem:[%s11532_s14 + $0x5e8] sm:$0xff] }
 0xfe7   :  { %v2469_v60 = vpop.f32.mrf.mxu1  ;;  %v3126_v54 = vld [vmem:[%s11532_s14 + $0x570] sm:$0xff] }
 0xfe8   :  { %v2470_v62 = vadd.f32 %v2469_v60, %v2398_v55  ;;  %v2478_v2 = vmax.f32 %v2468_v59, 0.0  ;;  %v2927_v59 = vld [vmem:[%s11532_s14 + $0x4c8] sm:$0xff] }
 0xfe9   :  { %v2473_v0 = vpop.f32.mrf.mxu1  ;;  %v3125_v60 = vld [vmem:[%s11532_s14 + $0x568] sm:$0xff] }
 0xfea   :  { %v2479_v1 = vmax.f32 %v2470_v62, 0.0  ;;  %v2474_v3 = vadd.f32 %v2473_v0, %v2394_v52  ;;  %v3142_v52 = vld [vmem:[%s11532_s14 + $0x5f0] sm:$0xff]  ;;  %v2911_v62 = vld [vmem:[%s11532_s14 + $0x448] sm:$0xff]  ;;  %v2926_v0 = vld [vmem:[%s11532_s14 + $0x4c0] sm:$0xff] }
 0xfeb   :  { %v2475_v4 = vpop.f32.mrf.mxu1 }
 0xfec   :  { %v2476_v5 = vadd.f32 %v2475_v4, %v2398_v55  ;;  %2578 = vmatprep.mubr.f32.mxu0 %v2479_v1  ;;  %v2480_v12 = vmax.f32 %v2474_v3, 0.0  ;;  %v2912_v55 = vld [vmem:[%s11532_s14 + $0x450] sm:$0xff]  ;;  %v3124_v1 = vld [vmem:[%s11532_s14 + $0x560] sm:$0xff]  ;;  %v2925_v3 = vld [vmem:[%s11532_s14 + $0x4b8] sm:$0xff] }
 0xfed   :  { %2579 = vmatmul.mubr.f32.vlgmr.msra.gmra.mxu0 %v2478_v2  ;;  %v2677_v8 = vpop.f32.mrf.mxu1  ;;  %v2910_v2 = vld [vmem:[%s11532_s14 + $0x440] sm:$0xff]  ;;  %v3139_v4 = vld [vmem:[%s11532_s14 + $0x5d8] sm:$0xff] }
 0xfee   :  { %v2481_v10 = vmax.f32 %v2476_v5, 0.0  ;;  %2846 = vmatpush1.msra.mxu0 %v2807_v15  ;;  %v2678_v13 = vadd.f32 %v2677_v8, %v2604_v16  ;;  %v3123_v15 = vld [vmem:[%s11532_s14 + $0x558] sm:$0xff]  ;;  %v2924_v5 = vld [vmem:[%s11532_s14 + $0x4b0] sm:$0xff] }
 0xfef   :  { %v2679_v14 = vpop.f32.mrf.mxu1  ;;  %2847 = vmatprep.subr.mxu0 %v2806_v7  ;;  %v2908_v7 = vld [vmem:[%s11532_s14 + $0x430] sm:$0xff] }
 0xff0   :  { %v2680_v19 = vadd.f32 %v2679_v14, %v2608_v6  ;;  %2583 = vmatprep.mubr.f32.mxu0 %v2481_v10  ;;  %2848 = vmatpush1.msra.mxu0 %v2805_v9  ;;  %v2688_v26 = vmax.f32 %v2678_v13, 0.0  ;;  %v3122_v8 = vld [vmem:[%s11532_s14 + $0x550] sm:$0xff]  ;;  %v2923_v9 = vld [vmem:[%s11532_s14 + $0x4a8] sm:$0xff]  ;;  %v2922_v13 = vld [vmem:[%s11532_s14 + $0x4a0] sm:$0xff] }
 0xff1   :  { %2584 = vmatmul.mubr.f32.gmra.mxu0 %v2480_v12  ;;  %v2683_v23 = vpop.f32.mrf.mxu1  ;;  %2849 = vmatprep.subr.mxu0 %v2804_v11  ;;  %v3137_v10 = vld [vmem:[%s11532_s14 + $0x5c8] sm:$0xff]  ;;  %v3136_v14 = vld [vmem:[%s11532_s14 + $0x5c0] sm:$0xff] }
 0xff2   :  { %v2689_v25 = vmax.f32 %v2680_v19, 0.0  ;;  %2850 = vmatpush1.msra.mxu0 %v2803_v18  ;;  %2885 = vmatprep.mubr.f32.mxu0 %v8805_v17  ;;  %v2684_v27 = vadd.f32 %v2683_v23, %v2604_v16  ;;  %v2909_v16 = vld [vmem:[%s11532_s14 + $0x438] sm:$0xff]  ;;  %v2907_v11 = vld [vmem:[%s11532_s14 + $0x428] sm:$0xff]  ;;  %v2906_v18 = vld [vmem:[%s11532_s14 + $0x420] sm:$0xff] }
 0xff3   :  { %v2685_v28 = vpop.f32.mrf.mxu1  ;;  %2851 = vmatprep.subr.mxu0 %v2802_v20  ;;  %v3121_v12 = vld [vmem:[%s11532_s14 + $0x548] sm:$0xff]  ;;  %v3120_v19 = vld [vmem:[%s11532_s14 + $0x540] sm:$0xff]  ;;  %v2921_v20 = vld [vmem:[%s11532_s14 + $0x498] sm:$0xff] }
 0xff4   :  { %v2686_v30 = vadd.f32 %v2685_v28, %v2608_v6  ;;  %2788 = vmatprep.mubr.f32.mxu1 %v2689_v25  ;;  %2852 = vmatpush1.msra.mxu0 %v2801_v24  ;;  %v2690_v35 = vmax.f32 %v2684_v27, 0.0  ;;  %v3138_v6 = vld [vmem:[%s11532_s14 + $0x5d0] sm:$0xff]  ;;  %v3135_v23 = vld [vmem:[%s11532_s14 + $0x5b8] sm:$0xff] }
 0xff5   :  { %2789 = vmatmul.mubr.f32.vlgmr.msra.gmra.mxu1 %v2688_v26  ;;  %7337 = vmatmul.mubr.msk.f32.vlgmr.msra.gmra.mxu0 %vm162_vm1, %v9243_v56  ;;  %v2905_v24 = vld [vmem:[%s11532_s14 + $0x418] sm:$0xff]  ;;  %v2920_v26 = vld [vmem:[%s11532_s14 + $0x490] sm:$0xff] }
 0xff6   :  { %v2691_v34 = vmax.f32 %v2686_v30, 0.0  ;;  %3056 = vmatpush1.msra.mxu1 %v3017_v29  ;;  %2891 = vmatprep.mubr.f32.mxu0 %v8805_v17  ;;  %v3119_v25 = vld [vmem:[%s11532_s14 + $0x538] sm:$0xff]  ;;  %v3134_v27 = vld [vmem:[%s11532_s14 + $0x5b0] sm:$0xff]  ;;  %v2919_v30 = vld [vmem:[%s11532_s14 + $0x488] sm:$0xff] }
 0xff7   :  { %3057 = vmatprep.subr.mxu1 %v3016_v31  ;;  %7954 = vmatprep.subr.mxu0 %v2933_v32  ;;  %v2904_v28 = vld [vmem:[%s11532_s14 + $0x410] sm:$0xff]  ;;  %v3133_v31 = vld [vmem:[%s11532_s14 + $0x5a8] sm:$0xff] }
 0xff8   :  { %2793 = vmatprep.mubr.f32.mxu1 %v2691_v34  ;;  %3058 = vmatpush1.msra.mxu1 %v3015_v33  ;;  %v3118_v29 = vld [vmem:[%s11532_s14 + $0x530] sm:$0xff]  ;;  %v2903_v32 = vld [vmem:[%s11532_s14 + $0x408] sm:$0xff]  ;;  %v2918_v34 = vld [vmem:[%s11532_s14 + $0x480] sm:$0xff] }
 0xff9   :  { %2794 = vmatmul.mubr.f32.gmra.mxu1 %v2690_v35  ;;  %7338 = vmatmul.mubr.msk.f32.gmra.mxu0 %vm162_vm1, %v9260_v61  ;;  %v3117_v33 = vld [vmem:[%s11532_s14 + $0x528] sm:$0xff]  ;;  %v3132_v35 = vld [vmem:[%s11532_s14 + $0x5a0] sm:$0xff] }
 0xffa   :  { %3059 = vmatprep.subr.mxu1 %v3014_v36  ;;  %3095 = vmatprep.mubr.f32.mxu1 %v8805_v17  ;;  %v2902_v36 = vld [vmem:[%s11532_s14 + $0x400] sm:$0xff] }
 0xffb   :  { %3060 = vmatpush1.msra.mxu1 %v3013_v38  ;;  %7955 = vmatpush3.msra.mxu0 %v2917_v39  ;;  %v3116_v38 = vld [vmem:[%s11532_s14 + $0x520] sm:$0xff]  ;;  %v3131_v39 = vld [vmem:[%s11532_s14 + $0x598] sm:$0xff] }
 0xffc   :  { %3061 = vmatprep.subr.mxu1 %v3012_v40  ;;  %7956 = vmatprep.subr.mxu0 %v2932_v37  ;;  %v3228_v40 = vld [vmem:[%s11530_s12 + $0x1e8] sm:$0xff]  ;;  %v3115_v37 = vld [vmem:[%s11532_s14 + $0x518] sm:$0xff] }
 0xffd   :  { %3062 = vmatpush1.msra.mxu1 %v3011_v41  ;;  %7957 = vmatpush3.msra.mxu0 %v2916_v42  ;;  %v3130_v41 = vld [vmem:[%s11532_s14 + $0x590] sm:$0xff] }
 0xffe   :  { %7339 = vmatmul.mubr.msk.f32.vlgmr.msra.gmra.mxu1 %vm162_vm1, %v9243_v56  ;;  %7958 = vmatprep.subr.mxu0 %v2931_v43  ;;  %v3114_v42 = vld [vmem:[%s11532_s14 + $0x510] sm:$0xff]  ;;  %v3129_v43 = vld [vmem:[%s11532_s14 + $0x588] sm:$0xff] }
 0xfff   :  { %3101 = vmatprep.mubr.f32.mxu1 %v8805_v17  ;;  %7959 = vmatpush3.msra.mxu0 %v2915_v21  ;;  %v3113_v21 = vld [vmem:[%s11532_s14 + $0x508] sm:$0xff] }
0x1000   :  { %7960 = vmatprep.subr.mxu0 %v2930_v44  ;;  %7992 = vmatprep.subr.mxu1 %v3143_v45  ;;  %v3128_v44 = vld [vmem:[%s11532_s14 + $0x580] sm:$0xff] }
0x1001   :  { %7961 = vmatpush3.msra.mxu0 %v2914_v46  ;;  %7993 = vmatpush3.msra.mxu1 %v3127_v48  ;;  %v3112_v45 = vld [vmem:[%s11532_s14 + $0x500] sm:$0xff]  ;;  %v3438_v46 = vld [vmem:[%s11530_s12 + $0x1f8] sm:$0xff] }
0x1002   :  { %7340 = vmatmul.mubr.msk.f32.gmra.mxu1 %vm162_vm1, %v9260_v61  ;;  %7962 = vmatprep.subr.mxu0 %v2929_v49 }
0x1003   :  { %7963 = vmatpush3.msra.mxu0 %v2913_v51  ;;  %7994 = vmatprep.subr.mxu1 %v3142_v52  ;;  %v2809_v52 = vld [vmem:[%s11531_s13 + $0x8] sm:$0x3] }
0x1004   :  { %7964 = vmatprep.subr.mxu0 %v2928_v53  ;;  %7995 = vmatpush3.msra.mxu1 %v3126_v54 }
0x1005   :  { %7965 = vmatpush3.msra.mxu0 %v2912_v55  ;;  %7996 = vmatprep.subr.mxu1 %v3141_v57  ;;  %v2814_v57 = vrot.slane %v2809_v52, %v9405_v47 }
0x1006   :  { %7966 = vmatprep.subr.mxu0 %v2927_v59  ;;  %7997 = vmatpush3.msra.mxu1 %v3125_v60  ;;  %v2818_v60 = vrot.slane %v2809_v52, %v9410_v22  ;;  %v3336_v52 = vld [vmem:[%s11532_s14 + $0x670] sm:$0xff] }
0x1007   :  { %7967 = vmatpush3.msra.mxu0 %v2911_v62  ;;  %7998 = vmatprep.subr.mxu1 %v3140_v63 }
0x1008   :  { %7968 = vmatprep.subr.mxu0 %v2926_v0  ;;  %7999 = vmatpush3.msra.mxu1 %v3124_v1 }
0x1009   :  { %7969 = vmatpush3.msra.mxu0 %v2910_v2  ;;  %8000 = vmatprep.subr.mxu1 %v3139_v4 }
0x100a   :  { %7970 = vmatprep.subr.mxu0 %v2925_v3  ;;  %8001 = vmatpush3.msra.mxu1 %v3123_v15 }
0x100b   :  { %7971 = vmatpush3.msra.mxu0 %v2909_v16  ;;  %8002 = vmatprep.subr.mxu1 %v3138_v6 }
0x100c   :  { %7972 = vmatprep.subr.mxu0 %v2924_v5  ;;  %8003 = vmatpush3.msra.mxu1 %v3122_v8 }
0x100d   :  { %7973 = vmatpush3.msra.mxu0 %v2908_v7  ;;  %8004 = vmatprep.subr.mxu1 %v3137_v10 }
0x100e   :  { %7974 = vmatprep.subr.mxu0 %v2923_v9  ;;  %8005 = vmatpush3.msra.mxu1 %v3121_v12 }
0x100f   :  { %7975 = vmatpush3.msra.mxu0 %v2907_v11  ;;  %8006 = vmatprep.subr.mxu1 %v3136_v14 }
0x1010   :  { %7976 = vmatprep.subr.mxu0 %v2922_v13  ;;  %8007 = vmatpush3.msra.mxu1 %v3120_v19 }
0x1011   :  { %7977 = vmatpush3.msra.mxu0 %v2906_v18  ;;  %8008 = vmatprep.subr.mxu1 %v3135_v23  ;;  %v3226_v18 = vld [vmem:[%s11530_s12 + $0x168] sm:$0xff] }
0x1012   :  { %7978 = vmatprep.subr.mxu0 %v2921_v20  ;;  %8009 = vmatpush3.msra.mxu1 %v3119_v25  ;;  %v3225_v20 = vld [vmem:[%s11530_s12 + $0x160] sm:$0xff] }
0x1013   :  { %7979 = vmatpush3.msra.mxu0 %v2905_v24  ;;  %8010 = vmatprep.subr.mxu1 %v3134_v27 }
0x1014   :  { %7980 = vmatprep.subr.mxu0 %v2920_v26  ;;  %8011 = vmatpush3.msra.mxu1 %v3118_v29  ;;  %v3224_v26 = vld [vmem:[%s11530_s12 + $0xe8] sm:$0xff] }
0x1015   :  { %7981 = vmatpush3.msra.mxu0 %v2904_v28  ;;  %8012 = vmatprep.subr.mxu1 %v3133_v31  ;;  %v3223_v28 = vld [vmem:[%s11530_s12 + $0xe0] sm:$0xff]  ;;  %v3222_v31 = vld [vmem:[%s11530_s12 + $0x68] sm:$0xff] }
0x1016   :  { %7982 = vmatprep.subr.mxu0 %v2919_v30  ;;  %8013 = vmatpush3.msra.mxu1 %v3117_v33  ;;  %v3221_v33 = vld [vmem:[%s11530_s12 + $0x60] sm:$0xff] }
0x1017   :  { %7983 = vmatpush3.msra.mxu0 %v2903_v32  ;;  %8014 = vmatprep.subr.mxu1 %v3132_v35 }
0x1018   :  { %7984 = vmatprep.subr.mxu0 %v2918_v34  ;;  %8015 = vmatpush3.msra.mxu1 %v3116_v38 }
0x1019   :  { %7985 = vmatpush3.msra.mxu0 %v2902_v36  ;;  %8016 = vmatprep.subr.mxu1 %v3131_v39 }
0x101a   :  { %3265 = vmatprep.subr.mxu0 %v3228_v40  ;;  %8017 = vmatpush3.msra.mxu1 %v3115_v37  ;;  %v3437_v40 = vld [vmem:[%s11530_s12 + $0x1f0] sm:$0xff]  ;;  %v3353_v37 = vld [vmem:[%s11532_s14 + $0x6f8] sm:$0xff] }
0x101b   :  { %8018 = vmatprep.subr.mxu1 %v3130_v41 }
0x101c   :  { %8019 = vmatpush3.msra.mxu1 %v3114_v42  ;;  %v3436_v42 = vld [vmem:[%s11530_s12 + $0x178] sm:$0xff] }
0x101d   :  { %8020 = vmatprep.subr.mxu1 %v3129_v43  ;;  %v3337_v43 = vld [vmem:[%s11532_s14 + $0x678] sm:$0xff] }
0x101e   :  { %8021 = vmatpush3.msra.mxu1 %v3113_v21  ;;  %v3435_v21 = vld [vmem:[%s11530_s12 + $0x170] sm:$0xff] }
0x101f   :  { %8022 = vmatprep.subr.mxu1 %v3128_v44 }
0x1020   :  { %8023 = vmatpush3.msra.mxu1 %v3112_v45 }
0x1021   :  { %3475 = vmatprep.subr.mxu1 %v3438_v46  ;;  %v3434_v46 = vld [vmem:[%s11530_s12 + $0xf8] sm:$0xff] }
0x10ad   :  { %v7910_v48 = vpop.f32.mrf.mxu0 }
0x10af   :  { %v7911_v49 = vpop.f32.mrf.mxu0 }
0x10b0   :  { %v7912_v51 = vadd.f32 %v7911_v49, %v7910_v48  ;;  %v3433_v48 = vld [vmem:[%s11530_s12 + $0xf0] sm:$0xff] }
0x10b1   :  { %v7913_v53 = vpop.f32.mrf.mxu0  ;;  %v3352_v49 = vld [vmem:[%s11532_s14 + $0x6f0] sm:$0xff] }
0x10b2   :  { %v2589_v54 = vadd.f32 %v7912_v51, %v9674_v50  ;;  %v3019_v50 = vld [vmem:[%s11531_s13 + $0xa] sm:$0x3]  ;;  %v3432_v51 = vld [vmem:[%s11530_s12 + $0x78] sm:$0xff] }
0x10b3   :  { %v7914_v55 = vpop.f32.mrf.mxu0  ;;  %v3024_v14 = vrot.slane %v3019_v50, %v9405_v47  ;;  %v3028_v19 = vrot.slane %v3019_v50, %v9410_v22  ;;  %v3545_v50 = vld [vmem:[%s11532_s14 + $0x768] sm:$0xff] }
0x10b4   :  { %v7915_v59 = vadd.f32 %v7914_v55, %v7913_v53  ;;  %v3431_v53 = vld [vmem:[%s11530_s12 + $0x70] sm:$0xff]  ;;  %v3335_v55 = vld [vmem:[%s11532_s14 + $0x668] sm:$0xff] }
0x10b5   :  { %v7948_v62 = vpop.f32.mrf.mxu1  ;;  %v2887_v63 = vpop.f32.mrf.mxu0 }
0x10b6   :  { %v2590_v0 = vadd.f32 %v7915_v59, %v9678_v58  ;;  %v2888_v1 = vadd.f32 %v2887_v63, %v2814_v57  ;;  %v3227_v58 = vld [vmem:[%s11530_s12 + $0x1e0] sm:$0xff]  ;;  %v3547_v63 = vld [vmem:[%s11532_s14 + $0x778] sm:$0xff] }
0x10b7   :  { %v7949_v2 = vpop.f32.mrf.mxu1  ;;  %v2889_v3 = vpop.f32.mrf.mxu0  ;;  %v3334_v59 = vld [vmem:[%s11532_s14 + $0x660] sm:$0xff] }
0x10b8   :  { %v7950_v4 = vadd.f32 %v7949_v2, %v7948_v62  ;;  %v2890_v16 = vadd.f32 %v2889_v3, %v2818_v60  ;;  %v2898_v8 = vmax.f32 %v2888_v1, 0.0  ;;  %v3349_v62 = vld [vmem:[%s11532_s14 + $0x6d8] sm:$0xff]  ;;  %v3348_v1 = vld [vmem:[%s11532_s14 + $0x6d0] sm:$0xff] }
0x10b9   :  { %v7951_v15 = vpop.f32.mrf.mxu1  ;;  %v2893_v5 = vpop.f32.mrf.mxu0  ;;  %v3562_v2 = vld [vmem:[%s11532_s14 + $0x7f0] sm:$0xff] }
0x10ba   :  { %v9947_v6 = vadd.f32 %v7950_v4, %v2589_v54  ;;  %v2899_v7 = vmax.f32 %v2890_v16, 0.0  ;;  %v2894_v9 = vadd.f32 %v2893_v5, %v2814_v57  ;;  %v3351_v54 = vld [vmem:[%s11532_s14 + $0x6e8] sm:$0xff]  ;;  %v3350_v57 = vld [vmem:[%s11532_s14 + $0x6e0] sm:$0xff]  ;;  %v3332_v3 = vld [vmem:[%s11532_s14 + $0x650] sm:$0xff] }
0x10bb   :  { %v7952_v10 = vpop.f32.mrf.mxu1  ;;  %v2895_v11 = vpop.f32.mrf.mxu0  ;;  %v3546_v4 = vld [vmem:[%s11532_s14 + $0x770] sm:$0xff]  ;;  %v3347_v16 = vld [vmem:[%s11532_s14 + $0x6c8] sm:$0xff] }
0x10bc   :  { %v7953_v12 = vadd.f32 %v7952_v10, %v7951_v15  ;;  %v2896_v13 = vadd.f32 %v2895_v11, %v2818_v60  ;;  %2998 = vmatprep.mubr.f32.mxu0 %v2899_v7  ;;  %v2900_v27 = vmax.f32 %v2894_v9, 0.0  ;;  %v3563_v60 = vld [vmem:[%s11532_s14 + $0x7f8] sm:$0xff]  ;;  %v3561_v15 = vld [vmem:[%s11532_s14 + $0x7e8] sm:$0xff]  ;;  %v3346_v7 = vld [vmem:[%s11532_s14 + $0x6c0] sm:$0xff] }
0x10bd   :  { %2999 = vmatmul.mubr.f32.vlgmr.msra.gmra.mxu0 %v2898_v8  ;;  %v3331_v5 = vld [vmem:[%s11532_s14 + $0x648] sm:$0xff]  ;;  %v3560_v8 = vld [vmem:[%s11532_s14 + $0x7e0] sm:$0xff]  ;;  %v3345_v11 = vld [vmem:[%s11532_s14 + $0x6b8] sm:$0xff] }
0x10be   :  { %v9960_v23 = vadd.f32 %v7953_v12, %v2590_v0  ;;  %v2901_v24 = vmax.f32 %v2896_v13, 0.0  ;;  %v3097_v25 = vpop.f32.mrf.mxu1  ;;  %3266 = vmatpush1.msra.mxu0 %v3227_v58  ;;  %v3333_v0 = vld [vmem:[%s11532_s14 + $0x658] sm:$0xff]  ;;  %v3330_v9 = vld [vmem:[%s11532_s14 + $0x640] sm:$0xff] }
0x10bf   :  { %3267 = vmatprep.subr.mxu0 %v3226_v18  ;;  %v3098_v29 = vadd.f32 %v3097_v25, %v3024_v14  ;;  %v3544_v10 = vld [vmem:[%s11532_s14 + $0x760] sm:$0xff]  ;;  %v3559_v58 = vld [vmem:[%s11532_s14 + $0x7d8] sm:$0xff]  ;;  %v3558_v18 = vld [vmem:[%s11532_s14 + $0x7d0] sm:$0xff] }
0x10c0   :  { %v3099_v30 = vpop.f32.mrf.mxu1  ;;  %3003 = vmatprep.mubr.f32.mxu0 %v2901_v24  ;;  %3268 = vmatpush1.msra.mxu0 %v3225_v20  ;;  %v3329_v12 = vld [vmem:[%s11532_s14 + $0x638] sm:$0xff]  ;;  %v3542_v20 = vld [vmem:[%s11532_s14 + $0x750] sm:$0xff]  ;;  %v3343_v24 = vld [vmem:[%s11532_s14 + $0x6a8] sm:$0xff] }
0x10c1   :  { %v3100_v32 = vadd.f32 %v3099_v30, %v3028_v19  ;;  %3004 = vmatmul.mubr.f32.gmra.mxu0 %v2900_v27  ;;  %3269 = vmatprep.subr.mxu0 %v3224_v26  ;;  %v3108_v36 = vmax.f32 %v3098_v29, 0.0  ;;  %v3543_v13 = vld [vmem:[%s11532_s14 + $0x758] sm:$0xff]  ;;  %v3557_v25 = vld [vmem:[%s11532_s14 + $0x7c8] sm:$0xff]  ;;  %v3556_v29 = vld [vmem:[%s11532_s14 + $0x7c0] sm:$0xff] }
0x10c2   :  { %v3103_v34 = vpop.f32.mrf.mxu1  ;;  %3270 = vmatpush1.msra.mxu0 %v3223_v28  ;;  %3305 = vmatprep.mubr.f32.mxu0 %v8805_v17  ;;  %v3327_v26 = vld [vmem:[%s11532_s14 + $0x628] sm:$0xff]  ;;  %v3342_v28 = vld [vmem:[%s11532_s14 + $0x6a0] sm:$0xff] }
0x10c3   :  { %v3109_v35 = vmax.f32 %v3100_v32, 0.0  ;;  %3271 = vmatprep.subr.mxu0 %v3222_v31  ;;  %v3104_v38 = vadd.f32 %v3103_v34, %v3024_v14  ;;  %v3344_v14 = vld [vmem:[%s11532_s14 + $0x6b0] sm:$0xff]  ;;  %v3541_v27 = vld [vmem:[%s11532_s14 + $0x748] sm:$0xff]  ;;  %v3326_v30 = vld [vmem:[%s11532_s14 + $0x620] sm:$0xff] }
0x10c4   :  { %v3105_v39 = vpop.f32.mrf.mxu1  ;;  %3272 = vmatpush1.msra.mxu0 %v3221_v33  ;;  %v3540_v31 = vld [vmem:[%s11532_s14 + $0x740] sm:$0xff]  ;;  %v3341_v32 = vld [vmem:[%s11532_s14 + $0x698] sm:$0xff] }
0x10c5   :  { %v3106_v41 = vadd.f32 %v3105_v39, %v3028_v19  ;;  %3208 = vmatprep.mubr.f32.mxu1 %v3109_v35  ;;  %7341 = vmatmul.mubr.msk.f32.vlgmr.msra.gmra.mxu0 %vm162_vm1, %v9243_v56  ;;  %v3110_v45 = vmax.f32 %v3104_v38, 0.0  ;;  %v3328_v19 = vld [vmem:[%s11532_s14 + $0x630] sm:$0xff]  ;;  %v3555_v33 = vld [vmem:[%s11532_s14 + $0x7b8] sm:$0xff] }
0x10c6   :  { %3209 = vmatmul.mubr.f32.vlgmr.msra.gmra.mxu1 %v3108_v36  ;;  %3311 = vmatprep.mubr.f32.mxu0 %v8805_v17  ;;  %v3325_v34 = vld [vmem:[%s11532_s14 + $0x618] sm:$0xff]  ;;  %v3340_v36 = vld [vmem:[%s11532_s14 + $0x690] sm:$0xff] }
0x10c7   :  { %v3111_v44 = vmax.f32 %v3106_v41, 0.0  ;;  %3476 = vmatpush1.msra.mxu1 %v3437_v40  ;;  %8030 = vmatprep.subr.mxu0 %v3353_v37  ;;  %v3539_v35 = vld [vmem:[%s11532_s14 + $0x738] sm:$0xff]  ;;  %v3554_v38 = vld [vmem:[%s11532_s14 + $0x7b0] sm:$0xff]  ;;  %v3339_v37 = vld [vmem:[%s11532_s14 + $0x688] sm:$0xff] }
0x10c8   :  { %3477 = vmatprep.subr.mxu1 %v3436_v42  ;;  %8031 = vmatpush3.msra.mxu0 %v3337_v43  ;;  %v3324_v39 = vld [vmem:[%s11532_s14 + $0x610] sm:$0xff]  ;;  %v3553_v41 = vld [vmem:[%s11532_s14 + $0x7a8] sm:$0xff] }
0x10c9   :  { %3213 = vmatprep.mubr.f32.mxu1 %v3111_v44  ;;  %3478 = vmatpush1.msra.mxu1 %v3435_v21  ;;  %v3538_v40 = vld [vmem:[%s11532_s14 + $0x730] sm:$0xff]  ;;  %v3323_v42 = vld [vmem:[%s11532_s14 + $0x608] sm:$0xff]  ;;  %v3338_v21 = vld [vmem:[%s11532_s14 + $0x680] sm:$0xff] }
0x10ca   :  { %3214 = vmatmul.mubr.f32.gmra.mxu1 %v3110_v45  ;;  %7342 = vmatmul.mubr.msk.f32.gmra.mxu0 %vm162_vm1, %v9260_v61  ;;  %v3537_v43 = vld [vmem:[%s11532_s14 + $0x728] sm:$0xff]  ;;  %v3552_v44 = vld [vmem:[%s11532_s14 + $0x7a0] sm:$0xff] }
0x10cb   :  { %3479 = vmatprep.subr.mxu1 %v3434_v46  ;;  %3515 = vmatprep.mubr.f32.mxu1 %v8805_v17  ;;  %v3322_v45 = vld [vmem:[%s11532_s14 + $0x600] sm:$0xff] }
0x10cc   :  { %3480 = vmatpush1.msra.mxu1 %v3433_v48  ;;  %8032 = vmatprep.subr.mxu0 %v3352_v49  ;;  %v3536_v46 = vld [vmem:[%s11532_s14 + $0x720] sm:$0xff]  ;;  %v3551_v48 = vld [vmem:[%s11532_s14 + $0x798] sm:$0xff] }
0x10cd   :  { %3481 = vmatprep.subr.mxu1 %v3432_v51  ;;  %8033 = vmatpush3.msra.mxu0 %v3336_v52  ;;  %v3535_v49 = vld [vmem:[%s11532_s14 + $0x718] sm:$0xff]  ;;  %v3550_v51 = vld [vmem:[%s11532_s14 + $0x790] sm:$0xff] }
0x10ce   :  { %3482 = vmatpush1.msra.mxu1 %v3431_v53  ;;  %8034 = vmatprep.subr.mxu0 %v3351_v54  ;;  %v3534_v52 = vld [vmem:[%s11532_s14 + $0x710] sm:$0xff]  ;;  %v3549_v53 = vld [vmem:[%s11532_s14 + $0x788] sm:$0xff] }
0x10cf   :  { %7343 = vmatmul.mubr.msk.f32.vlgmr.msra.gmra.mxu1 %vm162_vm1, %v9243_v56  ;;  %8035 = vmatpush3.msra.mxu0 %v3335_v55  ;;  %v3533_v54 = vld [vmem:[%s11532_s14 + $0x708] sm:$0xff]  ;;  %v3548_v55 = vld [vmem:[%s11532_s14 + $0x780] sm:$0xff] }
0x10d0   :  { %3521 = vmatprep.mubr.f32.mxu1 %v8805_v17  ;;  %8036 = vmatprep.subr.mxu0 %v3350_v57  ;;  %v3532_v57 = vld [vmem:[%s11532_s14 + $0x700] sm:$0xff] }
0x10d1   :  { %8037 = vmatpush3.msra.mxu0 %v3334_v59  ;;  %8068 = vmatprep.subr.mxu1 %v3563_v60 }
0x10d2   :  { %8038 = vmatprep.subr.mxu0 %v3349_v62  ;;  %8069 = vmatpush3.msra.mxu1 %v3547_v63  ;;  %v3229_v63 = vld [vmem:[%s11531_s13 + $0xc] sm:$0x3] }
0x10d3   :  { %7344 = vmatmul.mubr.msk.f32.gmra.mxu1 %vm162_vm1, %v9260_v61  ;;  %8039 = vmatpush3.msra.mxu0 %v3333_v0 }
0x10d4   :  { %8040 = vmatprep.subr.mxu0 %v3348_v1  ;;  %8070 = vmatprep.subr.mxu1 %v3562_v2 }
0x10d5   :  { %8041 = vmatpush3.msra.mxu0 %v3332_v3  ;;  %8071 = vmatpush3.msra.mxu1 %v3546_v4  ;;  %v3234_v3 = vrot.slane %v3229_v63, %v9405_v47 }
0x10d6   :  { %8042 = vmatprep.subr.mxu0 %v3347_v16  ;;  %8072 = vmatprep.subr.mxu1 %v3561_v15  ;;  %v3238_v16 = vrot.slane %v3229_v63, %v9410_v22 }
0x10d7   :  { %8043 = vmatpush3.msra.mxu0 %v3331_v5  ;;  %8073 = vmatpush3.msra.mxu1 %v3545_v50 }
0x10d8   :  { %8044 = vmatprep.subr.mxu0 %v3346_v7  ;;  %8074 = vmatprep.subr.mxu1 %v3560_v8 }
0x10d9   :  { %8045 = vmatpush3.msra.mxu0 %v3330_v9  ;;  %8075 = vmatpush3.msra.mxu1 %v3544_v10 }
0x10da   :  { %8046 = vmatprep.subr.mxu0 %v3345_v11  ;;  %8076 = vmatprep.subr.mxu1 %v3559_v58 }
0x10db   :  { %8047 = vmatpush3.msra.mxu0 %v3329_v12  ;;  %8077 = vmatpush3.msra.mxu1 %v3543_v13 }
0x10dc   :  { %8048 = vmatprep.subr.mxu0 %v3344_v14  ;;  %8078 = vmatprep.subr.mxu1 %v3558_v18 }
0x10dd   :  { %8049 = vmatpush3.msra.mxu0 %v3328_v19  ;;  %8079 = vmatpush3.msra.mxu1 %v3542_v20 }
0x10de   :  { %8050 = vmatprep.subr.mxu0 %v3343_v24  ;;  %8080 = vmatprep.subr.mxu1 %v3557_v25 }
0x10df   :  { %8051 = vmatpush3.msra.mxu0 %v3327_v26  ;;  %8081 = vmatpush3.msra.mxu1 %v3541_v27 }
0x10e0   :  { %8052 = vmatprep.subr.mxu0 %v3342_v28  ;;  %8082 = vmatprep.subr.mxu1 %v3556_v29 }
0x10e1   :  { %8053 = vmatpush3.msra.mxu0 %v3326_v30  ;;  %8083 = vmatpush3.msra.mxu1 %v3540_v31 }
0x10e2   :  { %8054 = vmatprep.subr.mxu0 %v3341_v32  ;;  %8084 = vmatprep.subr.mxu1 %v3555_v33 }
0x10e3   :  { %8055 = vmatpush3.msra.mxu0 %v3325_v34  ;;  %8085 = vmatpush3.msra.mxu1 %v3539_v35 }
0x10e4   :  { %8056 = vmatprep.subr.mxu0 %v3340_v36  ;;  %8086 = vmatprep.subr.mxu1 %v3554_v38 }
0x10e5   :  { %8057 = vmatpush3.msra.mxu0 %v3324_v39  ;;  %8087 = vmatpush3.msra.mxu1 %v3538_v40 }
0x10e6   :  { %8058 = vmatprep.subr.mxu0 %v3339_v37  ;;  %8088 = vmatprep.subr.mxu1 %v3553_v41 }
0x10e7   :  { %8059 = vmatpush3.msra.mxu0 %v3323_v42  ;;  %8089 = vmatpush3.msra.mxu1 %v3537_v43 }
0x10e8   :  { %8060 = vmatprep.subr.mxu0 %v3338_v21  ;;  %8090 = vmatprep.subr.mxu1 %v3552_v44 }
0x10e9   :  { %8061 = vmatpush3.msra.mxu0 %v3322_v45  ;;  %8091 = vmatpush3.msra.mxu1 %v3536_v46 }
0x10ea   :  { %8092 = vmatprep.subr.mxu1 %v3551_v48 }
0x10eb   :  { %8093 = vmatpush3.msra.mxu1 %v3535_v49 }
0x10ec   :  { %8094 = vmatprep.subr.mxu1 %v3550_v51 }
0x10ed   :  { %8095 = vmatpush3.msra.mxu1 %v3534_v52 }
0x10ee   :  { %8096 = vmatprep.subr.mxu1 %v3549_v53 }
0x10ef   :  { %8097 = vmatpush3.msra.mxu1 %v3533_v54 }
0x10f0   :  { %8098 = vmatprep.subr.mxu1 %v3548_v55  ;;  %v7345_v55 = vld [vmem:[%s11533_s15] ss:$0 sm:$0xff] }
0x10f1   :  { %8099 = vmatpush3.msra.mxu1 %v3532_v57 }
0x10f2   :  { %8604 = vmatprep.subr.mxu1 %v8805_v17 }
0x117d   :  { %v7986_v59 = vpop.f32.mrf.mxu0 }
0x117f   :  { %v7987_v60 = vpop.f32.mrf.mxu0 }
0x1180   :  { %v7988_v62 = vadd.f32 %v7987_v60, %v7986_v59 }
0x1181   :  { %v7989_v0 = vpop.f32.mrf.mxu0 }
0x1182   :  { %v3009_v1 = vadd.f32 %v7988_v62, %v9947_v6  ;;  %v3439_v6 = vld [vmem:[%s11531_s13 + $0xe] sm:$0x3] }
0x1183   :  { %v7990_v2 = vpop.f32.mrf.mxu0  ;;  %v3444_v26 = vrot.slane %v3439_v6, %v9405_v47  ;;  %v3448_v27 = vrot.slane %v3439_v6, %v9410_v22  ;;  %v7348_v6 = vld [vmem:[%s11522_s4 + $0x20] sm:$0xff] }
0x1184   :  { %v7991_v4 = vadd.f32 %v7990_v2, %v7989_v0 }
0x1185   :  { %v3307_v15 = vpop.f32.mrf.mxu0 }
0x1186   :  { %v3010_v5 = vadd.f32 %v7991_v4, %v9960_v23  ;;  %v8024_v50 = vpop.f32.mrf.mxu1  ;;  %v3308_v7 = vadd.f32 %v3307_v15, %v3234_v3 }
0x1187   :  { %v3309_v8 = vpop.f32.mrf.mxu0 }
0x1188   :  { %v8025_v9 = vpop.f32.mrf.mxu1  ;;  %v3310_v10 = vadd.f32 %v3309_v8, %v3238_v16  ;;  %v3318_v14 = vmax.f32 %v3308_v7, 0.0 }
0x1189   :  { %v8026_v11 = vadd.f32 %v8025_v9, %v8024_v50 }
0x118a   :  { %v3319_v58 = vmax.f32 %v3310_v10, 0.0  ;;  %v8027_v12 = vpop.f32.mrf.mxu1  ;;  %v3313_v13 = vpop.f32.mrf.mxu0 }
0x118b   :  { %v3219_v18 = vadd.f32 %v8026_v11, %v3009_v1  ;;  %v3314_v19 = vadd.f32 %v3313_v13, %v3234_v3  ;;  %v7349_v13 = vld [vmem:[%s11522_s4 + $0x28] sm:$0xff] }
0x118c   :  { %v8028_v20 = vpop.f32.mrf.mxu1  ;;  %v3315_v24 = vpop.f32.mrf.mxu0  ;;  %3418 = vmatprep.mubr.f32.mxu0 %v3319_v58 }
0x118d   :  { %v8029_v23 = vadd.f32 %v8028_v20, %v8027_v12  ;;  %v3316_v25 = vadd.f32 %v3315_v24, %v3238_v16  ;;  %3419 = vmatmul.mubr.f32.vlgmr.msra.gmra.mxu0 %v3318_v14  ;;  %v3320_v31 = vmax.f32 %v3314_v19, 0.0  ;;  %v7350_v12 = vld [vmem:[%s11522_s4 + $0x30] sm:$0xff] }
0x118f   :  { %v3220_v28 = vadd.f32 %v8029_v23, %v3010_v5  ;;  %v3321_v29 = vmax.f32 %v3316_v25, 0.0  ;;  %v3517_v30 = vpop.f32.mrf.mxu1 }
0x1190   :  { %v3518_v32 = vadd.f32 %v3517_v30, %v3444_v26 }
0x1191   :  { %v3519_v33 = vpop.f32.mrf.mxu1  ;;  %3423 = vmatprep.mubr.f32.mxu0 %v3321_v29 }
0x1192   :  { %v3520_v34 = vadd.f32 %v3519_v33, %v3448_v27  ;;  %3424 = vmatmul.mubr.f32.gmra.mxu0 %v3320_v31  ;;  %v3528_v38 = vmax.f32 %v3518_v32, 0.0 }
0x1193   :  { %v3523_v35 = vpop.f32.mrf.mxu1 }
0x1194   :  { %v3529_v36 = vmax.f32 %v3520_v34, 0.0  ;;  %v3524_v39 = vadd.f32 %v3523_v35, %v3444_v26  ;;  %v7346_v26 = vld [vmem:[%s11528_s10] ss:$0 sm:$0xff]  ;;  %v7353_v35 = vld [vmem:[%s11523_s5 + $0x1] ss:$0 sm:$0xff] }
0x1195   :  { %v3525_v40 = vpop.f32.mrf.mxu1 }
0x1196   :  { %v3526_v37 = vadd.f32 %v3525_v40, %v3448_v27  ;;  %3628 = vmatprep.mubr.f32.mxu1 %v3529_v36  ;;  %v3530_v42 = vmax.f32 %v3524_v39, 0.0 }
0x1197   :  { %3629 = vmatmul.mubr.f32.vlgmr.msra.gmra.mxu1 %v3528_v38 }
0x1198   :  { %v3531_v41 = vmax.f32 %v3526_v37, 0.0 }
0x119a   :  { %3633 = vmatprep.mubr.f32.mxu1 %v3531_v41 }
0x119b   :  { %3634 = vmatmul.mubr.f32.gmra.mxu1 %v3530_v42 }
0x119c   :  { %8606 = vmatprep.mubr.msk.f32.mxu1 %vm8806_vm2, %v8805_v17 }
0x124d   :  { %v8062_v43 = vpop.f32.mrf.mxu0 }
0x124f   :  { %v8063_v21 = vpop.f32.mrf.mxu0 }
0x1250   :  { %v8064_v45 = vadd.f32 %v8063_v21, %v8062_v43 }
0x1252   :  { %v8065_v44 = vpop.f32.mrf.mxu0  ;;  %v3429_v51 = vadd.f32 %v8064_v45, %v3219_v18 }
0x1254   :  { %v8066_v46 = vpop.f32.mrf.mxu0 }
0x1255   :  { %v8067_v52 = vadd.f32 %v8066_v46, %v8065_v44 }
0x1257   :  { %v8100_v48 = vpop.f32.mrf.mxu1  ;;  %v3430_v60 = vadd.f32 %v8067_v52, %v3220_v28  ;;  %v7347_v28 = vld [vmem:[%s11529_s11] ss:$0 sm:$0xff] }
0x1259   :  { %v8101_v49 = vpop.f32.mrf.mxu1 }
0x125a   :  { %v8102_v53 = vadd.f32 %v8101_v49, %v8100_v48 }
0x125b   :  { %v8103_v54 = vpop.f32.mrf.mxu1 }
0x125c   :  { %v3639_v57 = vadd.f32 %v8102_v53, %v3429_v51 }
0x125d   :  { %v8104_v59 = vpop.f32.mrf.mxu1 }
0x125e   :  { %v8105_v62 = vadd.f32 %v8104_v59, %v8103_v54  ;;  %v3648_v63 = vadd.f32 %v7345_v55, %v3639_v57 }
0x1260   :  { %v3640_v0 = vadd.f32 %v8105_v62, %v3430_v60  ;;  %v3650_v1 = vadd.f32 %v3648_v63, %v9243_v56 }
0x1262   :  { %v3654_v2 = vsel %vm162_vm1, %v3650_v1, 0.0  ;;  %v3649_v3 = vadd.f32 %v7345_v55, %v3640_v0 }
0x1263   :  { %3655 = vadd.xlane.f32.xlu1 %v3654_v2 }
0x1264   :  { %v3651_v4 = vadd.f32 %v3649_v3, %v9260_v61  ;;  %v7351_v61 = vld [vmem:[%s11522_s4 + $0x38] sm:$0xff] }
0x1265   :  { %8578 = vmatprep.subr.mxu0 %v7351_v61 }
0x1266   :  { %v3657_v16 = vsel %vm162_vm1, %v3651_v4, 0.0  ;;  %8579 = vmatpush3.msra.mxu0 %v7351_v61 }
0x1267   :  { %3658 = vadd.xlane.f32.xlu0 %v3657_v16  ;;  %8580 = vmatprep.subr.mxu0 %v7350_v12 }
0x1268   :  { %8581 = vmatpush3.msra.mxu0 %v7350_v12 }
0x1269   :  { %8582 = vmatprep.subr.mxu0 %v7349_v13 }
0x126a   :  { %8583 = vmatpush3.msra.mxu0 %v7349_v13 }
0x126b   :  { %8584 = vmatprep.subr.mxu0 %v7348_v6 }
0x126c   :  { %8585 = vmatpush3.msra.mxu0 %v7348_v6 }
0x126d   :  { %8589 = vmatprep.subr.mxu0 %v8805_v17 }
0x12ec   :  { %v3656_v15 = vpop.xlane.xlu1 %3655 }
0x12ed   :  { %v3660_v5 = vmul.f32 0.03125, %v3656_v15 }
0x12ef   :  { %v3662_v50 = vsub.f32 %v3650_v1, %v3660_v5 }
0x12f0   :  { %v3659_v7 = vpop.xlane.xlu0 %3658 }
0x12f1   :  { %v3661_v8 = vmul.f32 0.03125, %v3659_v7  ;;  %v3664_v9 = vmul.f32 %v3662_v50, %v3662_v50 }
0x12f3   :  { %v3663_v10 = vsub.f32 %v3651_v4, %v3661_v8  ;;  %v3666_v11 = vsel %vm162_vm1, %v3664_v9, 0.0 }
0x12f4   :  { %3667 = vadd.xlane.f32.xlu1 %v3666_v11 }
0x12f5   :  { %v3665_v56 = vmul.f32 %v3663_v10, %v3663_v10 }
0x12f7   :  { %v3669_v58 = vsel %vm162_vm1, %v3665_v56, 0.0 }
0x12f8   :  { %3670 = vadd.xlane.f32.xlu0 %v3669_v58 }
0x137d   :  { %v3668_v14 = vpop.xlane.xlu1 %3667 }
0x137e   :  { %v3672_v18 = vmul.f32 0.03125, %v3668_v14 }
0x1380   :  { %v3674_v19 = vadd.f32 1e-05, %v3672_v18 }
0x1381   :  { %v3671_v20 = vpop.xlane.xlu0 %3670 }
0x1382   :  { %8739 = vrsqrt.f32 %v3674_v19  ;;  %v3673_v24 = vmul.f32 0.03125, %v3671_v20 }
0x1384   :  { %v3675_v23 = vadd.f32 1e-05, %v3673_v24 }
0x1386   :  { %8741 = vrsqrt.f32 %v3675_v23 }
0x138f   :  { %v8740_v25 = vpop.eup %8739 }
0x1390   :  { %v3678_v27 = vmul.f32 %v8740_v25, %v3662_v50 }
0x1392   :  { %v3686_v29 = vmul.f32 %v7346_v26, %v3678_v27 }
0x1393   :  { %v8742_v30 = vpop.eup %8741 }
0x1394   :  { %v3679_v31 = vmul.f32 %v8742_v30, %v3663_v10  ;;  %v10242_v32 = vadd.f32 %v7347_v28, %v3686_v29 }
0x1396   :  { %v3687_v33 = vmul.f32 %v7346_v26, %v3679_v31  ;;  %8586 = vmatprep.mubr.msk.f32.mxu0 %vm162_vm1, %v10242_v32 }
0x1398   :  { %v10246_v34 = vadd.f32 %v7347_v28, %v3687_v33 }
0x139a   :  { %8587 = vmatmul.mubr.msk.f32.vlgmr.msra.gmra.mxu0 %vm162_vm1, %v10246_v34 }
0x139b   :  { %8591 = vmatprep.mubr.msk.f32.mxu0 %vm8806_vm2, %v8805_v17 }
0x145a   :  { %v8588_v36 = vpop.f32.mrf.mxu0 }
0x145b   :  { %v10255_v38 = vadd.f32 %v8588_v36, %v7353_v35 }
0x145c   :  { %v3781_v39 = vpop.f32.mrf.mxu0 }
0x145d   :  { %v10257_v40 = vadd.f32 %v7353_v35, %v3781_v39  ;;  %3868 = vrot.lane.b32.xlu0 %v10255_v38, %s8807_s28 }
0x145f   :  { %3791 = vrot.lane.b32.xlu1 %v10257_v40, %s8807_s28 }
0x14cf   :  { %v3869_v41 = vpop.permute.xlu0 %3868 }
0x14d1   :  { %v3792_v37 = vpop.permute.xlu1 %3791 }
0x14d2   :  { %8590 = vmatpush3.xpose.msk.msra.mxu0 %vm247_vm3, %v3792_v37  ;;  %v7362_v37 = vld [vmem:[%s11524_s6 + $0x20] sm:$0xff] }
0x14d3   :  { %8594 = vmatprep.subr.mxu0 %v8805_v17 }
0x14d5   :  { %8592 = vmatmul.mubr.msk.f32.vlgmr.msra.gmra.mxu0 %vm247_vm3, %v10257_v40 }
0x14d6   :  { %8595 = vmatpush3.xpose.msk.msra.mxu0 %vm247_vm3, %v3869_v41  ;;  %8596 = vmatprep.mubr.msk.f32.mxu0 %vm8806_vm2, %v8805_v17 }
0x14d7   :  { %8599 = vmatprep.subr.mxu0 %v8805_v17 }
0x14d9   :  { %8597 = vmatmul.mubr.msk.f32.vlgmr.msra.gmra.mxu0 %vm247_vm3, %v10255_v38 }
0x14da   :  { %8601 = vmatprep.mubr.msk.f32.mxu0 %vm8806_vm2, %v8805_v17 }
0x1595   :  { %v3863_v42 = vpop.f32.mrf.mxu0 }
0x1596   :  { %v3944_v43 = vmul.f32 0.35355338, %v3863_v42 }
0x1597   :  { %v8593_v21 = vpop.f32.mrf.mxu0 }
0x1598   :  { %v3946_v44 = vsel %vm247_vm3, %v3944_v43, -inf }
0x1599   :  { %3947 = vmax.xlane.f32.xlu1 %v3946_v44  ;;  %v3940_v45 = vpop.f32.mrf.mxu0 }
0x159a   :  { %v3945_v46 = vmul.f32 0.35355338, %v3940_v45 }
0x159b   :  { %v8598_v48 = vpop.f32.mrf.mxu0 }
0x159c   :  { %v3949_v49 = vsel %vm247_vm3, %v3945_v46, -inf }
0x159d   :  { %3950 = vmax.xlane.f32.xlu0 %v3949_v49  ;;  %v7369_v49 = vld [vmem:[%s11524_s6 + $0x28] sm:$0xff] }
0x15aa   :  { %3968 = vrot.lane.b32.xlu1 %v10257_v40, %s8808_s29 }
0x15ae   :  { %4124 = vrot.lane.b32.xlu1 %v10257_v40, %s8809_s30 }
0x15b2   :  { %4202 = vrot.lane.b32.xlu1 %v10255_v38, %s8809_s30 }
0x15b3   :  { %4044 = vrot.lane.b32.xlu0 %v10255_v38, %s8808_s29 }
0x1622   :  { %v3948_v51 = vpop.xlane.xlu1 %3947 }
0x1623   :  { %v3952_v52 = vsub.f32 %v3944_v43, %v3948_v51 }
0x1625   :  { %v3954_v53 = vmul.f32 1.442695, %v3952_v52 }
0x1626   :  { %v3969_v54 = vpop.permute.xlu1 %3968  ;;  %v3951_v55 = vpop.xlane.xlu0 %3950 }
0x1627   :  { %8743 = vpow2.f32 %v3954_v53  ;;  %v3953_v57 = vsub.f32 %v3945_v46, %v3951_v55  ;;  %8600 = vmatpush3.msra.mxu0 %v3969_v54 }
0x1628   :  { %8609 = vmatprep.subr.mxu0 %v8805_v17 }
0x1629   :  { %v3956_v59 = vmul.f32 1.442695, %v3953_v57 }
0x162a   :  { %v4045_v60 = vpop.permute.xlu0 %4044  ;;  %v4125_v2 = vpop.permute.xlu1 %4124 }
0x162b   :  { %8745 = vpow2.f32 %v3956_v59  ;;  %8605 = vmatpush3.msra.mxu1 %v4045_v60 }
0x162c   :  { %8614 = vmatprep.subr.mxu1 %v8805_v17 }
0x162e   :  { %v4203_v3 = vpop.permute.xlu1 %4202 }
0x1634   :  { %v8744_v62 = vpop.eup %8743 }
0x1635   :  { %v3958_v63 = vsel %vm247_vm3, %v8744_v62, 0.0 }
0x1636   :  { %3959 = vadd.xlane.f32.xlu1 %v3958_v63 }
0x1638   :  { %v8746_v0 = vpop.eup %8745 }
0x1639   :  { %v3961_v1 = vsel %vm247_vm3, %v8746_v0, 0.0 }
0x163a   :  { %3962 = vadd.xlane.f32.xlu0 %v3961_v1 }
0x1647   :  { %4200 = vrot.lane.b32.xlu1 %v10255_v38, %s8810_s0 }
0x1650   :  { %4122 = vrot.lane.b32.xlu0 %v10257_v40, %s8810_s0  ;;  %s11544_s0 = smov 72  }
0x16bf   :  { %v3960_v4 = vpop.xlane.xlu1 %3959 }
0x16c0   :  { %8747 = vrcp.f32 %v3960_v4 }
0x16c3   :  { %v3963_v16 = vpop.xlane.xlu0 %3962  ;;  %v4201_v9 = vpop.permute.xlu1 %4200 }
0x16c4   :  { %8749 = vrcp.f32 %v3963_v16 }
0x16c7   :  { %v4123_v8 = vpop.permute.xlu0 %4122 }
0x16cd   :  { %v8748_v15 = vpop.eup %8747 }
0x16ce   :  { %v3966_v5 = vmul.f32 %v8748_v15, %v8744_v62 }
0x16d0   :  { %8602 = vmatmul.mubr.msk.f32.vlgmr.msra.gmra.mxu0 %vm247_vm3, %v3966_v5 }
0x16d1   :  { %v8750_v50 = vpop.eup %8749  ;;  %8610 = vmatpush3.xpose.msk.msra.mxu0 %vm247_vm3, %v4125_v2  ;;  %8611 = vmatprep.mubr.msk.f32.mxu0 %vm8806_vm2, %v8805_v17 }
0x16d2   :  { %v3967_v7 = vmul.f32 %v8750_v50, %v8746_v0  ;;  %8619 = vmatprep.subr.mxu0 %v8805_v17 }
0x16d4   :  { %8607 = vmatmul.mubr.msk.f32.vlgmr.msra.gmra.mxu1 %vm247_vm3, %v3967_v7  ;;  %8612 = vmatmul.mubr.msk.f32.vlgmr.msra.gmra.mxu0 %vm247_vm3, %v4123_v8 }
0x16d5   :  { %8615 = vmatpush3.xpose.msk.msra.mxu1 %vm247_vm3, %v4203_v3  ;;  %8616 = vmatprep.mubr.msk.f32.mxu1 %vm8806_vm2, %v8805_v17 }
0x16d6   :  { %8624 = vmatprep.subr.mxu1 %v8805_v17  ;;  %8621 = vmatprep.mubr.msk.f32.mxu0 %vm8806_vm2, %v8805_v17 }
0x16d8   :  { %8617 = vmatmul.mubr.msk.f32.vlgmr.msra.gmra.mxu1 %vm247_vm3, %v4201_v9 }
0x16d9   :  { %8626 = vmatprep.mubr.msk.f32.mxu1 %vm8806_vm2, %v8805_v17 }
0x1790   :  { %v4040_v10 = vpop.f32.mrf.mxu0 }
0x1792   :  { %v8603_v11 = vpop.f32.mrf.mxu0 }
0x1794   :  { %v4116_v56 = vpop.f32.mrf.mxu1  ;;  %v4196_v58 = vpop.f32.mrf.mxu0 }
0x1795   :  { %v4278_v61 = vmul.f32 0.35355338, %v4196_v58 }
0x1796   :  { %v8608_v12 = vpop.f32.mrf.mxu1  ;;  %v8613_v13 = vpop.f32.mrf.mxu0 }
0x1797   :  { %v4280_v6 = vsel %vm247_vm3, %v4278_v61, -inf }
0x1798   :  { %v4274_v14 = vpop.f32.mrf.mxu1  ;;  %4281 = vmax.xlane.f32.xlu0 %v4280_v6 }
0x1799   :  { %v4279_v18 = vmul.f32 0.35355338, %v4274_v14 }
0x179a   :  { %v8618_v19 = vpop.f32.mrf.mxu1 }
0x179b   :  { %v4283_v20 = vsel %vm247_vm3, %v4279_v18, -inf }
0x179c   :  { %4284 = vmax.xlane.f32.xlu1 %v4283_v20 }
0x17ad   :  { %4302 = vrot.lane.b32.xlu1 %v10257_v40, %s8811_s1 }
0x17b1   :  { %4619 = vrot.lane.b32.xlu1 %v10257_v40, %s8813_s18 }
0x17b5   :  { %4697 = vrot.lane.b32.xlu1 %v10255_v38, %s8813_s18 }
0x17b9   :  { %4695 = vrot.lane.b32.xlu1 %v10255_v38, %s8812_s17 }
0x1821   :  { %v4282_v24 = vpop.xlane.xlu0 %4281 }
0x1822   :  { %v4286_v23 = vsub.f32 %v4278_v61, %v4282_v24 }
0x1824   :  { %v4288_v25 = vmul.f32 1.442695, %v4286_v23 }
0x1825   :  { %v4285_v26 = vpop.xlane.xlu1 %4284 }
0x1826   :  { %8751 = vpow2.f32 %v4288_v25  ;;  %v4287_v27 = vsub.f32 %v4279_v18, %v4285_v26  ;;  %v7380_v26 = vld [vmem:[%s11524_s6 + $0x30] sm:$0xff] }
0x1828   :  { %v4290_v28 = vmul.f32 1.442695, %v4287_v27 }
0x1829   :  { %v4303_v29 = vpop.permute.xlu1 %4302 }
0x182a   :  { %8753 = vpow2.f32 %v4290_v28  ;;  %8620 = vmatpush3.msra.mxu0 %v4303_v29 }
0x182b   :  { %8629 = vmatprep.subr.mxu0 %v7369_v49 }
0x182d   :  { %v4620_v21 = vpop.permute.xlu1 %4619 }
0x1831   :  { %v4698_v46 = vpop.permute.xlu1 %4697 }
0x1833   :  { %v8752_v30 = vpop.eup %8751 }
0x1834   :  { %v4292_v31 = vsel %vm247_vm3, %v8752_v30, 0.0 }
0x1835   :  { %4293 = vadd.xlane.f32.xlu0 %v4292_v31  ;;  %v4696_v48 = vpop.permute.xlu1 %4695 }
0x1837   :  { %v8754_v33 = vpop.eup %8753 }
0x1838   :  { %v4295_v35 = vsel %vm247_vm3, %v8754_v33, 0.0 }
0x1839   :  { %4296 = vadd.xlane.f32.xlu0 %v4295_v35 }
0x184f   :  { %4378 = vrot.lane.b32.xlu0 %v10255_v38, %s8811_s1  ;;  %s11545_s1 = smov 104  }
0x1853   :  { %4617 = vrot.lane.b32.xlu0 %v10257_v40, %s8812_s17 }
0x18be   :  { %v4294_v36 = vpop.xlane.xlu0 %4293 }
0x18bf   :  { %8755 = vrcp.f32 %v4294_v36 }
0x18c2   :  { %v4297_v39 = vpop.xlane.xlu0 %4296 }
0x18c3   :  { %8757 = vrcp.f32 %v4297_v39 }
0x18c6   :  { %v4379_v41 = vpop.permute.xlu0 %4378 }
0x18c7   :  { %8625 = vmatpush3.msra.mxu1 %v4379_v41 }
0x18c8   :  { %8634 = vmatprep.subr.mxu1 %v7362_v37 }
0x18ca   :  { %v4618_v55 = vpop.permute.xlu0 %4617 }
0x18cc   :  { %v8756_v42 = vpop.eup %8755 }
0x18cd   :  { %v4300_v43 = vmul.f32 %v8756_v42, %v8752_v30 }
0x18cf   :  { %8622 = vmatmul.mubr.msk.f32.vlgmr.msra.gmra.mxu0 %vm247_vm3, %v4300_v43 }
0x18d0   :  { %v8758_v44 = vpop.eup %8757  ;;  %8630 = vmatpush3.msra.mxu0 %v7369_v49 }
0x18d1   :  { %v4301_v45 = vmul.f32 %v8758_v44, %v8754_v33  ;;  %8639 = vmatprep.subr.mxu0 %v8805_v17 }
0x18d3   :  { %8627 = vmatmul.mubr.msk.f32.vlgmr.msra.gmra.mxu1 %vm247_vm3, %v4301_v45 }
0x18d4   :  { %8636 = vmatprep.mubr.msk.f32.mxu1 %vm247_vm3, %v4040_v10  ;;  %8635 = vmatpush3.msra.mxu1 %v7362_v37 }
0x18d5   :  { %8644 = vmatprep.subr.mxu1 %v8805_v17 }
0x18d7   :  { %8637 = vmatmul.mubr.msk.f32.vlgmr.msra.gmra.mxu1 %vm247_vm3, %v4116_v56 }
0x18d8   :  { %8645 = vmatpush3.xpose.msk.msra.mxu1 %vm247_vm3, %v4698_v46  ;;  %8646 = vmatprep.mubr.msk.f32.mxu1 %vm8806_vm2, %v8805_v17 }
0x18d9   :  { %8654 = vmatprep.subr.mxu1 %v8805_v17 }
0x18db   :  { %8647 = vmatmul.mubr.msk.f32.vlgmr.msra.gmra.mxu1 %vm247_vm3, %v4696_v48 }
0x18dc   :  { %8656 = vmatprep.mubr.msk.f32.mxu1 %vm8806_vm2, %v8805_v17 }
0x198f   :  { %v4374_v51 = vpop.f32.mrf.mxu0 }
0x1990   :  { %8631 = vmatprep.mubr.msk.f32.mxu0 %vm247_vm3, %v4374_v51 }
0x1991   :  { %v8623_v52 = vpop.f32.mrf.mxu0 }
0x1993   :  { %v4450_v53 = vpop.f32.mrf.mxu1 }
0x1994   :  { %8632 = vmatmul.mubr.msk.f32.vlgmr.msra.gmra.mxu0 %vm247_vm3, %v4450_v53 }
0x1995   :  { %8640 = vmatpush3.xpose.msk.msra.mxu0 %vm247_vm3, %v4620_v21  ;;  %v8628_v54 = vpop.f32.mrf.mxu1  ;;  %8641 = vmatprep.mubr.msk.f32.mxu0 %vm8806_vm2, %v8805_v17 }
0x1996   :  { %8649 = vmatprep.subr.mxu0 %v8805_v17 }
0x1997   :  { %v10350_v57 = vpop.f32.mrf.mxu1 }
0x1998   :  { %8642 = vmatmul.mubr.msk.f32.vlgmr.msra.gmra.mxu0 %vm247_vm3, %v4618_v55 }
0x1999   :  { %v10353_v59 = vpop.f32.mrf.mxu1  ;;  %8651 = vmatprep.mubr.msk.f32.mxu0 %vm8806_vm2, %v8805_v17 }
0x199b   :  { %v4769_v60 = vpop.f32.mrf.mxu1 }
0x199c   :  { %v4774_v62 = vmul.f32 0.35355338, %v4769_v60 }
0x199d   :  { %v8648_v63 = vpop.f32.mrf.mxu1 }
0x199e   :  { %v4778_v0 = vsel %vm247_vm3, %v4774_v62, -inf }
0x199f   :  { %4779 = vmax.xlane.f32.xlu1 %v4778_v0 }
0x19b0   :  { %4797 = vrot.lane.b32.xlu1 %v10257_v40, %s8814_s23 }
0x19b4   :  { %5035 = vrot.lane.b32.xlu1 %v10257_v40, %s11544_s0 }
0x19b8   :  { %5113 = vrot.lane.b32.xlu1 %v10255_v38, %s11544_s0 }
0x19bc   :  { %5111 = vrot.lane.b32.xlu1 %v10255_v38, %s11545_s1 }
0x1a28   :  { %v4780_v1 = vpop.xlane.xlu1 %4779 }
0x1a29   :  { %v4782_v3 = vsub.f32 %v4774_v62, %v4780_v1 }
0x1a2b   :  { %v4785_v4 = vmul.f32 1.442695, %v4782_v3 }
0x1a2c   :  { %v4798_v2 = vpop.permute.xlu1 %4797 }
0x1a2d   :  { %8650 = vmatpush3.msra.mxu0 %v4798_v2  ;;  %8759 = vpow2.f32 %v4785_v4 }
0x1a2e   :  { %8659 = vmatprep.subr.mxu0 %v7380_v26 }
0x1a30   :  { %v5036_v20 = vpop.permute.xlu1 %5035 }
0x1a34   :  { %v5114_v35 = vpop.permute.xlu1 %5113 }
0x1a38   :  { %v5112_v37 = vpop.permute.xlu1 %5111 }
0x1a3a   :  { %v8760_v9 = vpop.eup %8759 }
0x1a3b   :  { %v4790_v10 = vsel %vm247_vm3, %v8760_v9, 0.0 }
0x1a54   :  { %v10366_v16 = vpop.f32.mrf.mxu0 }
0x1a55   :  { %v4614_v45 = vadd.f32 %v10350_v57, %v10366_v16 }
0x1a56   :  { %v10368_v15 = vpop.f32.mrf.mxu0 }
0x1a57   :  { %v4609_v48 = vadd.f32 %v10353_v59, %v10368_v15 }
0x1a58   :  { %v4691_v5 = vpop.f32.mrf.mxu0 }
0x1a59   :  { %v4773_v50 = vmul.f32 0.35355338, %v4691_v5 }
0x1a5a   :  { %v8643_v7 = vpop.f32.mrf.mxu0 }
0x1a5b   :  { %v4775_v8 = vsel %vm247_vm3, %v4773_v50, -inf }
0x1a5c   :  { %4776 = vmax.xlane.f32.xlu0 %v4775_v8 }
0x1a60   :  { %4791 = vadd.xlane.f32.xlu0 %v4790_v10 }
0x1ae5   :  { %v4777_v11 = vpop.xlane.xlu0 %4776 }
0x1ae6   :  { %v4781_v56 = vsub.f32 %v4773_v50, %v4777_v11  ;;  %v7393_v11 = vld [vmem:[%s11525_s7 + $0x1] ss:$0 sm:$0xff] }
0x1ae8   :  { %v4783_v58 = vmul.f32 1.442695, %v4781_v56 }
0x1ae9   :  { %v4792_v13 = vpop.xlane.xlu0 %4791 }
0x1aea   :  { %8761 = vpow2.f32 %v4783_v58 }
0x1aeb   :  { %8763 = vrcp.f32 %v4792_v13 }
0x1af7   :  { %v8762_v61 = vpop.eup %8761 }
0x1af8   :  { %v4787_v12 = vsel %vm247_vm3, %v8762_v61, 0.0  ;;  %v8764_v14 = vpop.eup %8763 }
0x1af9   :  { %4788 = vadd.xlane.f32.xlu0 %v4787_v12  ;;  %v4796_v19 = vmul.f32 %v8764_v14, %v8760_v9 }
0x1b0f   :  { %4873 = vrot.lane.b32.xlu0 %v10255_v38, %s8814_s23  ;;  %s11546_s23 = smov 40  }
0x1b13   :  { %5033 = vrot.lane.b32.xlu0 %v10257_v40, %s11545_s1 }
0x1b82   :  { %v4789_v6 = vpop.xlane.xlu0 %4788 }
0x1b83   :  { %8765 = vrcp.f32 %v4789_v6 }
0x1b86   :  { %v4874_v18 = vpop.permute.xlu0 %4873 }
0x1b87   :  { %8655 = vmatpush3.msra.mxu1 %v4874_v18 }
0x1b88   :  { %8657 = vmatmul.mubr.msk.f32.vlgmr.msra.gmra.mxu1 %vm247_vm3, %v4796_v19  ;;  %8664 = vmatprep.subr.mxu1 %v8805_v17 }
0x1b89   :  { %8665 = vmatpush3.xpose.msk.msra.mxu1 %vm247_vm3, %v5036_v20  ;;  %8666 = vmatprep.mubr.msk.f32.mxu1 %vm8806_vm2, %v8805_v17 }
0x1b8a   :  { %v5034_v24 = vpop.permute.xlu0 %5033  ;;  %8674 = vmatprep.subr.mxu1 %v8805_v17 }
0x1b8c   :  { %8667 = vmatmul.mubr.msk.f32.vlgmr.msra.gmra.mxu1 %vm247_vm3, %v5034_v24 }
0x1b8d   :  { %8676 = vmatprep.mubr.msk.f32.mxu1 %vm8806_vm2, %v8805_v17 }
0x1b90   :  { %v8766_v23 = vpop.eup %8765 }
0x1b91   :  { %v4795_v25 = vmul.f32 %v8766_v23, %v8762_v61 }
0x1b93   :  { %8652 = vmatmul.mubr.msk.f32.vlgmr.msra.gmra.mxu0 %vm247_vm3, %v4795_v25 }
0x1b94   :  { %8660 = vmatpush3.msra.mxu0 %v7380_v26 }
0x1b95   :  { %8669 = vmatprep.subr.mxu0 %v8805_v17 }
0x1c48   :  { %v4945_v27 = vpop.f32.mrf.mxu1 }
0x1c4a   :  { %v8658_v28 = vpop.f32.mrf.mxu1 }
0x1c4c   :  { %v5107_v29 = vpop.f32.mrf.mxu1 }
0x1c4d   :  { %v5189_v30 = vmul.f32 0.35355338, %v5107_v29 }
0x1c4e   :  { %v8668_v31 = vpop.f32.mrf.mxu1 }
0x1c4f   :  { %v5191_v33 = vsel %vm247_vm3, %v5189_v30, -inf  ;;  %v7448_v31 = vld [vmem:[%s11530_s12 + $0x398] sm:$0xff] }
0x1c50   :  { %5192 = vmax.xlane.f32.xlu0 %v5191_v33  ;;  %v7404_v33 = vld [vmem:[%s11530_s12 + $0x380] sm:$0xff] }
0x1c53   :  { %v4869_v36 = vpop.f32.mrf.mxu0 }
0x1c54   :  { %8661 = vmatprep.mubr.msk.f32.mxu0 %vm247_vm3, %v4869_v36  ;;  %v7403_v36 = vld [vmem:[%s11530_s12 + $0x308] sm:$0xff] }
0x1c55   :  { %v8653_v39 = vpop.f32.mrf.mxu0  ;;  %8662 = vmatmul.mubr.msk.f32.vlgmr.msra.gmra.mxu0 %vm247_vm3, %v4945_v27 }
0x1c56   :  { %8670 = vmatpush3.xpose.msk.msra.mxu0 %vm247_vm3, %v5114_v35  ;;  %8671 = vmatprep.mubr.msk.f32.mxu0 %vm8806_vm2, %v8805_v17  ;;  %v7447_v35 = vld [vmem:[%s11530_s12 + $0x390] sm:$0xff]  ;;  %v7446_v39 = vld [vmem:[%s11530_s12 + $0x318] sm:$0xff] }
0x1c57   :  { %8679 = vmatprep.subr.mxu0 %v8805_v17 }
0x1c59   :  { %8672 = vmatmul.mubr.msk.f32.vlgmr.msra.gmra.mxu0 %vm247_vm3, %v5112_v37  ;;  %v7402_v37 = vld [vmem:[%s11530_s12 + $0x300] sm:$0xff] }
0x1c5a   :  { %8681 = vmatprep.mubr.msk.f32.mxu0 %vm8806_vm2, %v8805_v17 }
0x1cd9   :  { %v5193_v41 = vpop.xlane.xlu0 %5192 }
0x1cda   :  { %v5197_v42 = vsub.f32 %v5189_v30, %v5193_v41  ;;  %v7445_v41 = vld [vmem:[%s11530_s12 + $0x310] sm:$0xff] }
0x1cdc   :  { %v5199_v43 = vmul.f32 1.442695, %v5197_v42  ;;  %v7401_v42 = vld [vmem:[%s11530_s12 + $0x288] sm:$0xff] }
0x1cde   :  { %8767 = vpow2.f32 %v5199_v43  ;;  %v7444_v43 = vld [vmem:[%s11530_s12 + $0x298] sm:$0xff] }
0x1ceb   :  { %v8768_v21 = vpop.eup %8767 }
0x1cec   :  { %v5203_v44 = vsel %vm247_vm3, %v8768_v21, 0.0 }
0x1ced   :  { %5204 = vadd.xlane.f32.xlu0 %v5203_v44  ;;  %v7443_v44 = vld [vmem:[%s11530_s12 + $0x290] sm:$0xff] }
0x1d15   :  { %v8663_v46 = vpop.f32.mrf.mxu0 }
0x1d16   :  { %v5032_v49 = vadd.f32 %v8663_v46, %v4614_v45  ;;  %v7399_v45 = vld [vmem:[%s11530_s12 + $0x208] sm:$0xff]  ;;  %v7442_v46 = vld [vmem:[%s11530_s12 + $0x218] sm:$0xff] }
0x1d17   :  { %v5022_v51 = vpop.f32.mrf.mxu0 }
0x1d18   :  { %v5031_v52 = vadd.f32 %v5022_v51, %v4609_v48  ;;  %v7398_v48 = vld [vmem:[%s11530_s12 + $0x200] sm:$0xff]  ;;  %v7483_v51 = vld [vmem:[%s11532_s14 + $0x9f8] sm:$0xff] }
0x1d19   :  { %v5185_v53 = vpop.f32.mrf.mxu0 }
0x1d1a   :  { %v5190_v54 = vmul.f32 0.35355338, %v5185_v53 }
0x1d1b   :  { %v8673_v55 = vpop.f32.mrf.mxu0 }
0x1d1c   :  { %v5194_v60 = vsel %vm247_vm3, %v5190_v54, -inf }
0x1d1d   :  { %5195 = vmax.xlane.f32.xlu1 %v5194_v60 }
0x1d2e   :  { %5213 = vrot.lane.b32.xlu1 %v10257_v40, %s11546_s23  ;;  %v7389_v40 = vld [vmem:[%s11524_s6 + $0x38] sm:$0xff] }
0x1d76   :  { %v5205_v62 = vpop.xlane.xlu0 %5204 }
0x1d77   :  { %8769 = vrcp.f32 %v5205_v62 }
0x1d84   :  { %v8770_v57 = vpop.eup %8769 }
0x1d85   :  { %v5211_v59 = vmul.f32 %v8770_v57, %v8768_v21  ;;  %v7400_v21 = vld [vmem:[%s11530_s12 + $0x280] sm:$0xff] }
0x1da6   :  { %v5196_v63 = vpop.xlane.xlu1 %5195 }
0x1da7   :  { %v5198_v0 = vsub.f32 %v5190_v54, %v5196_v63 }
0x1da9   :  { %v5201_v1 = vmul.f32 1.442695, %v5198_v0 }
0x1daa   :  { %v5214_v2 = vpop.permute.xlu1 %5213 }
0x1dab   :  { %8771 = vpow2.f32 %v5201_v1  ;;  %8675 = vmatpush3.msra.mxu1 %v5214_v2 }
0x1dac   :  { %8677 = vmatmul.mubr.msk.f32.vlgmr.msra.gmra.mxu1 %vm247_vm3, %v5211_v59  ;;  %8684 = vmatprep.subr.mxu1 %v7389_v40  ;;  %v7396_v59 = vld [vmem:[%s11526_s8 + $0x1] ss:$0 sm:$0xff] }
0x1dad   :  { %8685 = vmatpush3.msra.mxu1 %v7389_v40 }
0x1dae   :  { %5693 = vmatprep.subr.mxu1 %v7448_v31  ;;  %v7460_v31 = vld [vmem:[%s11532_s14 + $0x940] sm:$0xff] }
0x1db8   :  { %v8772_v3 = vpop.eup %8771 }
0x1db9   :  { %v5206_v4 = vsel %vm247_vm3, %v8772_v3, 0.0 }
0x1dba   :  { %5207 = vadd.xlane.f32.xlu0 %v5206_v4  ;;  %v7397_v4 = vld [vmem:[%s11527_s9 + $0x1] ss:$0 sm:$0xff] }
0x1dd0   :  { %5289 = vrot.lane.b32.xlu0 %v10255_v38, %s11546_s23 }
0x1e43   :  { %v5208_v16 = vpop.xlane.xlu0 %5207 }
0x1e44   :  { %8773 = vrcp.f32 %v5208_v16 }
0x1e47   :  { %v5290_v15 = vpop.permute.xlu0 %5289 }
0x1e48   :  { %8680 = vmatpush3.msra.mxu0 %v5290_v15  ;;  %v7467_v15 = vld [vmem:[%s11532_s14 + $0x978] sm:$0xff] }
0x1e51   :  { %v8774_v5 = vpop.eup %8773 }
0x1e52   :  { %v5212_v50 = vmul.f32 %v8774_v5, %v8772_v3  ;;  %v7424_v5 = vld [vmem:[%s11532_s14 + $0x878] sm:$0xff] }
0x1e54   :  { %8682 = vmatmul.mubr.msk.f32.vlgmr.msra.gmra.mxu0 %vm247_vm3, %v5212_v50  ;;  %v7482_v50 = vld [vmem:[%s11532_s14 + $0x9f0] sm:$0xff] }
0x1e55   :  { %5599 = vmatprep.mubr.f32.mxu0 %v8805_v17 }
0x1e6c   :  { %v5285_v7 = vpop.f32.mrf.mxu1 }
0x1e6d   :  { %8686 = vmatprep.mubr.msk.f32.mxu1 %vm247_vm3, %v5285_v7  ;;  %v7439_v7 = vld [vmem:[%s11532_s14 + $0x8f0] sm:$0xff] }
0x1e6e   :  { %v8678_v38 = vpop.f32.mrf.mxu1 }
0x1f14   :  { %v5361_v8 = vpop.f32.mrf.mxu0 }
0x1f15   :  { %8687 = vmatmul.mubr.msk.f32.vlgmr.msra.gmra.mxu1 %vm247_vm3, %v5361_v8  ;;  %v7466_v8 = vld [vmem:[%s11532_s14 + $0x970] sm:$0xff] }
0x1f16   :  { %v8683_v9 = vpop.f32.mrf.mxu0  ;;  %5733 = vmatprep.mubr.f32.mxu1 %v8805_v17  ;;  %5694 = vmatpush1.msra.mxu1 %v7447_v35  ;;  %v7475_v35 = vld [vmem:[%s11532_s14 + $0x9b8] sm:$0xff] }
0x1f17   :  { %5695 = vmatprep.subr.mxu1 %v7446_v39  ;;  %v7423_v9 = vld [vmem:[%s11532_s14 + $0x870] sm:$0xff]  ;;  %v7459_v39 = vld [vmem:[%s11532_s14 + $0x938] sm:$0xff] }
0x1f18   :  { %5696 = vmatpush1.msra.mxu1 %v7445_v41  ;;  %v7474_v41 = vld [vmem:[%s11532_s14 + $0x9b0] sm:$0xff] }
0x1f19   :  { %5697 = vmatprep.subr.mxu1 %v7444_v43  ;;  %v7458_v43 = vld [vmem:[%s11532_s14 + $0x930] sm:$0xff] }
0x1f1a   :  { %5698 = vmatpush1.msra.mxu1 %v7443_v44  ;;  %v7473_v44 = vld [vmem:[%s11532_s14 + $0x9a8] sm:$0xff] }
0x1f1b   :  { %5699 = vmatprep.subr.mxu1 %v7442_v46  ;;  %v7457_v46 = vld [vmem:[%s11532_s14 + $0x928] sm:$0xff] }
0x1fd5   :  { %v8688_v10 = vpop.f32.mrf.mxu1 }
0x1fd6   :  { %v5448_v56 = vadd.f32 %v8688_v10, %v5032_v49  ;;  %v7441_v49 = vld [vmem:[%s11530_s12 + $0x210] sm:$0xff]  ;;  %v7481_v10 = vld [vmem:[%s11532_s14 + $0x9e8] sm:$0xff] }
0x1fd7   :  { %v5438_v58 = vpop.f32.mrf.mxu1  ;;  %5700 = vmatpush1.msra.mxu1 %v7441_v49  ;;  %v7472_v49 = vld [vmem:[%s11532_s14 + $0x9a0] sm:$0xff] }
0x1fd8   :  { %v5458_v61 = vadd.f32 %v7393_v11, %v5448_v56  ;;  %v5447_v12 = vadd.f32 %v5438_v58, %v5031_v52  ;;  %v7440_v52 = vld [vmem:[%s11532_s14 + $0x8f8] sm:$0xff]  ;;  %v7465_v56 = vld [vmem:[%s11532_s14 + $0x968] sm:$0xff] }
0x1fd9   :  { %8194 = vmatprep.subr.mxu1 %v7440_v52  ;;  %v7422_v58 = vld [vmem:[%s11532_s14 + $0x868] sm:$0xff]  ;;  %v7456_v52 = vld [vmem:[%s11532_s14 + $0x920] sm:$0xff] }
0x1fda   :  { %v5457_v13 = vadd.f32 %v7393_v11, %v5447_v12  ;;  %v5460_v6 = vadd.f32 %v5458_v61, %v10246_v34  ;;  %v7438_v11 = vld [vmem:[%s11532_s14 + $0x8e8] sm:$0xff]  ;;  %v7480_v61 = vld [vmem:[%s11532_s14 + $0x9e0] sm:$0xff] }
0x1fdb   :  { %v7437_v12 = vld [vmem:[%s11532_s14 + $0x8e0] sm:$0xff] }
0x1fdc   :  { %v5468_v14 = vsel %vm162_vm1, %v5460_v6, 0.0  ;;  %v5459_v18 = vadd.f32 %v5457_v13, %v10242_v32  ;;  %v7405_v32 = vld [vmem:[%s11530_s12 + $0x388] sm:$0xff]  ;;  %v7464_v13 = vld [vmem:[%s11532_s14 + $0x960] sm:$0xff] }
0x1fdd   :  { %5469 = vadd.xlane.f32.xlu0 %v5468_v14  ;;  %5559 = vmatprep.subr.mxu0 %v7405_v32  ;;  %v7479_v14 = vld [vmem:[%s11532_s14 + $0x9d8] sm:$0xff]  ;;  %v7433_v32 = vld [vmem:[%s11532_s14 + $0x8c0] sm:$0xff] }
0x1fde   :  { %v5465_v19 = vsel %vm162_vm1, %v5459_v18, 0.0  ;;  %5560 = vmatpush1.msra.mxu0 %v7404_v33  ;;  %v7417_v33 = vld [vmem:[%s11532_s14 + $0x840] sm:$0xff] }
0x1fdf   :  { %5466 = vadd.xlane.f32.xlu1 %v5465_v19  ;;  %5561 = vmatprep.subr.mxu0 %v7403_v36  ;;  %v7463_v19 = vld [vmem:[%s11532_s14 + $0x958] sm:$0xff] }
0x1fe0   :  { %5562 = vmatpush1.msra.mxu0 %v7402_v37  ;;  %v7432_v36 = vld [vmem:[%s11532_s14 + $0x8b8] sm:$0xff] }
0x1fe1   :  { %5563 = vmatprep.subr.mxu0 %v7401_v42  ;;  %v7416_v37 = vld [vmem:[%s11532_s14 + $0x838] sm:$0xff]  ;;  %v7431_v42 = vld [vmem:[%s11532_s14 + $0x8b0] sm:$0xff] }
0x1fe2   :  { %5564 = vmatpush1.msra.mxu0 %v7400_v21  ;;  %v7415_v21 = vld [vmem:[%s11532_s14 + $0x830] sm:$0xff] }
0x1fe3   :  { %5565 = vmatprep.subr.mxu0 %v7399_v45  ;;  %v7430_v45 = vld [vmem:[%s11532_s14 + $0x8a8] sm:$0xff] }
0x1fe4   :  { %5566 = vmatpush1.msra.mxu0 %v7398_v48  ;;  %v7414_v48 = vld [vmem:[%s11532_s14 + $0x828] sm:$0xff] }
0x1fe5   :  { %8156 = vmatprep.subr.mxu0 %v7483_v51  ;;  %v7429_v51 = vld [vmem:[%s11532_s14 + $0x8a0] sm:$0xff] }
0x2066   :  { %v5470_v20 = vpop.xlane.xlu0 %5469 }
0x2067   :  { %v5472_v24 = vmul.f32 0.03125, %v5470_v20  ;;  %v7420_v20 = vld [vmem:[%s11532_s14 + $0x858] sm:$0xff] }
0x2068   :  { %v5467_v23 = vpop.xlane.xlu1 %5466 }
0x2069   :  { %v5474_v25 = vsub.f32 %v5460_v6, %v5472_v24  ;;  %v5471_v26 = vmul.f32 0.03125, %v5467_v23  ;;  %v7421_v6 = vld [vmem:[%s11532_s14 + $0x860] sm:$0xff]  ;;  %v7478_v24 = vld [vmem:[%s11532_s14 + $0x9d0] sm:$0xff] }
0x206a   :  { %v7435_v23 = vld [vmem:[%s11532_s14 + $0x8d0] sm:$0xff] }
0x206b   :  { %v5473_v27 = vsub.f32 %v5459_v18, %v5471_v26  ;;  %v5476_v28 = vmul.f32 %v5474_v25, %v5474_v25  ;;  %v7436_v18 = vld [vmem:[%s11532_s14 + $0x8d8] sm:$0xff]  ;;  %v7419_v26 = vld [vmem:[%s11532_s14 + $0x850] sm:$0xff] }
0x206d   :  { %v5480_v29 = vsel %vm162_vm1, %v5476_v28, 0.0  ;;  %v5475_v30 = vmul.f32 %v5473_v27, %v5473_v27  ;;  %v7434_v28 = vld [vmem:[%s11532_s14 + $0x8c8] sm:$0xff] }
0x206e   :  { %5481 = vadd.xlane.f32.xlu0 %v5480_v29  ;;  %v7461_v29 = vld [vmem:[%s11532_s14 + $0x948] sm:$0xff] }
0x206f   :  { %v5477_v34 = vsel %vm162_vm1, %v5475_v30, 0.0  ;;  %v7418_v30 = vld [vmem:[%s11532_s14 + $0x848] sm:$0xff] }
0x2070   :  { %5478 = vadd.xlane.f32.xlu1 %v5477_v34  ;;  %v7476_v34 = vld [vmem:[%s11532_s14 + $0x9c0] sm:$0xff] }
0x20f7   :  { %v5482_v53 = vpop.xlane.xlu0 %5481 }
0x20f8   :  { %v5484_v54 = vmul.f32 0.03125, %v5482_v53  ;;  %v7413_v53 = vld [vmem:[%s11532_s14 + $0x820] sm:$0xff] }
0x20f9   :  { %v5479_v55 = vpop.xlane.xlu1 %5478 }
0x20fa   :  { %v5486_v60 = vadd.f32 1e-05, %v5484_v54  ;;  %v5483_v62 = vmul.f32 0.03125, %v5479_v55  ;;  %v7471_v54 = vld [vmem:[%s11532_s14 + $0x998] sm:$0xff] }
0x20fb   :  { %v7428_v55 = vld [vmem:[%s11532_s14 + $0x898] sm:$0xff] }
0x20fc   :  { %8775 = vrsqrt.f32 %v5486_v60  ;;  %v5485_v63 = vadd.f32 1e-05, %v5483_v62  ;;  %v7455_v60 = vld [vmem:[%s11532_s14 + $0x918] sm:$0xff] }
0x20fd   :  { %v7412_v62 = vld [vmem:[%s11532_s14 + $0x818] sm:$0xff] }
0x20fe   :  { %8777 = vrsqrt.f32 %v5485_v63  ;;  %v7470_v63 = vld [vmem:[%s11532_s14 + $0x990] sm:$0xff] }
0x2109   :  { %v8776_v57 = vpop.eup %8775 }
0x210a   :  { %v5490_v1 = vmul.f32 %v8776_v57, %v5474_v25  ;;  %v7462_v25 = vld [vmem:[%s11532_s14 + $0x950] sm:$0xff] }
0x210b   :  { %v8778_v0 = vpop.eup %8777  ;;  %v7427_v57 = vld [vmem:[%s11532_s14 + $0x890] sm:$0xff] }
0x210c   :  { %v5489_v2 = vmul.f32 %v8778_v0, %v5473_v27  ;;  %v5498_v40 = vmul.f32 %v7396_v59, %v5490_v1  ;;  %v7477_v27 = vld [vmem:[%s11532_s14 + $0x9c8] sm:$0xff]  ;;  %v7454_v0 = vld [vmem:[%s11532_s14 + $0x910] sm:$0xff] }
0x210d   :  { %v7411_v1 = vld [vmem:[%s11532_s14 + $0x810] sm:$0xff] }
0x210e   :  { %v5497_v3 = vmul.f32 %v7396_v59, %v5489_v2  ;;  %v10510_v38 = vadd.f32 %v7397_v4, %v5498_v40  ;;  %v7469_v2 = vld [vmem:[%s11532_s14 + $0x988] sm:$0xff]  ;;  %v7468_v40 = vld [vmem:[%s11532_s14 + $0x980] sm:$0xff] }
0x210f   :  { %v7426_v59 = vld [vmem:[%s11532_s14 + $0x888] sm:$0xff] }
0x2110   :  { %v10490_v16 = vadd.f32 %v7397_v4, %v5497_v3  ;;  %v7453_v3 = vld [vmem:[%s11532_s14 + $0x908] sm:$0xff] }
0x2111   :  { %v7410_v4 = vld [vmem:[%s11532_s14 + $0x808] sm:$0xff] }
0x2112   :  { %7407 = vmatmul.mubr.msk.f32.vlgmr.msra.gmra.mxu0 %vm162_vm1, %v10490_v16  ;;  %7450 = vmatmul.mubr.msk.f32.vlgmr.msra.gmra.mxu1 %vm162_vm1, %v10490_v16 }
0x2113   :  { %5605 = vmatprep.mubr.f32.mxu0 %v8805_v17  ;;  %5739 = vmatprep.mubr.f32.mxu1 %v8805_v17 }
0x2114   :  { %8157 = vmatpush3.msra.mxu0 %v7467_v15  ;;  %8195 = vmatpush3.msra.mxu1 %v7424_v5  ;;  %v7425_v15 = vld [vmem:[%s11532_s14 + $0x880] sm:$0xff] }
0x2115   :  { %8158 = vmatprep.subr.mxu0 %v7482_v50  ;;  %8196 = vmatprep.subr.mxu1 %v7439_v7  ;;  %v7452_v5 = vld [vmem:[%s11532_s14 + $0x900] sm:$0xff]  ;;  %v7491_v7 = vld [vmem:[%s11530_s12 + $0x3a8] sm:$0xff] }
0x2116   :  { %7408 = vmatmul.mubr.msk.f32.gmra.mxu0 %vm162_vm1, %v10510_v38  ;;  %7451 = vmatmul.mubr.msk.f32.gmra.mxu1 %vm162_vm1, %v10510_v38  ;;  %v7409_v50 = vld [vmem:[%s11532_s14 + $0x800] sm:$0xff] }
0x2117   :  { %8159 = vmatpush3.msra.mxu0 %v7466_v8  ;;  %8197 = vmatpush3.msra.mxu1 %v7423_v9  ;;  %v7526_v8 = vld [vmem:[%s11532_s14 + $0xaf8] sm:$0xff]  ;;  %v7406_v9 = vld [vmem:[%s11531_s13 + $0x10] sm:$0x3] }
0x2118   :  { %8160 = vmatprep.subr.mxu0 %v7481_v10  ;;  %8198 = vmatprep.subr.mxu1 %v7438_v11  ;;  %v7449_v10 = vld [vmem:[%s11531_s13 + $0x12] sm:$0x3]  ;;  %v5522_v11 = vrot.slane %v7406_v9, %v9405_v47 }
0x2119   :  { %8161 = vmatpush3.msra.mxu0 %v7465_v56  ;;  %8199 = vmatpush3.msra.mxu1 %v7422_v58  ;;  %v5662_v56 = vrot.slane %v7449_v10, %v9405_v47  ;;  %v5526_v58 = vrot.slane %v7406_v9, %v9410_v22  ;;  %v7520_v9 = vld [vmem:[%s11532_s14 + $0xac8] sm:$0xff] }
0x211a   :  { %8162 = vmatprep.subr.mxu0 %v7480_v61  ;;  %8200 = vmatprep.subr.mxu1 %v7437_v12  ;;  %v5666_v61 = vrot.slane %v7449_v10, %v9410_v22  ;;  %v7552_v10 = vld [vmem:[%s11532_s14 + $0xb70] sm:$0xff] }
0x211b   :  { %8163 = vmatpush3.msra.mxu0 %v7464_v13  ;;  %8201 = vmatpush3.msra.mxu1 %v7421_v6 }
0x211c   :  { %8164 = vmatprep.subr.mxu0 %v7479_v14  ;;  %8202 = vmatprep.subr.mxu1 %v7436_v18 }
0x211d   :  { %8165 = vmatpush3.msra.mxu0 %v7463_v19  ;;  %8203 = vmatpush3.msra.mxu1 %v7420_v20 }
0x211e   :  { %8166 = vmatprep.subr.mxu0 %v7478_v24  ;;  %8204 = vmatprep.subr.mxu1 %v7435_v23 }
0x211f   :  { %8167 = vmatpush3.msra.mxu0 %v7462_v25  ;;  %8205 = vmatpush3.msra.mxu1 %v7419_v26 }
0x2120   :  { %8168 = vmatprep.subr.mxu0 %v7477_v27  ;;  %8206 = vmatprep.subr.mxu1 %v7434_v28 }
0x2121   :  { %8169 = vmatpush3.msra.mxu0 %v7461_v29  ;;  %8207 = vmatpush3.msra.mxu1 %v7418_v30 }
0x2122   :  { %8170 = vmatprep.subr.mxu0 %v7476_v34  ;;  %8208 = vmatprep.subr.mxu1 %v7433_v32 }
0x2123   :  { %8171 = vmatpush3.msra.mxu0 %v7460_v31  ;;  %8209 = vmatpush3.msra.mxu1 %v7417_v33  ;;  %v7490_v31 = vld [vmem:[%s11530_s12 + $0x3a0] sm:$0xff]  ;;  %v7510_v33 = vld [vmem:[%s11532_s14 + $0xa78] sm:$0xff] }
0x2124   :  { %8172 = vmatprep.subr.mxu0 %v7475_v35  ;;  %8210 = vmatprep.subr.mxu1 %v7432_v36 }
0x2125   :  { %8173 = vmatpush3.msra.mxu0 %v7459_v39  ;;  %8211 = vmatpush3.msra.mxu1 %v7416_v37  ;;  %v7489_v37 = vld [vmem:[%s11530_s12 + $0x328] sm:$0xff] }
0x2126   :  { %8174 = vmatprep.subr.mxu0 %v7474_v41  ;;  %8212 = vmatprep.subr.mxu1 %v7431_v42  ;;  %v7525_v41 = vld [vmem:[%s11532_s14 + $0xaf0] sm:$0xff] }
0x2127   :  { %8175 = vmatpush3.msra.mxu0 %v7458_v43  ;;  %8213 = vmatpush3.msra.mxu1 %v7415_v21  ;;  %v7488_v21 = vld [vmem:[%s11530_s12 + $0x320] sm:$0xff] }
0x2128   :  { %8176 = vmatprep.subr.mxu0 %v7473_v44  ;;  %8214 = vmatprep.subr.mxu1 %v7430_v45  ;;  %v7487_v45 = vld [vmem:[%s11530_s12 + $0x2a8] sm:$0xff] }
0x2129   :  { %8177 = vmatpush3.msra.mxu0 %v7457_v46  ;;  %8215 = vmatpush3.msra.mxu1 %v7414_v48  ;;  %v7486_v48 = vld [vmem:[%s11530_s12 + $0x2a0] sm:$0xff] }
0x212a   :  { %8178 = vmatprep.subr.mxu0 %v7472_v49  ;;  %8216 = vmatprep.subr.mxu1 %v7429_v51  ;;  %v7485_v49 = vld [vmem:[%s11530_s12 + $0x228] sm:$0xff]  ;;  %v7509_v51 = vld [vmem:[%s11532_s14 + $0xa70] sm:$0xff] }
0x212b   :  { %8179 = vmatpush3.msra.mxu0 %v7456_v52  ;;  %8217 = vmatpush3.msra.mxu1 %v7413_v53  ;;  %v7484_v52 = vld [vmem:[%s11530_s12 + $0x220] sm:$0xff]  ;;  %v7524_v53 = vld [vmem:[%s11532_s14 + $0xae8] sm:$0xff] }
0x212c   :  { %8180 = vmatprep.subr.mxu0 %v7471_v54  ;;  %8218 = vmatprep.subr.mxu1 %v7428_v55  ;;  %v7534_v54 = vld [vmem:[%s11530_s12 + $0x3b8] sm:$0xff]  ;;  %v7533_v55 = vld [vmem:[%s11530_s12 + $0x3b0] sm:$0xff] }
0x212d   :  { %8181 = vmatpush3.msra.mxu0 %v7455_v60  ;;  %8219 = vmatpush3.msra.mxu1 %v7412_v62  ;;  %v7532_v60 = vld [vmem:[%s11530_s12 + $0x338] sm:$0xff]  ;;  %v7508_v62 = vld [vmem:[%s11532_s14 + $0xa68] sm:$0xff] }
0x212e   :  { %8182 = vmatprep.subr.mxu0 %v7470_v63  ;;  %8220 = vmatprep.subr.mxu1 %v7427_v57  ;;  %v7531_v63 = vld [vmem:[%s11530_s12 + $0x330] sm:$0xff]  ;;  %v7523_v57 = vld [vmem:[%s11532_s14 + $0xae0] sm:$0xff] }
0x212f   :  { %8183 = vmatpush3.msra.mxu0 %v7454_v0  ;;  %8221 = vmatpush3.msra.mxu1 %v7411_v1  ;;  %v7530_v0 = vld [vmem:[%s11530_s12 + $0x2b8] sm:$0xff]  ;;  %v7529_v1 = vld [vmem:[%s11530_s12 + $0x2b0] sm:$0xff] }
0x2130   :  { %8184 = vmatprep.subr.mxu0 %v7469_v2  ;;  %8222 = vmatprep.subr.mxu1 %v7426_v59  ;;  %v7528_v2 = vld [vmem:[%s11530_s12 + $0x238] sm:$0xff]  ;;  %v7507_v59 = vld [vmem:[%s11532_s14 + $0xa60] sm:$0xff] }
0x2131   :  { %8185 = vmatpush3.msra.mxu0 %v7453_v3  ;;  %8223 = vmatpush3.msra.mxu1 %v7410_v4  ;;  %v7527_v3 = vld [vmem:[%s11530_s12 + $0x230] sm:$0xff]  ;;  %v7522_v4 = vld [vmem:[%s11532_s14 + $0xad8] sm:$0xff] }
0x2132   :  { %8186 = vmatprep.subr.mxu0 %v7468_v40  ;;  %8224 = vmatprep.subr.mxu1 %v7425_v15  ;;  %v7569_v40 = vld [vmem:[%s11532_s14 + $0xbf8] sm:$0xff] }
0x2133   :  { %8187 = vmatpush3.msra.mxu0 %v7452_v5  ;;  %8225 = vmatpush3.msra.mxu1 %v7409_v50  ;;  %v7506_v15 = vld [vmem:[%s11532_s14 + $0xa58] sm:$0xff]  ;;  %v7521_v50 = vld [vmem:[%s11532_s14 + $0xad0] sm:$0xff] }
0x2134   :  { %5976 = vmatprep.subr.mxu0 %v7491_v7  ;;  %8232 = vmatprep.subr.mxu1 %v7526_v8  ;;  %v7553_v5 = vld [vmem:[%s11532_s14 + $0xb78] sm:$0xff]  ;;  %v7568_v7 = vld [vmem:[%s11532_s14 + $0xbf0] sm:$0xff] }
0x2135   :  { %v7505_v8 = vld [vmem:[%s11532_s14 + $0xa50] sm:$0xff] }
0x21d2   :  { %v5601_v12 = vpop.f32.mrf.mxu0  ;;  %v5735_v13 = vpop.f32.mrf.mxu1 }
0x21d3   :  { %v5602_v6 = vadd.f32 %v5601_v12, %v5522_v11  ;;  %v5736_v14 = vadd.f32 %v5735_v13, %v5662_v56  ;;  %v7503_v12 = vld [vmem:[%s11532_s14 + $0xa40] sm:$0xff] }
0x21d4   :  { %v5603_v18 = vpop.f32.mrf.mxu0  ;;  %v5737_v19 = vpop.f32.mrf.mxu1  ;;  %v7566_v13 = vld [vmem:[%s11532_s14 + $0xbe0] sm:$0xff] }
0x21d5   :  { %v5604_v20 = vadd.f32 %v5603_v18, %v5526_v58  ;;  %v5738_v24 = vadd.f32 %v5737_v19, %v5666_v61  ;;  %v5612_v28 = vmax.f32 %v5602_v6, 0.0  ;;  %v5746_v29 = vmax.f32 %v5736_v14, 0.0  ;;  %v7550_v6 = vld [vmem:[%s11532_s14 + $0xb60] sm:$0xff]  ;;  %v7518_v14 = vld [vmem:[%s11532_s14 + $0xab8] sm:$0xff] }
0x21d6   :  { %v5607_v23 = vpop.f32.mrf.mxu0  ;;  %v5741_v25 = vpop.f32.mrf.mxu1  ;;  %v7565_v18 = vld [vmem:[%s11532_s14 + $0xbd8] sm:$0xff] }
0x21d7   :  { %v5613_v26 = vmax.f32 %v5604_v20, 0.0  ;;  %v5747_v27 = vmax.f32 %v5738_v24, 0.0  ;;  %v5608_v30 = vadd.f32 %v5607_v23, %v5522_v11  ;;  %v5742_v35 = vadd.f32 %v5741_v25, %v5662_v56  ;;  %v7504_v11 = vld [vmem:[%s11532_s14 + $0xa48] sm:$0xff]  ;;  %v7502_v19 = vld [vmem:[%s11532_s14 + $0xa38] sm:$0xff]  ;;  %v7517_v24 = vld [vmem:[%s11532_s14 + $0xab0] sm:$0xff] }
0x21d8   :  { %v5609_v34 = vpop.f32.mrf.mxu0  ;;  %v5743_v32 = vpop.f32.mrf.mxu1  ;;  %v7567_v56 = vld [vmem:[%s11532_s14 + $0xbe8] sm:$0xff]  ;;  %v7549_v20 = vld [vmem:[%s11532_s14 + $0xb58] sm:$0xff]  ;;  %v7564_v23 = vld [vmem:[%s11532_s14 + $0xbd0] sm:$0xff] }
0x21d9   :  { %v5610_v36 = vadd.f32 %v5609_v34, %v5526_v58  ;;  %v5744_v39 = vadd.f32 %v5743_v32, %v5666_v61  ;;  %5846 = vmatprep.mubr.f32.mxu0 %v5747_v27  ;;  %5921 = vmatprep.mubr.f32.mxu1 %v5613_v26  ;;  %v5614_v44 = vmax.f32 %v5608_v30, 0.0  ;;  %v5748_v46 = vmax.f32 %v5742_v35, 0.0  ;;  %v7519_v58 = vld [vmem:[%s11532_s14 + $0xac0] sm:$0xff]  ;;  %v7551_v61 = vld [vmem:[%s11532_s14 + $0xb68] sm:$0xff]  ;;  %v7501_v25 = vld [vmem:[%s11532_s14 + $0xa30] sm:$0xff] }
0x21da   :  { %5847 = vmatmul.mubr.f32.vlgmr.msra.gmra.mxu0 %v5746_v29  ;;  %5922 = vmatmul.mubr.f32.vlgmr.msra.gmra.mxu1 %v5612_v28  ;;  %v7548_v26 = vld [vmem:[%s11532_s14 + $0xb50] sm:$0xff]  ;;  %v7516_v27 = vld [vmem:[%s11532_s14 + $0xaa8] sm:$0xff]  ;;  %v7515_v34 = vld [vmem:[%s11532_s14 + $0xaa0] sm:$0xff] }
0x21db   :  { %v5615_v42 = vmax.f32 %v5610_v36, 0.0  ;;  %v5749_v43 = vmax.f32 %v5744_v39, 0.0  ;;  %5977 = vmatpush1.msra.mxu0 %v7490_v31  ;;  %8233 = vmatpush3.msra.mxu1 %v7510_v33  ;;  %v7563_v28 = vld [vmem:[%s11532_s14 + $0xbc8] sm:$0xff]  ;;  %v7562_v32 = vld [vmem:[%s11532_s14 + $0xbc0] sm:$0xff]  ;;  %v7514_v35 = vld [vmem:[%s11532_s14 + $0xa98] sm:$0xff] }
0x21dc   :  { %5978 = vmatprep.subr.mxu0 %v7489_v37  ;;  %8234 = vmatprep.subr.mxu1 %v7525_v41  ;;  %v7500_v29 = vld [vmem:[%s11532_s14 + $0xa28] sm:$0xff]  ;;  %v7499_v31 = vld [vmem:[%s11532_s14 + $0xa20] sm:$0xff]  ;;  %v7561_v36 = vld [vmem:[%s11532_s14 + $0xbb8] sm:$0xff] }
0x21dd   :  { %5851 = vmatprep.mubr.f32.mxu0 %v5749_v43  ;;  %5926 = vmatprep.mubr.f32.mxu1 %v5615_v42  ;;  %v7547_v30 = vld [vmem:[%s11532_s14 + $0xb48] sm:$0xff]  ;;  %v7546_v33 = vld [vmem:[%s11532_s14 + $0xb40] sm:$0xff]  ;;  %v7498_v39 = vld [vmem:[%s11532_s14 + $0xa18] sm:$0xff] }
0x21de   :  { %5979 = vmatpush1.msra.mxu0 %v7488_v21  ;;  %5927 = vmatmul.mubr.f32.gmra.mxu1 %v5614_v44  ;;  %v7545_v37 = vld [vmem:[%s11532_s14 + $0xb38] sm:$0xff]  ;;  %v7513_v41 = vld [vmem:[%s11532_s14 + $0xa90] sm:$0xff]  ;;  %v7512_v44 = vld [vmem:[%s11532_s14 + $0xa88] sm:$0xff] }
0x21df   :  { %5852 = vmatmul.mubr.f32.gmra.mxu0 %v5748_v46  ;;  %5980 = vmatprep.subr.mxu0 %v7487_v45  ;;  %v7560_v42 = vld [vmem:[%s11532_s14 + $0xbb0] sm:$0xff]  ;;  %v7559_v45 = vld [vmem:[%s11532_s14 + $0xba8] sm:$0xff] }
0x21e0   :  { %5981 = vmatpush1.msra.mxu0 %v7486_v48  ;;  %6016 = vmatprep.mubr.f32.mxu0 %v8805_v17  ;;  %v7497_v43 = vld [vmem:[%s11532_s14 + $0xa10] sm:$0xff]  ;;  %v7496_v46 = vld [vmem:[%s11532_s14 + $0xa08] sm:$0xff] }
0x21e1   :  { %5982 = vmatprep.subr.mxu0 %v7485_v49  ;;  %8235 = vmatpush3.msra.mxu1 %v7509_v51  ;;  %v7544_v21 = vld [vmem:[%s11532_s14 + $0xb30] sm:$0xff]  ;;  %v7543_v48 = vld [vmem:[%s11532_s14 + $0xb28] sm:$0xff]  ;;  %v7511_v49 = vld [vmem:[%s11532_s14 + $0xa80] sm:$0xff] }
0x21e2   :  { %5983 = vmatpush1.msra.mxu0 %v7484_v52  ;;  %8236 = vmatprep.subr.mxu1 %v7524_v53  ;;  %v7558_v51 = vld [vmem:[%s11532_s14 + $0xba0] sm:$0xff] }
0x21e3   :  { %7493 = vmatmul.mubr.msk.f32.vlgmr.msra.gmra.mxu0 %vm162_vm1, %v10490_v16  ;;  %6186 = vmatprep.subr.mxu0 %v7534_v54  ;;  %v7495_v52 = vld [vmem:[%s11532_s14 + $0xa00] sm:$0xff]  ;;  %v7557_v54 = vld [vmem:[%s11532_s14 + $0xb98] sm:$0xff] }
0x21e4   :  { %6187 = vmatpush1.msra.mxu0 %v7533_v55  ;;  %6022 = vmatprep.mubr.f32.mxu0 %v8805_v17  ;;  %v7542_v53 = vld [vmem:[%s11532_s14 + $0xb20] sm:$0xff]  ;;  %v7577_v55 = vld [vmem:[%s11530_s12 + $0x3c8] sm:$0xff] }
0x21e5   :  { %6188 = vmatprep.subr.mxu0 %v7532_v60  ;;  %8237 = vmatpush3.msra.mxu1 %v7508_v62  ;;  %v7541_v60 = vld [vmem:[%s11532_s14 + $0xb18] sm:$0xff]  ;;  %v7556_v62 = vld [vmem:[%s11532_s14 + $0xb90] sm:$0xff] }
0x21e6   :  { %6189 = vmatpush1.msra.mxu0 %v7531_v63  ;;  %8238 = vmatprep.subr.mxu1 %v7523_v57  ;;  %v7540_v63 = vld [vmem:[%s11532_s14 + $0xb10] sm:$0xff]  ;;  %v7555_v57 = vld [vmem:[%s11532_s14 + $0xb88] sm:$0xff] }
0x21e7   :  { %7494 = vmatmul.mubr.msk.f32.gmra.mxu0 %vm162_vm1, %v10510_v38  ;;  %6190 = vmatprep.subr.mxu0 %v7530_v0  ;;  %v7539_v0 = vld [vmem:[%s11532_s14 + $0xb08] sm:$0xff] }
0x21e8   :  { %6191 = vmatpush1.msra.mxu0 %v7529_v1  ;;  %6226 = vmatprep.mubr.f32.mxu0 %v8805_v17  ;;  %v7554_v1 = vld [vmem:[%s11532_s14 + $0xb80] sm:$0xff] }
0x21e9   :  { %6192 = vmatprep.subr.mxu0 %v7528_v2  ;;  %8239 = vmatpush3.msra.mxu1 %v7507_v59  ;;  %v7538_v2 = vld [vmem:[%s11532_s14 + $0xb00] sm:$0xff]  ;;  %v7620_v59 = vld [vmem:[%s11530_s12 + $0x3d8] sm:$0xff] }
0x21ea   :  { %6193 = vmatpush1.msra.mxu0 %v7527_v3  ;;  %8240 = vmatprep.subr.mxu1 %v7522_v4 }
0x21eb   :  { %7536 = vmatmul.mubr.msk.f32.vlgmr.msra.gmra.mxu0 %vm162_vm1, %v10490_v16  ;;  %8270 = vmatprep.subr.mxu0 %v7569_v40 }
0x21ec   :  { %6232 = vmatprep.mubr.f32.mxu0 %v8805_v17  ;;  %8241 = vmatpush3.msra.mxu1 %v7506_v15 }
0x21ed   :  { %8271 = vmatpush3.msra.mxu0 %v7553_v5  ;;  %8242 = vmatprep.subr.mxu1 %v7521_v50 }
0x21ee   :  { %8272 = vmatprep.subr.mxu0 %v7568_v7  ;;  %8243 = vmatpush3.msra.mxu1 %v7505_v8  ;;  %v7492_v8 = vld [vmem:[%s11531_s13 + $0x14] sm:$0x3] }
0x21ef   :  { %7537 = vmatmul.mubr.msk.f32.gmra.mxu0 %vm162_vm1, %v10510_v38  ;;  %8244 = vmatprep.subr.mxu1 %v7520_v9 }
0x21f0   :  { %8273 = vmatpush3.msra.mxu0 %v7552_v10  ;;  %8245 = vmatpush3.msra.mxu1 %v7504_v11 }
0x21f1   :  { %8274 = vmatprep.subr.mxu0 %v7567_v56  ;;  %8246 = vmatprep.subr.mxu1 %v7519_v58 }
0x21f2   :  { %8275 = vmatpush3.msra.mxu0 %v7551_v61  ;;  %8247 = vmatpush3.msra.mxu1 %v7503_v12  ;;  %v5945_v61 = vrot.slane %v7492_v8, %v9405_v47 }
0x21f3   :  { %8276 = vmatprep.subr.mxu0 %v7566_v13  ;;  %8248 = vmatprep.subr.mxu1 %v7518_v14  ;;  %v5949_v13 = vrot.slane %v7492_v8, %v9410_v22  ;;  %v7593_v8 = vld [vmem:[%s11532_s14 + $0xc60] sm:$0xff] }
0x21f4   :  { %8277 = vmatpush3.msra.mxu0 %v7550_v6  ;;  %8249 = vmatpush3.msra.mxu1 %v7502_v19 }
0x21f5   :  { %8278 = vmatprep.subr.mxu0 %v7565_v18  ;;  %8250 = vmatprep.subr.mxu1 %v7517_v24  ;;  %v7535_v24 = vld [vmem:[%s11531_s13 + $0x16] sm:$0x3] }
0x21f6   :  { %8279 = vmatpush3.msra.mxu0 %v7549_v20  ;;  %8251 = vmatpush3.msra.mxu1 %v7501_v25 }
0x21f7   :  { %8280 = vmatprep.subr.mxu0 %v7564_v23  ;;  %8252 = vmatprep.subr.mxu1 %v7516_v27 }
0x21f8   :  { %8281 = vmatpush3.msra.mxu0 %v7548_v26  ;;  %8253 = vmatpush3.msra.mxu1 %v7500_v29  ;;  %v6155_v29 = vrot.slane %v7535_v24, %v9405_v47 }
0x21f9   :  { %8282 = vmatprep.subr.mxu0 %v7563_v28  ;;  %8254 = vmatprep.subr.mxu1 %v7515_v34 }
0x21fa   :  { %8283 = vmatpush3.msra.mxu0 %v7547_v30  ;;  %8255 = vmatpush3.msra.mxu1 %v7499_v31  ;;  %v7576_v30 = vld [vmem:[%s11530_s12 + $0x3c0] sm:$0xff]  ;;  %v7575_v31 = vld [vmem:[%s11530_s12 + $0x348] sm:$0xff] }
0x21fb   :  { %8284 = vmatprep.subr.mxu0 %v7562_v32  ;;  %8256 = vmatprep.subr.mxu1 %v7514_v35  ;;  %v6159_v32 = vrot.slane %v7535_v24, %v9410_v22  ;;  %v7574_v35 = vld [vmem:[%s11530_s12 + $0x340] sm:$0xff] }
0x21fc   :  { %8285 = vmatpush3.msra.mxu0 %v7546_v33  ;;  %8257 = vmatpush3.msra.mxu1 %v7498_v39  ;;  %v7573_v39 = vld [vmem:[%s11530_s12 + $0x2c8] sm:$0xff]  ;;  %v7652_v24 = vld [vmem:[%s11532_s14 + $0xde0] sm:$0xff] }
0x21fd   :  { %8286 = vmatprep.subr.mxu0 %v7561_v36  ;;  %8258 = vmatprep.subr.mxu1 %v7513_v41 }
0x21fe   :  { %8287 = vmatpush3.msra.mxu0 %v7545_v37  ;;  %8259 = vmatpush3.msra.mxu1 %v7497_v43  ;;  %v7572_v43 = vld [vmem:[%s11530_s12 + $0x2c0] sm:$0xff] }
0x21ff   :  { %8288 = vmatprep.subr.mxu0 %v7560_v42  ;;  %8260 = vmatprep.subr.mxu1 %v7512_v44  ;;  %v7571_v44 = vld [vmem:[%s11530_s12 + $0x248] sm:$0xff] }
0x2200   :  { %8289 = vmatpush3.msra.mxu0 %v7544_v21  ;;  %8261 = vmatpush3.msra.mxu1 %v7496_v46  ;;  %v7570_v46 = vld [vmem:[%s11530_s12 + $0x240] sm:$0xff] }
0x2201   :  { %8290 = vmatprep.subr.mxu0 %v7559_v45  ;;  %8262 = vmatprep.subr.mxu1 %v7511_v49 }
0x2202   :  { %8291 = vmatpush3.msra.mxu0 %v7543_v48  ;;  %8263 = vmatpush3.msra.mxu1 %v7495_v52 }
0x2203   :  { %8292 = vmatprep.subr.mxu0 %v7558_v51  ;;  %6396 = vmatprep.subr.mxu1 %v7577_v55  ;;  %v7618_v55 = vld [vmem:[%s11530_s12 + $0x358] sm:$0xff] }
0x2204   :  { %8293 = vmatpush3.msra.mxu0 %v7542_v53  ;;  %v7619_v53 = vld [vmem:[%s11530_s12 + $0x3d0] sm:$0xff] }
0x2205   :  { %8294 = vmatprep.subr.mxu0 %v7557_v54 }
0x2206   :  { %8295 = vmatpush3.msra.mxu0 %v7541_v60  ;;  %v7612_v60 = vld [vmem:[%s11532_s14 + $0xcf8] sm:$0xff] }
0x2207   :  { %8296 = vmatprep.subr.mxu0 %v7556_v62  ;;  %v7617_v62 = vld [vmem:[%s11530_s12 + $0x350] sm:$0xff] }
0x2208   :  { %8297 = vmatpush3.msra.mxu0 %v7540_v63 }
0x2209   :  { %8298 = vmatprep.subr.mxu0 %v7555_v57 }
0x220a   :  { %8299 = vmatpush3.msra.mxu0 %v7539_v0  ;;  %v7616_v0 = vld [vmem:[%s11530_s12 + $0x2d8] sm:$0xff] }
0x220b   :  { %8300 = vmatprep.subr.mxu0 %v7554_v1  ;;  %v7615_v1 = vld [vmem:[%s11530_s12 + $0x2d0] sm:$0xff] }
0x220c   :  { %8301 = vmatpush3.msra.mxu0 %v7538_v2  ;;  %v7596_v2 = vld [vmem:[%s11532_s14 + $0xc78] sm:$0xff] }
0x220d   :  { %6606 = vmatprep.subr.mxu0 %v7620_v59  ;;  %v7614_v59 = vld [vmem:[%s11530_s12 + $0x258] sm:$0xff] }
0x229a   :  { %v8188_v3 = vpop.f32.mrf.mxu0  ;;  %v8226_v4 = vpop.f32.mrf.mxu1 }
0x229c   :  { %v8189_v40 = vpop.f32.mrf.mxu0  ;;  %v8227_v15 = vpop.f32.mrf.mxu1 }
0x229d   :  { %v8190_v5 = vadd.f32 %v8189_v40, %v8188_v3  ;;  %v8228_v50 = vadd.f32 %v8227_v15, %v8226_v4  ;;  %v7611_v3 = vld [vmem:[%s11532_s14 + $0xcf0] sm:$0xff]  ;;  %v7610_v15 = vld [vmem:[%s11532_s14 + $0xce8] sm:$0xff] }
0x229e   :  { %v8229_v7 = vpop.f32.mrf.mxu1  ;;  %v7613_v4 = vld [vmem:[%s11530_s12 + $0x250] sm:$0xff] }
0x229f   :  { %v10961_v9 = vadd.f32 %v8228_v50, %v8190_v5  ;;  %v8191_v10 = vpop.f32.mrf.mxu0  ;;  %v7595_v40 = vld [vmem:[%s11532_s14 + $0xc70] sm:$0xff]  ;;  %v7594_v5 = vld [vmem:[%s11532_s14 + $0xc68] sm:$0xff]  ;;  %v7609_v50 = vld [vmem:[%s11532_s14 + $0xce0] sm:$0xff] }
0x22a0   :  { %v8230_v11 = vpop.f32.mrf.mxu1 }
0x22a1   :  { %v8192_v56 = vpop.f32.mrf.mxu0  ;;  %v8231_v58 = vadd.f32 %v8230_v11, %v8229_v7  ;;  %v7655_v7 = vld [vmem:[%s11532_s14 + $0xdf8] sm:$0xff] }
0x22a2   :  { %v8193_v12 = vadd.f32 %v8192_v56, %v8191_v10  ;;  %v7639_v10 = vld [vmem:[%s11532_s14 + $0xd78] sm:$0xff] }
0x22a3   :  { %v6018_v6 = vpop.f32.mrf.mxu0  ;;  %v7608_v11 = vld [vmem:[%s11532_s14 + $0xcd8] sm:$0xff] }
0x22a4   :  { %v10965_v14 = vadd.f32 %v8231_v58, %v8193_v12  ;;  %v6019_v18 = vadd.f32 %v6018_v6, %v5945_v61  ;;  %v7592_v56 = vld [vmem:[%s11532_s14 + $0xc58] sm:$0xff]  ;;  %v7654_v58 = vld [vmem:[%s11532_s14 + $0xdf0] sm:$0xff]  ;;  %v7653_v6 = vld [vmem:[%s11532_s14 + $0xde8] sm:$0xff] }
0x22a5   :  { %v6020_v19 = vpop.f32.mrf.mxu0  ;;  %v7638_v12 = vld [vmem:[%s11532_s14 + $0xd70] sm:$0xff] }
0x22a6   :  { %v6021_v20 = vadd.f32 %v6020_v19, %v5949_v13  ;;  %v6029_v26 = vmax.f32 %v6019_v18, 0.0  ;;  %v7606_v18 = vld [vmem:[%s11532_s14 + $0xcc8] sm:$0xff] }
0x22a7   :  { %v6024_v23 = vpop.f32.mrf.mxu0  ;;  %v7637_v19 = vld [vmem:[%s11532_s14 + $0xd68] sm:$0xff] }
0x22a8   :  { %v6030_v25 = vmax.f32 %v6021_v20, 0.0  ;;  %v6025_v27 = vadd.f32 %v6024_v23, %v5945_v61  ;;  %v7607_v61 = vld [vmem:[%s11532_s14 + $0xcd0] sm:$0xff]  ;;  %v7590_v20 = vld [vmem:[%s11532_s14 + $0xc48] sm:$0xff]  ;;  %v7605_v23 = vld [vmem:[%s11532_s14 + $0xcc0] sm:$0xff] }
0x22a9   :  { %v6026_v28 = vpop.f32.mrf.mxu0 }
0x22aa   :  { %v6027_v34 = vadd.f32 %v6026_v28, %v5949_v13  ;;  %6129 = vmatprep.mubr.f32.mxu1 %v6030_v25  ;;  %v6031_v37 = vmax.f32 %v6025_v27, 0.0  ;;  %v7591_v13 = vld [vmem:[%s11532_s14 + $0xc50] sm:$0xff]  ;;  %v7636_v25 = vld [vmem:[%s11532_s14 + $0xd60] sm:$0xff]  ;;  %v7604_v27 = vld [vmem:[%s11532_s14 + $0xcb8] sm:$0xff] }
0x22ab   :  { %6130 = vmatmul.mubr.f32.vlgmr.msra.gmra.mxu1 %v6029_v26  ;;  %v6228_v33 = vpop.f32.mrf.mxu0  ;;  %v7589_v26 = vld [vmem:[%s11532_s14 + $0xc40] sm:$0xff]  ;;  %v7651_v28 = vld [vmem:[%s11532_s14 + $0xdd8] sm:$0xff] }
0x22ac   :  { %v6032_v36 = vmax.f32 %v6027_v34, 0.0  ;;  %6397 = vmatpush1.msra.mxu1 %v7576_v30  ;;  %v6229_v41 = vadd.f32 %v6228_v33, %v6155_v29  ;;  %v7635_v30 = vld [vmem:[%s11532_s14 + $0xd58] sm:$0xff]  ;;  %v7603_v34 = vld [vmem:[%s11532_s14 + $0xcb0] sm:$0xff] }
0x22ad   :  { %v6230_v42 = vpop.f32.mrf.mxu0  ;;  %6398 = vmatprep.subr.mxu1 %v7575_v31  ;;  %v7587_v31 = vld [vmem:[%s11532_s14 + $0xc30] sm:$0xff] }
0x22ae   :  { %v6231_v21 = vadd.f32 %v6230_v42, %v6159_v32  ;;  %6134 = vmatprep.mubr.f32.mxu1 %v6032_v36  ;;  %6399 = vmatpush1.msra.mxu1 %v7574_v35  ;;  %v6239_v49 = vmax.f32 %v6229_v41, 0.0  ;;  %v7634_v33 = vld [vmem:[%s11532_s14 + $0xd50] sm:$0xff]  ;;  %v7602_v35 = vld [vmem:[%s11532_s14 + $0xca8] sm:$0xff]  ;;  %v7601_v41 = vld [vmem:[%s11532_s14 + $0xca0] sm:$0xff] }
0x22af   :  { %6135 = vmatmul.mubr.f32.gmra.mxu1 %v6031_v37  ;;  %v6234_v45 = vpop.f32.mrf.mxu0  ;;  %6400 = vmatprep.subr.mxu1 %v7573_v39  ;;  %v7649_v36 = vld [vmem:[%s11532_s14 + $0xdc8] sm:$0xff]  ;;  %v7648_v42 = vld [vmem:[%s11532_s14 + $0xdc0] sm:$0xff] }
0x22b0   :  { %v6240_v48 = vmax.f32 %v6231_v21, 0.0  ;;  %6401 = vmatpush1.msra.mxu1 %v7572_v43  ;;  %6436 = vmatprep.mubr.f32.mxu1 %v8805_v17  ;;  %v6235_v51 = vadd.f32 %v6234_v45, %v6155_v29  ;;  %v7588_v29 = vld [vmem:[%s11532_s14 + $0xc38] sm:$0xff]  ;;  %v7586_v39 = vld [vmem:[%s11532_s14 + $0xc28] sm:$0xff]  ;;  %v7585_v43 = vld [vmem:[%s11532_s14 + $0xc20] sm:$0xff] }
0x22b1   :  { %v6236_v52 = vpop.f32.mrf.mxu0  ;;  %6402 = vmatprep.subr.mxu1 %v7571_v44  ;;  %v7633_v37 = vld [vmem:[%s11532_s14 + $0xd48] sm:$0xff]  ;;  %v7632_v21 = vld [vmem:[%s11532_s14 + $0xd40] sm:$0xff]  ;;  %v7600_v44 = vld [vmem:[%s11532_s14 + $0xc98] sm:$0xff] }
0x22b2   :  { %v6237_v54 = vadd.f32 %v6236_v52, %v6159_v32  ;;  %6339 = vmatprep.mubr.f32.mxu0 %v6240_v48  ;;  %6403 = vmatpush1.msra.mxu1 %v7570_v46  ;;  %v6241_v57 = vmax.f32 %v6235_v51, 0.0  ;;  %v7650_v32 = vld [vmem:[%s11532_s14 + $0xdd0] sm:$0xff]  ;;  %v7647_v45 = vld [vmem:[%s11532_s14 + $0xdb8] sm:$0xff] }
0x22b3   :  { %6340 = vmatmul.mubr.f32.vlgmr.msra.gmra.mxu0 %v6239_v49  ;;  %7579 = vmatmul.mubr.msk.f32.vlgmr.msra.gmra.mxu1 %vm162_vm1, %v10490_v16  ;;  %v7584_v46 = vld [vmem:[%s11532_s14 + $0xc18] sm:$0xff]  ;;  %v7599_v49 = vld [vmem:[%s11532_s14 + $0xc90] sm:$0xff] }
0x22b4   :  { %v6242_v63 = vmax.f32 %v6237_v54, 0.0  ;;  %6607 = vmatpush1.msra.mxu0 %v7619_v53  ;;  %6442 = vmatprep.mubr.f32.mxu1 %v8805_v17  ;;  %v7631_v48 = vld [vmem:[%s11532_s14 + $0xd38] sm:$0xff]  ;;  %v7646_v51 = vld [vmem:[%s11532_s14 + $0xdb0] sm:$0xff]  ;;  %v7598_v54 = vld [vmem:[%s11532_s14 + $0xc88] sm:$0xff] }
0x22b5   :  { %6608 = vmatprep.subr.mxu0 %v7618_v55  ;;  %8308 = vmatprep.subr.mxu1 %v7612_v60  ;;  %v7583_v52 = vld [vmem:[%s11532_s14 + $0xc10] sm:$0xff]  ;;  %v7645_v55 = vld [vmem:[%s11532_s14 + $0xda8] sm:$0xff] }
0x22b6   :  { %6344 = vmatprep.mubr.f32.mxu0 %v6242_v63  ;;  %6609 = vmatpush1.msra.mxu0 %v7617_v62  ;;  %v7630_v53 = vld [vmem:[%s11532_s14 + $0xd30] sm:$0xff]  ;;  %v7582_v60 = vld [vmem:[%s11532_s14 + $0xc08] sm:$0xff]  ;;  %v7597_v63 = vld [vmem:[%s11532_s14 + $0xc80] sm:$0xff] }
0x22b7   :  { %6345 = vmatmul.mubr.f32.gmra.mxu0 %v6241_v57  ;;  %7580 = vmatmul.mubr.msk.f32.gmra.mxu1 %vm162_vm1, %v10510_v38  ;;  %v7629_v62 = vld [vmem:[%s11532_s14 + $0xd28] sm:$0xff]  ;;  %v7644_v57 = vld [vmem:[%s11532_s14 + $0xda0] sm:$0xff] }
0x22b8   :  { %6610 = vmatprep.subr.mxu0 %v7616_v0  ;;  %6646 = vmatprep.mubr.f32.mxu0 %v8805_v17  ;;  %v7581_v0 = vld [vmem:[%s11532_s14 + $0xc00] sm:$0xff] }
0x22b9   :  { %6611 = vmatpush1.msra.mxu0 %v7615_v1  ;;  %8309 = vmatpush3.msra.mxu1 %v7596_v2  ;;  %v7628_v1 = vld [vmem:[%s11532_s14 + $0xd20] sm:$0xff]  ;;  %v7643_v2 = vld [vmem:[%s11532_s14 + $0xd98] sm:$0xff] }
0x22ba   :  { %6612 = vmatprep.subr.mxu0 %v7614_v59  ;;  %8310 = vmatprep.subr.mxu1 %v7611_v3  ;;  %v7663_v59 = vld [vmem:[%s11530_s12 + $0x3e8] sm:$0xff]  ;;  %v7627_v3 = vld [vmem:[%s11532_s14 + $0xd18] sm:$0xff] }
0x22bb   :  { %6613 = vmatpush1.msra.mxu0 %v7613_v4  ;;  %8311 = vmatpush3.msra.mxu1 %v7595_v40  ;;  %v7642_v4 = vld [vmem:[%s11532_s14 + $0xd90] sm:$0xff] }
0x22bc   :  { %7622 = vmatmul.mubr.msk.f32.vlgmr.msra.gmra.mxu0 %vm162_vm1, %v10490_v16  ;;  %8312 = vmatprep.subr.mxu1 %v7610_v15  ;;  %v7626_v40 = vld [vmem:[%s11532_s14 + $0xd10] sm:$0xff]  ;;  %v7641_v15 = vld [vmem:[%s11532_s14 + $0xd88] sm:$0xff] }
0x22bd   :  { %6652 = vmatprep.mubr.f32.mxu0 %v8805_v17  ;;  %8313 = vmatpush3.msra.mxu1 %v7594_v5  ;;  %v7625_v5 = vld [vmem:[%s11532_s14 + $0xd08] sm:$0xff] }
0x22be   :  { %8314 = vmatprep.subr.mxu1 %v7609_v50  ;;  %8346 = vmatprep.subr.mxu0 %v7655_v7  ;;  %v7640_v50 = vld [vmem:[%s11532_s14 + $0xd80] sm:$0xff] }
0x22bf   :  { %8315 = vmatpush3.msra.mxu1 %v7593_v8  ;;  %8347 = vmatpush3.msra.mxu0 %v7639_v10  ;;  %v7624_v7 = vld [vmem:[%s11532_s14 + $0xd00] sm:$0xff]  ;;  %v7706_v8 = vld [vmem:[%s11530_s12 + $0x3f8] sm:$0xff] }
0x22c0   :  { %7623 = vmatmul.mubr.msk.f32.gmra.mxu0 %vm162_vm1, %v10510_v38  ;;  %8316 = vmatprep.subr.mxu1 %v7608_v11 }
0x22c1   :  { %8317 = vmatpush3.msra.mxu1 %v7592_v56  ;;  %8348 = vmatprep.subr.mxu0 %v7654_v58  ;;  %v7578_v58 = vld [vmem:[%s11531_s13 + $0x18] sm:$0x3] }
0x22c2   :  { %8318 = vmatprep.subr.mxu1 %v7607_v61  ;;  %8349 = vmatpush3.msra.mxu0 %v7638_v12 }
0x22c3   :  { %8319 = vmatpush3.msra.mxu1 %v7591_v13  ;;  %8350 = vmatprep.subr.mxu0 %v7653_v6  ;;  %v6365_v6 = vrot.slane %v7578_v58, %v9405_v47 }
0x22c4   :  { %8320 = vmatprep.subr.mxu1 %v7606_v18  ;;  %8351 = vmatpush3.msra.mxu0 %v7637_v19  ;;  %v6369_v19 = vrot.slane %v7578_v58, %v9410_v22  ;;  %v7681_v58 = vld [vmem:[%s11532_s14 + $0xe70] sm:$0xff] }
0x22c5   :  { %8321 = vmatpush3.msra.mxu1 %v7590_v20  ;;  %8352 = vmatprep.subr.mxu0 %v7652_v24 }
0x22c6   :  { %8322 = vmatprep.subr.mxu1 %v7605_v23  ;;  %8353 = vmatpush3.msra.mxu0 %v7636_v25 }
0x22c7   :  { %8323 = vmatpush3.msra.mxu1 %v7589_v26  ;;  %8354 = vmatprep.subr.mxu0 %v7651_v28 }
0x22c8   :  { %8324 = vmatprep.subr.mxu1 %v7604_v27  ;;  %8355 = vmatpush3.msra.mxu0 %v7635_v30 }
0x22c9   :  { %8325 = vmatpush3.msra.mxu1 %v7588_v29  ;;  %8356 = vmatprep.subr.mxu0 %v7650_v32 }
0x22ca   :  { %8326 = vmatprep.subr.mxu1 %v7603_v34  ;;  %8357 = vmatpush3.msra.mxu0 %v7634_v33 }
0x22cb   :  { %8327 = vmatpush3.msra.mxu1 %v7587_v31  ;;  %8358 = vmatprep.subr.mxu0 %v7649_v36 }
0x22cc   :  { %8328 = vmatprep.subr.mxu1 %v7602_v35  ;;  %8359 = vmatpush3.msra.mxu0 %v7633_v37 }
0x22cd   :  { %8329 = vmatpush3.msra.mxu1 %v7586_v39  ;;  %8360 = vmatprep.subr.mxu0 %v7648_v42 }
0x22ce   :  { %8330 = vmatprep.subr.mxu1 %v7601_v41  ;;  %8361 = vmatpush3.msra.mxu0 %v7632_v21 }
0x22cf   :  { %8331 = vmatpush3.msra.mxu1 %v7585_v43  ;;  %8362 = vmatprep.subr.mxu0 %v7647_v45  ;;  %v7661_v43 = vld [vmem:[%s11530_s12 + $0x368] sm:$0xff] }
0x22d0   :  { %8332 = vmatprep.subr.mxu1 %v7600_v44  ;;  %8363 = vmatpush3.msra.mxu0 %v7631_v48  ;;  %v7660_v44 = vld [vmem:[%s11530_s12 + $0x360] sm:$0xff] }
0x22d1   :  { %8333 = vmatpush3.msra.mxu1 %v7584_v46  ;;  %8364 = vmatprep.subr.mxu0 %v7646_v51 }
0x22d2   :  { %8334 = vmatprep.subr.mxu1 %v7599_v49  ;;  %8365 = vmatpush3.msra.mxu0 %v7630_v53  ;;  %v7659_v49 = vld [vmem:[%s11530_s12 + $0x2e8] sm:$0xff] }
0x22d3   :  { %8335 = vmatpush3.msra.mxu1 %v7583_v52  ;;  %8366 = vmatprep.subr.mxu0 %v7645_v55  ;;  %v7658_v52 = vld [vmem:[%s11530_s12 + $0x2e0] sm:$0xff]  ;;  %v7657_v55 = vld [vmem:[%s11530_s12 + $0x268] sm:$0xff] }
0x22d4   :  { %8336 = vmatprep.subr.mxu1 %v7598_v54  ;;  %8367 = vmatpush3.msra.mxu0 %v7629_v62  ;;  %v7656_v62 = vld [vmem:[%s11530_s12 + $0x260] sm:$0xff] }
0x22d5   :  { %8337 = vmatpush3.msra.mxu1 %v7582_v60  ;;  %8368 = vmatprep.subr.mxu0 %v7644_v57 }
0x22d6   :  { %8338 = vmatprep.subr.mxu1 %v7597_v63  ;;  %8369 = vmatpush3.msra.mxu0 %v7628_v1 }
0x22d7   :  { %8339 = vmatpush3.msra.mxu1 %v7581_v0  ;;  %8370 = vmatprep.subr.mxu0 %v7643_v2 }
0x22d8   :  { %6816 = vmatprep.subr.mxu1 %v7663_v59  ;;  %8371 = vmatpush3.msra.mxu0 %v7627_v3  ;;  %v7705_v59 = vld [vmem:[%s11530_s12 + $0x3f0] sm:$0xff]  ;;  %v7698_v3 = vld [vmem:[%s11532_s14 + $0xef8] sm:$0xff] }
0x22d9   :  { %8372 = vmatprep.subr.mxu0 %v7642_v4 }
0x22da   :  { %8373 = vmatpush3.msra.mxu0 %v7626_v40  ;;  %v7704_v40 = vld [vmem:[%s11530_s12 + $0x378] sm:$0xff] }
0x22db   :  { %8374 = vmatprep.subr.mxu0 %v7641_v15  ;;  %v7682_v15 = vld [vmem:[%s11532_s14 + $0xe78] sm:$0xff] }
0x22dc   :  { %8375 = vmatpush3.msra.mxu0 %v7625_v5  ;;  %v7703_v5 = vld [vmem:[%s11530_s12 + $0x370] sm:$0xff] }
0x22dd   :  { %8376 = vmatprep.subr.mxu0 %v7640_v50 }
0x22de   :  { %8377 = vmatpush3.msra.mxu0 %v7624_v7 }
0x22df   :  { %7026 = vmatprep.subr.mxu0 %v7706_v8  ;;  %v7702_v8 = vld [vmem:[%s11530_s12 + $0x2f8] sm:$0xff] }
0x236b   :  { %v8264_v10 = vpop.f32.mrf.mxu1 }
0x236d   :  { %v8265_v11 = vpop.f32.mrf.mxu1 }
0x236e   :  { %v8266_v56 = vadd.f32 %v8265_v11, %v8264_v10  ;;  %v7701_v10 = vld [vmem:[%s11530_s12 + $0x2f0] sm:$0xff] }
0x236f   :  { %v8267_v61 = vpop.f32.mrf.mxu1  ;;  %v7697_v11 = vld [vmem:[%s11532_s14 + $0xef0] sm:$0xff] }
0x2370   :  { %v6140_v12 = vadd.f32 %v8266_v56, %v10961_v9  ;;  %v7621_v9 = vld [vmem:[%s11531_s13 + $0x1a] sm:$0x3] }
0x2371   :  { %v8268_v13 = vpop.f32.mrf.mxu1  ;;  %v6575_v42 = vrot.slane %v7621_v9, %v9405_v47  ;;  %v6579_v21 = vrot.slane %v7621_v9, %v9410_v22  ;;  %v7700_v56 = vld [vmem:[%s11530_s12 + $0x278] sm:$0xff]  ;;  %v7691_v9 = vld [vmem:[%s11532_s14 + $0xec0] sm:$0xff] }
0x2372   :  { %v8269_v18 = vadd.f32 %v8268_v13, %v8267_v61  ;;  %v7699_v61 = vld [vmem:[%s11530_s12 + $0x270] sm:$0xff]  ;;  %v7680_v13 = vld [vmem:[%s11532_s14 + $0xe68] sm:$0xff] }
0x2373   :  { %v8302_v20 = vpop.f32.mrf.mxu0  ;;  %v6438_v24 = vpop.f32.mrf.mxu1 }
0x2374   :  { %v6141_v23 = vadd.f32 %v8269_v18, %v10965_v14  ;;  %v6439_v25 = vadd.f32 %v6438_v24, %v6365_v6  ;;  %v7662_v14 = vld [vmem:[%s11530_s12 + $0x3e0] sm:$0xff]  ;;  %v7725_v24 = vld [vmem:[%s11532_s14 + $0xf78] sm:$0xff] }
0x2375   :  { %v8303_v26 = vpop.f32.mrf.mxu0  ;;  %v6440_v27 = vpop.f32.mrf.mxu1  ;;  %v7679_v18 = vld [vmem:[%s11532_s14 + $0xe60] sm:$0xff] }
0x2376   :  { %v8304_v28 = vadd.f32 %v8303_v26, %v8302_v20  ;;  %v6441_v29 = vadd.f32 %v6440_v27, %v6369_v19  ;;  %v6449_v33 = vmax.f32 %v6439_v25, 0.0  ;;  %v7694_v20 = vld [vmem:[%s11532_s14 + $0xed8] sm:$0xff]  ;;  %v7693_v25 = vld [vmem:[%s11532_s14 + $0xed0] sm:$0xff] }
0x2377   :  { %v8305_v30 = vpop.f32.mrf.mxu0  ;;  %v6444_v34 = vpop.f32.mrf.mxu1  ;;  %v7740_v26 = vld [vmem:[%s11532_s14 + $0xff0] sm:$0xff] }
0x2378   :  { %v11234_v32 = vadd.f32 %v8304_v28, %v6140_v12  ;;  %v6450_v31 = vmax.f32 %v6441_v29, 0.0  ;;  %v6445_v35 = vadd.f32 %v6444_v34, %v6365_v6  ;;  %v7696_v12 = vld [vmem:[%s11532_s14 + $0xee8] sm:$0xff]  ;;  %v7695_v6 = vld [vmem:[%s11532_s14 + $0xee0] sm:$0xff]  ;;  %v7724_v27 = vld [vmem:[%s11532_s14 + $0xf70] sm:$0xff] }
0x2379   :  { %v8306_v36 = vpop.f32.mrf.mxu0  ;;  %v6446_v39 = vpop.f32.mrf.mxu1  ;;  %v7692_v28 = vld [vmem:[%s11532_s14 + $0xec8] sm:$0xff] }
0x237a   :  { %v8307_v37 = vadd.f32 %v8306_v36, %v8305_v30  ;;  %v6447_v41 = vadd.f32 %v6446_v39, %v6369_v19  ;;  %6549 = vmatprep.mubr.f32.mxu1 %v6450_v31  ;;  %v6451_v51 = vmax.f32 %v6445_v35, 0.0  ;;  %v7741_v19 = vld [vmem:[%s11532_s14 + $0xff8] sm:$0xff]  ;;  %v7739_v29 = vld [vmem:[%s11532_s14 + $0xfe8] sm:$0xff]  ;;  %v7738_v31 = vld [vmem:[%s11532_s14 + $0xfe0] sm:$0xff] }
0x237b   :  { %6550 = vmatmul.mubr.f32.vlgmr.msra.gmra.mxu1 %v6449_v33  ;;  %v7676_v30 = vld [vmem:[%s11532_s14 + $0xe48] sm:$0xff]  ;;  %v7675_v33 = vld [vmem:[%s11532_s14 + $0xe40] sm:$0xff]  ;;  %v7690_v36 = vld [vmem:[%s11532_s14 + $0xeb8] sm:$0xff] }
0x237c   :  { %v11247_v45 = vadd.f32 %v8307_v37, %v6141_v23  ;;  %v6452_v46 = vmax.f32 %v6447_v41, 0.0  ;;  %v6648_v48 = vpop.f32.mrf.mxu0  ;;  %6817 = vmatpush1.msra.mxu1 %v7662_v14  ;;  %v7678_v23 = vld [vmem:[%s11532_s14 + $0xe58] sm:$0xff]  ;;  %v7723_v34 = vld [vmem:[%s11532_s14 + $0xf68] sm:$0xff]  ;;  %v7722_v35 = vld [vmem:[%s11532_s14 + $0xf60] sm:$0xff] }
0x237d   :  { %6818 = vmatprep.subr.mxu1 %v7661_v43  ;;  %v6649_v53 = vadd.f32 %v6648_v48, %v6575_v42  ;;  %v7737_v39 = vld [vmem:[%s11532_s14 + $0xfd8] sm:$0xff]  ;;  %v7689_v41 = vld [vmem:[%s11532_s14 + $0xeb0] sm:$0xff]  ;;  %v7672_v48 = vld [vmem:[%s11532_s14 + $0xe28] sm:$0xff] }
0x237e   :  { %v6650_v54 = vpop.f32.mrf.mxu0  ;;  %6554 = vmatprep.mubr.f32.mxu1 %v6452_v46  ;;  %6819 = vmatpush1.msra.mxu1 %v7660_v44  ;;  %v7674_v14 = vld [vmem:[%s11532_s14 + $0xe38] sm:$0xff]  ;;  %v7673_v43 = vld [vmem:[%s11532_s14 + $0xe30] sm:$0xff]  ;;  %v7688_v44 = vld [vmem:[%s11532_s14 + $0xea8] sm:$0xff] }
0x237f   :  { %v6651_v60 = vadd.f32 %v6650_v54, %v6579_v21  ;;  %6555 = vmatmul.mubr.f32.gmra.mxu1 %v6451_v51  ;;  %6820 = vmatprep.subr.mxu1 %v7659_v49  ;;  %v6659_v0 = vmax.f32 %v6649_v53, 0.0  ;;  %v7721_v37 = vld [vmem:[%s11532_s14 + $0xf58] sm:$0xff]  ;;  %v7735_v46 = vld [vmem:[%s11532_s14 + $0xfc8] sm:$0xff]  ;;  %v7687_v51 = vld [vmem:[%s11532_s14 + $0xea0] sm:$0xff] }
0x2380   :  { %v6654_v63 = vpop.f32.mrf.mxu0  ;;  %6821 = vmatpush1.msra.mxu1 %v7658_v52  ;;  %6856 = vmatprep.mubr.f32.mxu1 %v8805_v17  ;;  %v7719_v49 = vld [vmem:[%s11532_s14 + $0xf48] sm:$0xff]  ;;  %v7734_v52 = vld [vmem:[%s11532_s14 + $0xfc0] sm:$0xff] }
0x2381   :  { %v6660_v57 = vmax.f32 %v6651_v60, 0.0  ;;  %6822 = vmatprep.subr.mxu1 %v7657_v55  ;;  %v6655_v1 = vadd.f32 %v6654_v63, %v6575_v42  ;;  %v7736_v42 = vld [vmem:[%s11532_s14 + $0xfd0] sm:$0xff]  ;;  %v7671_v53 = vld [vmem:[%s11532_s14 + $0xe20] sm:$0xff]  ;;  %v7686_v55 = vld [vmem:[%s11532_s14 + $0xe98] sm:$0xff] }
0x2382   :  { %v6656_v2 = vpop.f32.mrf.mxu0  ;;  %6823 = vmatpush1.msra.mxu1 %v7656_v62  ;;  %v7718_v54 = vld [vmem:[%s11532_s14 + $0xf40] sm:$0xff]  ;;  %v7733_v60 = vld [vmem:[%s11532_s14 + $0xfb8] sm:$0xff] }
0x2383   :  { %v6657_v4 = vadd.f32 %v6656_v2, %v6579_v21  ;;  %6759 = vmatprep.mubr.f32.mxu0 %v6660_v57  ;;  %7665 = vmatmul.mubr.msk.f32.vlgmr.msra.gmra.mxu1 %vm162_vm1, %v10490_v16  ;;  %v6661_v7 = vmax.f32 %v6655_v1, 0.0  ;;  %v7720_v21 = vld [vmem:[%s11532_s14 + $0xf50] sm:$0xff]  ;;  %v7670_v62 = vld [vmem:[%s11532_s14 + $0xe18] sm:$0xff] }
0x2384   :  { %6760 = vmatmul.mubr.f32.vlgmr.msra.gmra.mxu0 %v6659_v0  ;;  %6862 = vmatprep.mubr.f32.mxu1 %v8805_v17  ;;  %v7717_v63 = vld [vmem:[%s11532_s14 + $0xf38] sm:$0xff]  ;;  %v7685_v57 = vld [vmem:[%s11532_s14 + $0xe90] sm:$0xff] }
0x2385   :  { %v6662_v50 = vmax.f32 %v6657_v4, 0.0  ;;  %7027 = vmatpush1.msra.mxu0 %v7705_v59  ;;  %8384 = vmatprep.subr.mxu1 %v7698_v3  ;;  %v7732_v0 = vld [vmem:[%s11532_s14 + $0xfb0] sm:$0xff]  ;;  %v7684_v59 = vld [vmem:[%s11532_s14 + $0xe88] sm:$0xff] }
0x2386   :  { %7028 = vmatprep.subr.mxu0 %v7704_v40  ;;  %8385 = vmatpush3.msra.mxu1 %v7682_v15  ;;  %v7669_v1 = vld [vmem:[%s11532_s14 + $0xe10] sm:$0xff]  ;;  %v7731_v3 = vld [vmem:[%s11532_s14 + $0xfa8] sm:$0xff]  ;;  %v7683_v15 = vld [vmem:[%s11532_s14 + $0xe80] sm:$0xff] }
0x2387   :  { %6764 = vmatprep.mubr.f32.mxu0 %v6662_v50  ;;  %7029 = vmatpush1.msra.mxu0 %v7703_v5  ;;  %v7716_v2 = vld [vmem:[%s11532_s14 + $0xf30] sm:$0xff]  ;;  %v7668_v4 = vld [vmem:[%s11532_s14 + $0xe08] sm:$0xff]  ;;  %v7730_v5 = vld [vmem:[%s11532_s14 + $0xfa0] sm:$0xff] }
0x2388   :  { %6765 = vmatmul.mubr.f32.gmra.mxu0 %v6661_v7  ;;  %7666 = vmatmul.mubr.msk.f32.gmra.mxu1 %vm162_vm1, %v10510_v38  ;;  %v7715_v40 = vld [vmem:[%s11532_s14 + $0xf28] sm:$0xff]  ;;  %v7667_v50 = vld [vmem:[%s11532_s14 + $0xe00] sm:$0xff] }
0x2389   :  { %7030 = vmatprep.subr.mxu0 %v7702_v8  ;;  %7066 = vmatprep.mubr.f32.mxu0 %v8805_v17  ;;  %v7714_v7 = vld [vmem:[%s11532_s14 + $0xf20] sm:$0xff]  ;;  %v7729_v8 = vld [vmem:[%s11532_s14 + $0xf98] sm:$0xff] }
0x238a   :  { %7031 = vmatpush1.msra.mxu0 %v7701_v10  ;;  %8386 = vmatprep.subr.mxu1 %v7697_v11  ;;  %v7713_v10 = vld [vmem:[%s11532_s14 + $0xf18] sm:$0xff]  ;;  %v7728_v11 = vld [vmem:[%s11532_s14 + $0xf90] sm:$0xff] }
0x238b   :  { %7032 = vmatprep.subr.mxu0 %v7700_v56  ;;  %8387 = vmatpush3.msra.mxu1 %v7681_v58  ;;  %v7712_v56 = vld [vmem:[%s11532_s14 + $0xf10] sm:$0xff]  ;;  %v7727_v58 = vld [vmem:[%s11532_s14 + $0xf88] sm:$0xff] }
0x238c   :  { %7033 = vmatpush1.msra.mxu0 %v7699_v61  ;;  %8388 = vmatprep.subr.mxu1 %v7696_v12  ;;  %v7711_v61 = vld [vmem:[%s11532_s14 + $0xf08] sm:$0xff]  ;;  %v7726_v12 = vld [vmem:[%s11532_s14 + $0xf80] sm:$0xff] }
0x238d   :  { %7708 = vmatmul.mubr.msk.f32.vlgmr.msra.gmra.mxu0 %vm162_vm1, %v10490_v16  ;;  %8389 = vmatpush3.msra.mxu1 %v7680_v13  ;;  %v7710_v13 = vld [vmem:[%s11532_s14 + $0xf00] sm:$0xff] }
0x238e   :  { %7072 = vmatprep.mubr.f32.mxu0 %v8805_v17  ;;  %8390 = vmatprep.subr.mxu1 %v7695_v6  ;;  %v7677_v17 = vld [vmem:[%s11532_s14 + $0xe50] sm:$0xff] }
0x238f   :  { %8391 = vmatpush3.msra.mxu1 %v7679_v18  ;;  %8422 = vmatprep.subr.mxu0 %v7741_v19 }
0x2390   :  { %8392 = vmatprep.subr.mxu1 %v7694_v20  ;;  %8423 = vmatpush3.msra.mxu0 %v7725_v24  ;;  %v7664_v20 = vld [vmem:[%s11531_s13 + $0x1c] sm:$0x3] }
0x2391   :  { %7709 = vmatmul.mubr.msk.f32.gmra.mxu0 %vm162_vm1, %v10510_v38  ;;  %8393 = vmatpush3.msra.mxu1 %v7678_v23 }
0x2392   :  { %8394 = vmatprep.subr.mxu1 %v7693_v25  ;;  %8424 = vmatprep.subr.mxu0 %v7740_v26  ;;  %v6785_v26 = vrot.slane %v7664_v20, %v9405_v47 }
0x2393   :  { %8395 = vmatpush3.msra.mxu1 %v7677_v17  ;;  %8425 = vmatpush3.msra.mxu0 %v7724_v27  ;;  %v6789_v27 = vrot.slane %v7664_v20, %v9410_v22 }
0x2394   :  { %8396 = vmatprep.subr.mxu1 %v7692_v28  ;;  %8426 = vmatprep.subr.mxu0 %v7739_v29 }
0x2395   :  { %8397 = vmatpush3.msra.mxu1 %v7676_v30  ;;  %8427 = vmatpush3.msra.mxu0 %v7723_v34 }
0x2396   :  { %8398 = vmatprep.subr.mxu1 %v7691_v9  ;;  %8428 = vmatprep.subr.mxu0 %v7738_v31 }
0x2397   :  { %8399 = vmatpush3.msra.mxu1 %v7675_v33  ;;  %8429 = vmatpush3.msra.mxu0 %v7722_v35 }
0x2398   :  { %8400 = vmatprep.subr.mxu1 %v7690_v36  ;;  %8430 = vmatprep.subr.mxu0 %v7737_v39 }
0x2399   :  { %8401 = vmatpush3.msra.mxu1 %v7674_v14  ;;  %8431 = vmatpush3.msra.mxu0 %v7721_v37 }
0x239a   :  { %8402 = vmatprep.subr.mxu1 %v7689_v41  ;;  %8432 = vmatprep.subr.mxu0 %v7736_v42 }
0x239b   :  { %8403 = vmatpush3.msra.mxu1 %v7673_v43  ;;  %8433 = vmatpush3.msra.mxu0 %v7720_v21 }
0x239c   :  { %8404 = vmatprep.subr.mxu1 %v7688_v44  ;;  %8434 = vmatprep.subr.mxu0 %v7735_v46 }
0x239d   :  { %8405 = vmatpush3.msra.mxu1 %v7672_v48  ;;  %8435 = vmatpush3.msra.mxu0 %v7719_v49 }
0x239e   :  { %8406 = vmatprep.subr.mxu1 %v7687_v51  ;;  %8436 = vmatprep.subr.mxu0 %v7734_v52 }
0x239f   :  { %8407 = vmatpush3.msra.mxu1 %v7671_v53  ;;  %8437 = vmatpush3.msra.mxu0 %v7718_v54 }
0x23a0   :  { %8408 = vmatprep.subr.mxu1 %v7686_v55  ;;  %8438 = vmatprep.subr.mxu0 %v7733_v60 }
0x23a1   :  { %8409 = vmatpush3.msra.mxu1 %v7670_v62  ;;  %8439 = vmatpush3.msra.mxu0 %v7717_v63 }
0x23a2   :  { %8410 = vmatprep.subr.mxu1 %v7685_v57  ;;  %8440 = vmatprep.subr.mxu0 %v7732_v0 }
0x23a3   :  { %8411 = vmatpush3.msra.mxu1 %v7669_v1  ;;  %8441 = vmatpush3.msra.mxu0 %v7716_v2 }
0x23a4   :  { %8412 = vmatprep.subr.mxu1 %v7684_v59  ;;  %8442 = vmatprep.subr.mxu0 %v7731_v3 }
0x23a5   :  { %8413 = vmatpush3.msra.mxu1 %v7668_v4  ;;  %8443 = vmatpush3.msra.mxu0 %v7715_v40 }
0x23a6   :  { %8414 = vmatprep.subr.mxu1 %v7683_v15  ;;  %8444 = vmatprep.subr.mxu0 %v7730_v5 }
0x23a7   :  { %8415 = vmatpush3.msra.mxu1 %v7667_v50  ;;  %8445 = vmatpush3.msra.mxu0 %v7714_v7 }
0x23a8   :  { %8446 = vmatprep.subr.mxu0 %v7729_v8 }
0x23a9   :  { %8447 = vmatpush3.msra.mxu0 %v7713_v10 }
0x23aa   :  { %8448 = vmatprep.subr.mxu0 %v7728_v11 }
0x23ab   :  { %8449 = vmatpush3.msra.mxu0 %v7712_v56  ;;  %v7743_v56 = vld [vmem:[%s11533_s15 + $0x1] ss:$0 sm:$0xff] }
0x23ac   :  { %8450 = vmatprep.subr.mxu0 %v7727_v58 }
0x23ad   :  { %8451 = vmatpush3.msra.mxu0 %v7711_v61 }
0x23ae   :  { %8452 = vmatprep.subr.mxu0 %v7726_v12 }
0x23af   :  { %8453 = vmatpush3.msra.mxu0 %v7710_v13 }
0x243b   :  { %v8340_v6 = vpop.f32.mrf.mxu1 }
0x243d   :  { %v8341_v18 = vpop.f32.mrf.mxu1 }
0x243e   :  { %v8342_v19 = vadd.f32 %v8341_v18, %v8340_v6 }
0x243f   :  { %v8343_v24 = vpop.f32.mrf.mxu1 }
0x2440   :  { %v6560_v23 = vadd.f32 %v8342_v19, %v11234_v32  ;;  %v7707_v32 = vld [vmem:[%s11531_s13 + $0x1e] sm:$0x3] }
0x2441   :  { %v8344_v25 = vpop.f32.mrf.mxu1  ;;  %v6995_v46 = vrot.slane %v7707_v32, %v9405_v47  ;;  %v6999_v48 = vrot.slane %v7707_v32, %v9410_v22 }
0x2442   :  { %v8345_v17 = vadd.f32 %v8344_v25, %v8343_v24 }
0x2443   :  { %v6858_v28 = vpop.f32.mrf.mxu1 }
0x2444   :  { %v6561_v29 = vadd.f32 %v8345_v17, %v11247_v45  ;;  %v8378_v30 = vpop.f32.mrf.mxu0  ;;  %v6859_v34 = vadd.f32 %v6858_v28, %v6785_v26 }
0x2445   :  { %v6860_v9 = vpop.f32.mrf.mxu1 }
0x2446   :  { %v8379_v31 = vpop.f32.mrf.mxu0  ;;  %v6861_v33 = vadd.f32 %v6860_v9, %v6789_v27  ;;  %v6869_v37 = vmax.f32 %v6859_v34, 0.0 }
0x2447   :  { %v8380_v35 = vadd.f32 %v8379_v31, %v8378_v30 }
0x2448   :  { %v6870_v36 = vmax.f32 %v6861_v33, 0.0  ;;  %v8381_v39 = vpop.f32.mrf.mxu0  ;;  %v6864_v14 = vpop.f32.mrf.mxu1 }
0x2449   :  { %v6770_v41 = vadd.f32 %v8380_v35, %v6560_v23  ;;  %v6865_v42 = vadd.f32 %v6864_v14, %v6785_v26 }
0x244a   :  { %v8382_v43 = vpop.f32.mrf.mxu0  ;;  %v6866_v21 = vpop.f32.mrf.mxu1  ;;  %6969 = vmatprep.mubr.f32.mxu1 %v6870_v36 }
0x244b   :  { %v8383_v45 = vadd.f32 %v8382_v43, %v8381_v39  ;;  %v6867_v44 = vadd.f32 %v6866_v21, %v6789_v27  ;;  %6970 = vmatmul.mubr.f32.vlgmr.msra.gmra.mxu1 %v6869_v37  ;;  %v6871_v53 = vmax.f32 %v6865_v42, 0.0  ;;  %v7746_v37 = vld [vmem:[%s11528_s10 + $0x1] ss:$0 sm:$0xff]  ;;  %s8818_s10 = smov [#allocation2]  }
0x244c   :  { %v7747_v42 = vld [vmem:[%s11529_s11 + $0x1] ss:$0 sm:$0xff]  ;;  %s7280_s11 = sshll.u32 %s8818_s10, 4  ;;  %s7281_s11 = int_to_ptr.vmem [resolvable:$true] %s7280_s11 }
0x244d   :  { %v6771_v49 = vadd.f32 %v8383_v45, %v6561_v29  ;;  %v6872_v51 = vmax.f32 %v6867_v44, 0.0  ;;  %v7068_v52 = vpop.f32.mrf.mxu0  ;;  %s8783_s30 = scalar_lea.vmem %s7281_s11, 32  ;;  %p8788_p1 = scmp.lt.s32.totalorder %s7281_s11, %s7281_s11 }
0x244e   :  { %v7069_v54 = vadd.f32 %v7068_v52, %v6995_v46  ;;  %p8784_p0 = scmp.ne.s32.totalorder %s7281_s11, %s8783_s30  ;;  %p8789_p2 = scmp.lt.s32.totalorder %s8783_s30, %s8783_s30 }
0x244f   :  { %v7070_v55 = vpop.f32.mrf.mxu0  ;;  %6974 = vmatprep.mubr.f32.mxu1 %v6872_v51 }
0x2450   :  { %v7071_v60 = vadd.f32 %v7070_v55, %v6999_v48  ;;  %6975 = vmatmul.mubr.f32.gmra.mxu1 %v6871_v53  ;;  %v7079_v57 = vmax.f32 %v7069_v54, 0.0  ;;  %p8790_p3 = por %p8789_p2, %p8788_p1 }
0x2451   :  { %v7074_v62 = vpop.f32.mrf.mxu0 }
0x2452   :  { %v7080_v63 = vmax.f32 %v7071_v60, 0.0  ;;  %v7075_v0 = vadd.f32 %v7074_v62, %v6995_v46  ;;  %p8791_p4 = pnand %p8790_p3, %p8784_p0 }
0x2453   :  { %v7076_v1 = vpop.f32.mrf.mxu0 }
0x2454   :  { %v7077_v2 = vadd.f32 %v7076_v1, %v6999_v48  ;;  %7179 = vmatprep.mubr.f32.mxu0 %v7080_v63  ;;  %v7081_v59 = vmax.f32 %v7075_v0, 0.0 }
0x2455   :  { %7180 = vmatmul.mubr.f32.vlgmr.msra.gmra.mxu0 %v7079_v57 }
0x2456   :  { %v7082_v47 = vmax.f32 %v7077_v2, 0.0 }
0x2458   :  { %7184 = vmatprep.mubr.f32.mxu0 %v7082_v47 }
0x2459   :  { %7185 = vmatmul.mubr.f32.gmra.mxu0 %v7081_v59 }
0x250b   :  { %v8416_v22 = vpop.f32.mrf.mxu1 }
0x250d   :  { %v8417_v3 = vpop.f32.mrf.mxu1 }
0x250e   :  { %v8418_v40 = vadd.f32 %v8417_v3, %v8416_v22 }
0x2510   :  { %v8419_v4 = vpop.f32.mrf.mxu1  ;;  %v6980_v7 = vadd.f32 %v8418_v40, %v6770_v41 }
0x2512   :  { %v8420_v15 = vpop.f32.mrf.mxu1 }
0x2513   :  { %v8421_v8 = vadd.f32 %v8420_v15, %v8419_v4 }
0x2515   :  { %v8454_v5 = vpop.f32.mrf.mxu0  ;;  %v6981_v12 = vadd.f32 %v8421_v8, %v6771_v49 }
0x2517   :  { %v8455_v50 = vpop.f32.mrf.mxu0 }
0x2518   :  { %v8456_v10 = vadd.f32 %v8455_v50, %v8454_v5 }
0x2519   :  { %v8457_v11 = vpop.f32.mrf.mxu0 }
0x251a   :  { %v7190_v58 = vadd.f32 %v8456_v10, %v6980_v7 }
0x251b   :  { %v8458_v61 = vpop.f32.mrf.mxu0 }
0x251c   :  { %v8459_v13 = vadd.f32 %v8458_v61, %v8457_v11  ;;  %v7200_v6 = vadd.f32 %v7743_v56, %v7190_v58 }
0x251e   :  { %v7191_v18 = vadd.f32 %v8459_v13, %v6981_v12  ;;  %v7202_v19 = vadd.f32 %v7200_v6, %v10490_v16 }
0x2520   :  { %v7208_v20 = vsel %vm162_vm1, %v7202_v19, 0.0  ;;  %v7201_v24 = vadd.f32 %v7743_v56, %v7191_v18 }
0x2521   :  { %7209 = vadd.xlane.f32.xlu1 %v7208_v20 }
0x2522   :  { %v7203_v23 = vadd.f32 %v7201_v24, %v10510_v38 }
0x2524   :  { %v7211_v25 = vsel %vm162_vm1, %v7203_v23, 0.0 }
0x2525   :  { %7212 = vadd.xlane.f32.xlu0 %v7211_v25 }
0x25aa   :  { %v7210_v26 = vpop.xlane.xlu1 %7209 }
0x25ab   :  { %v7214_v17 = vmul.f32 0.03125, %v7210_v26 }
0x25ad   :  { %v7216_v27 = vsub.f32 %v7202_v19, %v7214_v17 }
0x25ae   :  { %v7213_v28 = vpop.xlane.xlu0 %7212 }
0x25af   :  { %v7215_v29 = vmul.f32 0.03125, %v7213_v28  ;;  %v7218_v30 = vmul.f32 %v7216_v27, %v7216_v27 }
0x25b1   :  { %v7217_v34 = vsub.f32 %v7203_v23, %v7215_v29  ;;  %v7220_v9 = vsel %vm162_vm1, %v7218_v30, 0.0 }
0x25b2   :  { %7221 = vadd.xlane.f32.xlu1 %v7220_v9 }
0x25b3   :  { %v7219_v16 = vmul.f32 %v7217_v34, %v7217_v34 }
0x25b5   :  { %v7223_v31 = vsel %vm162_vm1, %v7219_v16, 0.0 }
0x25b6   :  { %7224 = vadd.xlane.f32.xlu0 %v7223_v31 }
0x263b   :  { %v7222_v33 = vpop.xlane.xlu1 %7221 }
0x263c   :  { %v7226_v35 = vmul.f32 0.03125, %v7222_v33 }
0x263e   :  { %v7228_v38 = vadd.f32 1e-05, %v7226_v35 }
0x263f   :  { %v7225_v36 = vpop.xlane.xlu0 %7224 }
0x2640   :  { %8779 = vrsqrt.f32 %v7228_v38  ;;  %v7227_v39 = vmul.f32 0.03125, %v7225_v36 }
0x2642   :  { %v7229_v14 = vadd.f32 1e-05, %v7227_v39 }
0x2644   :  { %8781 = vrsqrt.f32 %v7229_v14 }
0x264d   :  { %v8780_v32 = vpop.eup %8779 }
0x264e   :  { %v7232_v41 = vmul.f32 %v8780_v32, %v7216_v27 }
0x2650   :  { %v7240_v43 = vmul.f32 %v7746_v37, %v7232_v41 }
0x2651   :  { %v8782_v21 = vpop.eup %8781 }
0x2652   :  { %v7233_v45 = vmul.f32 %v8782_v21, %v7217_v34  ;;  %v7248_v44 = vadd.f32 %v7747_v42, %v7240_v43 }
0x2654   :  { %v7241_v46 = vmul.f32 %v7746_v37, %v7233_v45  ;;  %v7250_v48 = vsel %vm162_vm1, %v7248_v44, 0.0 }
0x2655   :  { %v7251_v49 = vrot.slane %v7250_v48, 4 }
0x2656   :  { %v7249_v51 = vadd.f32 %v7747_v42, %v7241_v46 }
0x2657   :  { %v7252_v52 = vadd.f32 %v7251_v49, %v7250_v48 }
0x2658   :  { %v7257_v53 = vsel %vm162_vm1, %v7249_v51, 0.0 }
0x2659   :  { %v7253_v54 = vrot.slane %v7252_v52, 2  ;;  %v7258_v55 = vrot.slane %v7257_v53, 4 }
0x265b   :  { %v7254_v60 = vadd.f32 %v7253_v54, %v7252_v52  ;;  %v7259_v62 = vadd.f32 %v7258_v55, %v7257_v53 }
0x265d   :  { %v7255_v63 = vrot.slane %v7254_v60, 1  ;;  %v7260_v57 = vrot.slane %v7259_v62, 2 }
0x265f   :  { %v7261_v0 = vadd.f32 %v7260_v57, %v7259_v62  ;;  %v7256_v1 = vadd.f32 %v7255_v63, %v7254_v60 }
0x2661   :  { %v7262_v2 = vrot.slane %v7261_v0, 1  ;;  %v7265_v59 = vmul.f32 0.125, %v7256_v1 }
0x2663   :  { %v7263_v47 = vadd.f32 %v7262_v2, %v7261_v0 }
0x2665   :  { %v7266_v22 = vmul.f32 0.125, %v7263_v47 }
0x2667   :  { %v7270_v3 = vsel %vm7269_vm4, %v7266_v22, %v7265_v59 }
0x2668   :  { %7273 = vst.msk [vmem:[#allocation2] sm:$0x3] %vm7272_vm5, %v7270_v3 }
0x2669   :  { %8794 = shalt.err (!%p8791_p4)
}
0x266a   :  { %7283 = dma.vmem_to_hbm [thread:$0]  %s7281_s11, 32, %s11534_s16, [#allocation3]  }
0x266b   :  { %8803 = dma.done.wait [#allocation3], 32  }
0x266c   :  { %8804 = vsyncadd [#allocation3], 4294967264 }
0x266d   :  { %7287 = vsyncpa [#allocation3], 1 }

</bundles_post_ra>
